<compile_context>
chip_gen: v7x
topology: tpu7x:2x2x1
jax: 0.10.0
libtpu: 0.0.40
codegen_flags: <defaults>
</compile_context>

<pallas_src>
import jax
import jax.numpy as jnp
from jax import lax
from jax.experimental import pallas as pl

# ---- small deterministic "hyperparameters" (mirror hp.* of the repo) ----
NUM_MELS = 16           # hp.num_mels
HIDDEN = 16             # hp.hidden_size
NUM_UNITS = 2 * HIDDEN  # AttentionDecoder num_units = hp.hidden_size * 2
R = 2                   # hp.outputs_per_step
MAX_ITERS = 4           # hp.max_iters (inference loop length)


def mel_decoder_kernel(dec_in_ref, mem_ref, keys_ref,
                       p1w_ref, p1b_ref, p2w_ref, p2b_ref,
                       w2_ref, v_ref,
                       a_w_ref, a_b_ref, g1_w_ref, g1_b_ref, g2_w_ref, g2_b_ref,
                       apdt_ref, apdp_ref, apb_ref,
                       ow_ref, ob_ref, owl_ref, obl_ref,
                       out_ref):
    U = NUM_UNITS

    # Hoist all loop-invariant loads out of the timestep loop.
    mem = mem_ref[...]                       # (B, L, U)
    keys = keys_ref[...]                     # (B, L, U)  -- precomputed memory @ W1.T
    v = v_ref[...]                           # (1, U)
    p1w = p1w_ref[...]; p1b = p1b_ref[...]
    p2w = p2w_ref[...]; p2b = p2b_ref[...]
    w2 = w2_ref[...]
    a_w = a_w_ref[...]; a_b = a_b_ref[...]
    g1_w = g1_w_ref[...]; g1_b = g1_b_ref[...]
    g2_w = g2_w_ref[...]; g2_b = g2_b_ref[...]
    apdt = apdt_ref[...]; apdp = apdp_ref[...]; apb = apb_ref[...]
    ow = ow_ref[...]; ob = ob_ref[...]
    owl = owl_ref[...]; obl = obl_ref[...]

    B = mem.shape[0]

    def gru(x, h, w, b):
        """PyTorch nn.GRUCell, single fused matmul.

        w columns: [r | z | gi_n | gh_n]; b = [bih_r+bhh_r | bih_z+bhh_z | bih_n | bhh_n].
        """
        g = jnp.dot(jnp.concatenate([x, h], axis=1), w,
                    preferred_element_type=jnp.float32) + b          # (B, 4U)
        r = jax.nn.sigmoid(g[:, :U])
        z = jax.nn.sigmoid(g[:, U:2 * U])
        n = jnp.tanh(g[:, 2 * U:3 * U] + r * g[:, 3 * U:])
        return (1.0 - z) * n + z * h

    def step(t, carry):
        attn_h, g1h, g2h, prev = carry                                 # all (B, *)

        # ---- Prenet (eval mode: Dropout == identity) ----
        h1 = jnp.maximum(jnp.dot(prev, p1w, preferred_element_type=jnp.float32) + p1b, 0.0)
        p = jnp.maximum(jnp.dot(h1, p2w, preferred_element_type=jnp.float32) + p2b, 0.0)

        # ---- attention GRU cell ----
        d_t = gru(p, attn_h, a_w, a_b)                                 # (B, U)

        # ---- Vinyals attention (keys precomputed) ----
        d_dup = jnp.dot(d_t, w2, preferred_element_type=jnp.float32)   # (B, U)
        scores = jnp.sum(jnp.tanh(keys + d_dup[:, None, :]) * v, axis=-1)  # (B, L)
        scores = scores - jnp.max(scores, axis=-1, keepdims=True)
        ex = jnp.exp(scores)
        attn = ex / jnp.sum(ex, axis=-1, keepdims=True)
        d_prime = jnp.sum(attn[:, :, None] * mem, axis=1)              # (B, U)

        # ---- projection (split, no lane concat) + two residual GRU cells ----
        gru1_in = (jnp.dot(d_t, apdt, preferred_element_type=jnp.float32)
                   + jnp.dot(d_prime, apdp, preferred_element_type=jnp.float32) + apb)
        g1 = gru(gru1_in, g1h, g1_w, g1_b)
        gru2_in = gru1_in + g1
        g2 = gru(gru2_in, g2h, g2_w, g2_b)
        bf = gru2_in + g2

        # ---- output linear (full frame) + last-mel-frame feedback ----
        out_ref[t] = jnp.dot(bf, ow, preferred_element_type=jnp.float32) + ob   # (B, M*R)
        prev_next = jnp.dot(bf, owl, preferred_element_type=jnp.float32) + obl  # (B, M)
        return (d_t, g1, g2, prev_next)

    z0 = jnp.zeros((B, U), jnp.float32)     # AttentionDecoder.inithidden
    lax.fori_loop(0, MAX_ITERS, step, (z0, z0, z0, dec_in_ref[...]), unroll=True)


def _fuse_gru(wih, whh, bih, bhh):
    """Build the fused (in+U, 4U) GRU weight and (1, 4U) bias (columns r|z|gi_n|gh_n)."""
    in_dim = wih.shape[1]
    U = whh.shape[1]
    wx = wih.T                                              # (in, 3U)
    wh = whh.T                                              # (U, 3U)
    w_x = jnp.concatenate([wx[:, :2 * U], wx[:, 2 * U:],
                           jnp.zeros((in_dim, U), jnp.float32)], axis=1)   # (in, 4U)
    w_h = jnp.concatenate([wh[:, :2 * U],
                           jnp.zeros((U, U), jnp.float32), wh[:, 2 * U:]], axis=1)  # (U, 4U)
    w = jnp.concatenate([w_x, w_h], axis=0)                 # (in+U, 4U)
    b = jnp.concatenate([bih[:2 * U] + bhh[:2 * U], bih[2 * U:], bhh[2 * U:]]).reshape(1, 4 * U)
    return w, b


def mel_decoder_forward(decoder_input, memory, params):
    B = decoder_input.shape[0]
    U = NUM_UNITS

    def row(x):  # biases as (1, N) rows for clean 2-D VMEM layout
        return x.reshape(1, -1)

    # Loop-invariant attention key projection, computed once host-side.
    keys = jnp.einsum('blu,vu->blv', memory, params['w1'])

    a_w, a_b = _fuse_gru(params['a_wih'], params['a_whh'], params['a_bih'], params['a_bhh'])
    g1_w, g1_b = _fuse_gru(params['g1_wih'], params['g1_whh'], params['g1_bih'], params['g1_bhh'])
    g2_w, g2_b = _fuse_gru(params['g2_wih'], params['g2_whh'], params['g2_bih'], params['g2_bhh'])

    inputs = [
        decoder_input[:, :, 0],                    # GO frame (B, M)
        memory, keys,
        params['p1w'].T, row(params['p1b']),
        params['p2w'].T, row(params['p2b']),
        params['w2'].T, params['v'],
        a_w, a_b, g1_w, g1_b, g2_w, g2_b,
        params['ap_w'][:, :U].T, params['ap_w'][:, U:].T, row(params['ap_b']),
        params['out_w'].T, row(params['out_b']),
        params['out_w'][R - 1::R, :].T, row(params['out_b'][R - 1::R]),
    ]

    # Single invocation: no grid, whole arrays resident in VMEM, one writeback.
    out = pl.pallas_call(
        mel_decoder_kernel,
        out_shape=jax.ShapeDtypeStruct((MAX_ITERS, B, NUM_MELS * R), jnp.float32),
    )(*inputs)

    # (T, B, M*R) -> (B, M, T*R), exactly torch.cat(outputs, dim=2)
    out = out.reshape(MAX_ITERS, B, NUM_MELS, R).transpose(1, 2, 0, 3)
    return out.reshape(B, NUM_MELS, MAX_ITERS * R)


def init_params(key):
    ks = jax.random.split(key, 23)
    M, H, U = NUM_MELS, HIDDEN, NUM_UNITS

    def w(i, shape):
        return jax.random.normal(ks[i], shape, jnp.float32) * 0.1

    return dict(
        # Prenet: Linear(M, 2H)=Linear(M, U), Linear(U, H)
        p1w=w(0, (U, M)), p1b=w(1, (U,)),
        p2w=w(2, (H, U)), p2b=w(3, (H,)),
        # attention linears
        w1=w(4, (U, U)), w2=w(5, (U, U)), v=w(6, (1, U)),
        # GRUCell(H, U)
        a_wih=w(7, (3 * U, H)), a_whh=w(8, (3 * U, U)),
        a_bih=w(9, (3 * U,)), a_bhh=w(10, (3 * U,)),
        # GRUCell(U, U) x2
        g1_wih=w(11, (3 * U, U)), g1_whh=w(12, (3 * U, U)),
        g1_bih=w(13, (3 * U,)), g1_bhh=w(14, (3 * U,)),
        g2_wih=w(15, (3 * U, U)), g2_whh=w(16, (3 * U, U)),
        g2_bih=w(17, (3 * U,)), g2_bhh=w(18, (3 * U,)),
        # attn_projection: Linear(2U, U); out: Linear(U, M*R)
        ap_w=w(19, (U, 2 * U)), ap_b=w(20, (U,)),
        out_w=w(21, (M * R, U)), out_b=w(22, (M * R,)),
    )


def reference_forward(decoder_input, memory, p):
    """Pure-JAX replica of the PyTorch eval path, for verification."""
    B = decoder_input.shape[0]

    def gru(x, h, wih, whh, bih, bhh):
        u = h.shape[1]
        gi = x @ wih.T + bih
        gh = h @ whh.T + bhh
        r = jax.nn.sigmoid(gi[:, :u] + gh[:, :u])
        z = jax.nn.sigmoid(gi[:, u:2 * u] + gh[:, u:2 * u])
        n = jnp.tanh(gi[:, 2 * u:] + r * gh[:, 2 * u:])
        return (1 - z) * n + z * h

    attn_h = jnp.zeros((B, NUM_UNITS))
    g1h = jnp.zeros((B, NUM_UNITS))
    g2h = jnp.zeros((B, NUM_UNITS))
    prev = decoder_input
    outs = []
    for _ in range(MAX_ITERS):
        x = prev[:, :, 0]
        h1 = jax.nn.relu(x @ p['p1w'].T + p['p1b'])
        pre = jax.nn.relu(h1 @ p['p2w'].T + p['p2b'])
        d_t = gru(pre, attn_h, p['a_wih'], p['a_whh'], p['a_bih'], p['a_bhh'])
        keys = jnp.einsum('blu,vu->blv', memory, p['w1'])
        d_dup = d_t @ p['w2'].T
        scores = jnp.sum(jnp.tanh(keys + d_dup[:, None, :]) * p['v'][0], axis=-1)
        attn = jax.nn.softmax(scores, axis=-1)
        d_prime = jnp.einsum('bl,blu->bu', attn, memory)
        gru1_in = jnp.concatenate([d_t, d_prime], axis=1) @ p['ap_w'].T + p['ap_b']
        g1h = gru(gru1_in, g1h, p['g1_wih'], p['g1_whh'], p['g1_bih'], p['g1_bhh'])
        gru2_in = gru1_in + g1h
        g2h = gru(gru2_in, g2h, p['g2_wih'], p['g2_whh'], p['g2_bih'], p['g2_bhh'])
        bf = gru2_in + g2h
        out3 = (bf @ p['out_w'].T + p['out_b']).reshape(B, NUM_MELS, R)
        outs.append(out3)
        attn_h = d_t
        prev = out3[:, :, -1:]
    return jnp.concatenate(outs, axis=2)


if __name__ == "__main__":
    key = jax.random.PRNGKey(0)
    kp, kd, km = jax.random.split(key, 3)
    params = init_params(kp)

    B, L = 2, 8
    decoder_input = jax.random.normal(kd, (B, NUM_MELS, 1), jnp.float32)  # GO frame (B, num_mels, 1)
    memory = jax.random.normal(km, (B, L, NUM_UNITS), jnp.float32)        # encoder memory (B, L, 2*hidden)

    out = mel_decoder_forward(decoder_input, memory, params)
    out = jax.block_until_ready(out)

    ref = reference_forward(decoder_input, memory, params)
    assert out.shape == (B, NUM_MELS, MAX_ITERS * R), out.shape
    assert bool(jnp.all(jnp.isfinite(out)))
    assert bool(jnp.allclose(out, ref, rtol=1e-2, atol=1e-2)), \
        float(jnp.max(jnp.abs(out - ref)))
    print("KERNEL_OK")
</pallas_src>

<mosaic_0001>
module attributes {stable_mosaic.version = 11 : i64} {
  func.func @mel_decoder_kernel(%arg0: memref<2x16xf32, #tpu.memory_space<vmem>>, %arg1: memref<2x8x32xf32, #tpu.memory_space<vmem>>, %arg2: memref<2x8x32xf32, #tpu.memory_space<vmem>>, %arg3: memref<16x32xf32, #tpu.memory_space<vmem>>, %arg4: memref<1x32xf32, #tpu.memory_space<vmem>>, %arg5: memref<32x16xf32, #tpu.memory_space<vmem>>, %arg6: memref<1x16xf32, #tpu.memory_space<vmem>>, %arg7: memref<32x32xf32, #tpu.memory_space<vmem>>, %arg8: memref<1x32xf32, #tpu.memory_space<vmem>>, %arg9: memref<48x128xf32, #tpu.memory_space<vmem>>, %arg10: memref<1x128xf32, #tpu.memory_space<vmem>>, %arg11: memref<64x128xf32, #tpu.memory_space<vmem>>, %arg12: memref<1x128xf32, #tpu.memory_space<vmem>>, %arg13: memref<64x128xf32, #tpu.memory_space<vmem>>, %arg14: memref<1x128xf32, #tpu.memory_space<vmem>>, %arg15: memref<32x32xf32, #tpu.memory_space<vmem>>, %arg16: memref<32x32xf32, #tpu.memory_space<vmem>>, %arg17: memref<1x32xf32, #tpu.memory_space<vmem>>, %arg18: memref<32x32xf32, #tpu.memory_space<vmem>>, %arg19: memref<1x32xf32, #tpu.memory_space<vmem>>, %arg20: memref<32x16xf32, #tpu.memory_space<vmem>>, %arg21: memref<1x16xf32, #tpu.memory_space<vmem>>, %arg22: memref<4x2x32xf32, #tpu.memory_space<vmem>>) attributes {dimension_semantics = [], scalar_prefetch = 0 : i64, scratch_operands = 0 : i64, tpu.core_type = #tpu.core_type<tc>} {
    %c0 = arith.constant 0 : index
    %c0_0 = arith.constant 0 : index
    %c0_1 = arith.constant 0 : index
    %0 = vector.load %arg1[%c0, %c0_0, %c0_1] : memref<2x8x32xf32, #tpu.memory_space<vmem>>, vector<2x8x32xf32>
    %c0_2 = arith.constant 0 : index
    %c0_3 = arith.constant 0 : index
    %c0_4 = arith.constant 0 : index
    %1 = vector.load %arg2[%c0_2, %c0_3, %c0_4] : memref<2x8x32xf32, #tpu.memory_space<vmem>>, vector<2x8x32xf32>
    %c0_5 = arith.constant 0 : index
    %c0_6 = arith.constant 0 : index
    %2 = vector.load %arg8[%c0_5, %c0_6] : memref<1x32xf32, #tpu.memory_space<vmem>>, vector<1x32xf32>
    %c0_7 = arith.constant 0 : index
    %c0_8 = arith.constant 0 : index
    %3 = vector.load %arg3[%c0_7, %c0_8] : memref<16x32xf32, #tpu.memory_space<vmem>>, vector<16x32xf32>
    %c0_9 = arith.constant 0 : index
    %c0_10 = arith.constant 0 : index
    %4 = vector.load %arg4[%c0_9, %c0_10] : memref<1x32xf32, #tpu.memory_space<vmem>>, vector<1x32xf32>
    %c0_11 = arith.constant 0 : index
    %c0_12 = arith.constant 0 : index
    %5 = vector.load %arg5[%c0_11, %c0_12] : memref<32x16xf32, #tpu.memory_space<vmem>>, vector<32x16xf32>
    %c0_13 = arith.constant 0 : index
    %c0_14 = arith.constant 0 : index
    %6 = vector.load %arg6[%c0_13, %c0_14] : memref<1x16xf32, #tpu.memory_space<vmem>>, vector<1x16xf32>
    %c0_15 = arith.constant 0 : index
    %c0_16 = arith.constant 0 : index
    %7 = vector.load %arg7[%c0_15, %c0_16] : memref<32x32xf32, #tpu.memory_space<vmem>>, vector<32x32xf32>
    %c0_17 = arith.constant 0 : index
    %c0_18 = arith.constant 0 : index
    %8 = vector.load %arg9[%c0_17, %c0_18] : memref<48x128xf32, #tpu.memory_space<vmem>>, vector<48x128xf32>
    %c0_19 = arith.constant 0 : index
    %c0_20 = arith.constant 0 : index
    %9 = vector.load %arg10[%c0_19, %c0_20] : memref<1x128xf32, #tpu.memory_space<vmem>>, vector<1x128xf32>
    %c0_21 = arith.constant 0 : index
    %c0_22 = arith.constant 0 : index
    %10 = vector.load %arg11[%c0_21, %c0_22] : memref<64x128xf32, #tpu.memory_space<vmem>>, vector<64x128xf32>
    %c0_23 = arith.constant 0 : index
    %c0_24 = arith.constant 0 : index
    %11 = vector.load %arg12[%c0_23, %c0_24] : memref<1x128xf32, #tpu.memory_space<vmem>>, vector<1x128xf32>
    %c0_25 = arith.constant 0 : index
    %c0_26 = arith.constant 0 : index
    %12 = vector.load %arg13[%c0_25, %c0_26] : memref<64x128xf32, #tpu.memory_space<vmem>>, vector<64x128xf32>
    %c0_27 = arith.constant 0 : index
    %c0_28 = arith.constant 0 : index
    %13 = vector.load %arg14[%c0_27, %c0_28] : memref<1x128xf32, #tpu.memory_space<vmem>>, vector<1x128xf32>
    %c0_29 = arith.constant 0 : index
    %c0_30 = arith.constant 0 : index
    %14 = vector.load %arg15[%c0_29, %c0_30] : memref<32x32xf32, #tpu.memory_space<vmem>>, vector<32x32xf32>
    %c0_31 = arith.constant 0 : index
    %c0_32 = arith.constant 0 : index
    %15 = vector.load %arg16[%c0_31, %c0_32] : memref<32x32xf32, #tpu.memory_space<vmem>>, vector<32x32xf32>
    %c0_33 = arith.constant 0 : index
    %c0_34 = arith.constant 0 : index
    %16 = vector.load %arg17[%c0_33, %c0_34] : memref<1x32xf32, #tpu.memory_space<vmem>>, vector<1x32xf32>
    %c0_35 = arith.constant 0 : index
    %c0_36 = arith.constant 0 : index
    %17 = vector.load %arg18[%c0_35, %c0_36] : memref<32x32xf32, #tpu.memory_space<vmem>>, vector<32x32xf32>
    %c0_37 = arith.constant 0 : index
    %c0_38 = arith.constant 0 : index
    %18 = vector.load %arg19[%c0_37, %c0_38] : memref<1x32xf32, #tpu.memory_space<vmem>>, vector<1x32xf32>
    %c0_39 = arith.constant 0 : index
    %c0_40 = arith.constant 0 : index
    %19 = vector.load %arg20[%c0_39, %c0_40] : memref<32x16xf32, #tpu.memory_space<vmem>>, vector<32x16xf32>
    %c0_41 = arith.constant 0 : index
    %c0_42 = arith.constant 0 : index
    %20 = vector.load %arg21[%c0_41, %c0_42] : memref<1x16xf32, #tpu.memory_space<vmem>>, vector<1x16xf32>
    %cst = arith.constant 0.000000e+00 : f32
    %21 = vector.broadcast %cst : f32 to vector<2x32xf32>
    %c0_43 = arith.constant 0 : index
    %c0_44 = arith.constant 0 : index
    %22 = vector.load %arg0[%c0_43, %c0_44] : memref<2x16xf32, #tpu.memory_space<vmem>>, vector<2x16xf32>
    %c0_i32 = arith.constant 0 : i32
    %cst_45 = arith.constant dense<0.000000e+00> : vector<2x32xf32>
    %23 = tpu.matmul %22, %3, %cst_45 {dimension_numbers = #tpu.dot_dimension_numbers<[1], [0], [0], [1], [0, 0, 1, 1], [], []>} : vector<2x16xf32>, vector<16x32xf32>, vector<2x32xf32> -> vector<2x32xf32>
    %24 = vector.broadcast %4 : vector<1x32xf32> to vector<2x32xf32>
    %25 = arith.addf %23, %24 : vector<2x32xf32>
    %cst_46 = arith.constant 0.000000e+00 : f32
    %26 = vector.broadcast %cst_46 : f32 to vector<2x32xf32>
    %27 = arith.maximumf %25, %26 : vector<2x32xf32>
    %cst_47 = arith.constant dense<0.000000e+00> : vector<2x16xf32>
    %28 = tpu.matmul %27, %5, %cst_47 {dimension_numbers = #tpu.dot_dimension_numbers<[1], [0], [0], [1], [0, 0, 1, 1], [], []>} : vector<2x32xf32>, vector<32x16xf32>, vector<2x16xf32> -> vector<2x16xf32>
    %29 = vector.broadcast %6 : vector<1x16xf32> to vector<2x16xf32>
    %30 = arith.addf %28, %29 : vector<2x16xf32>
    %cst_48 = arith.constant 0.000000e+00 : f32
    %31 = vector.broadcast %cst_48 : f32 to vector<2x16xf32>
    %32 = arith.maximumf %30, %31 : vector<2x16xf32>
    %33 = tpu.concatenate %32, %21 in 1 : vector<2x16xf32>, vector<2x32xf32> -> vector<2x48xf32>
    %cst_49 = arith.constant dense<0.000000e+00> : vector<2x128xf32>
    %34 = tpu.matmul %33, %8, %cst_49 {dimension_numbers = #tpu.dot_dimension_numbers<[1], [0], [0], [1], [0, 0, 1, 1], [], []>} : vector<2x48xf32>, vector<48x128xf32>, vector<2x128xf32> -> vector<2x128xf32>
    %35 = vector.broadcast %9 : vector<1x128xf32> to vector<2x128xf32>
    %36 = arith.addf %34, %35 : vector<2x128xf32>
    %37 = vector.extract_strided_slice %36 {offsets = [0, 0], sizes = [2, 32], strides = [1, 1]} : vector<2x128xf32> to vector<2x32xf32>
    %38 = arith.negf %37 : vector<2x32xf32>
    %39 = math.exp %38 : vector<2x32xf32>
    %cst_50 = arith.constant 1.000000e+00 : f32
    %40 = vector.broadcast %cst_50 : f32 to vector<2x32xf32>
    %41 = arith.addf %40, %39 : vector<2x32xf32>
    %42 = arith.divf %40, %41 : vector<2x32xf32>
    %43 = vector.extract_strided_slice %36 {offsets = [0, 32], sizes = [2, 32], strides = [1, 1]} : vector<2x128xf32> to vector<2x32xf32>
    %44 = arith.negf %43 : vector<2x32xf32>
    %45 = math.exp %44 : vector<2x32xf32>
    %cst_51 = arith.constant 1.000000e+00 : f32
    %46 = vector.broadcast %cst_51 : f32 to vector<2x32xf32>
    %47 = arith.addf %46, %45 : vector<2x32xf32>
    %48 = arith.divf %46, %47 : vector<2x32xf32>
    %49 = vector.extract_strided_slice %36 {offsets = [0, 64], sizes = [2, 32], strides = [1, 1]} : vector<2x128xf32> to vector<2x32xf32>
    %50 = vector.extract_strided_slice %36 {offsets = [0, 96], sizes = [2, 32], strides = [1, 1]} : vector<2x128xf32> to vector<2x32xf32>
    %51 = arith.mulf %42, %50 : vector<2x32xf32>
    %52 = arith.addf %49, %51 : vector<2x32xf32>
    %53 = math.tanh %52 : vector<2x32xf32>
    %cst_52 = arith.constant 1.000000e+00 : f32
    %54 = vector.broadcast %cst_52 : f32 to vector<2x32xf32>
    %55 = arith.subf %54, %48 : vector<2x32xf32>
    %56 = arith.mulf %55, %53 : vector<2x32xf32>
    %57 = arith.mulf %48, %21 : vector<2x32xf32>
    %58 = arith.addf %56, %57 : vector<2x32xf32>
    %cst_53 = arith.constant dense<0.000000e+00> : vector<2x32xf32>
    %59 = tpu.matmul %58, %7, %cst_53 {dimension_numbers = #tpu.dot_dimension_numbers<[1], [0], [0], [1], [0, 0, 1, 1], [], []>} : vector<2x32xf32>, vector<32x32xf32>, vector<2x32xf32> -> vector<2x32xf32>
    %60 = vector.shape_cast %59 : vector<2x32xf32> to vector<2x1x32xf32>
    %61 = vector.broadcast %60 : vector<2x1x32xf32> to vector<2x8x32xf32>
    %62 = arith.addf %1, %61 : vector<2x8x32xf32>
    %63 = math.tanh %62 : vector<2x8x32xf32>
    %64 = vector.shape_cast %2 : vector<1x32xf32> to vector<1x1x32xf32>
    %65 = vector.broadcast %64 : vector<1x1x32xf32> to vector<2x8x32xf32>
    %66 = arith.mulf %63, %65 : vector<2x8x32xf32>
    %cst_54 = arith.constant dense<0.000000e+00> : vector<2x8xf32>
    %67 = vector.multi_reduction <add>, %66, %cst_54 [2] : vector<2x8x32xf32> to vector<2x8xf32>
    %cst_55 = arith.constant dense<0xFF800000> : vector<2xf32>
    %68 = vector.multi_reduction <maximumf>, %67, %cst_55 [1] : vector<2x8xf32> to vector<2xf32>
    %69 = vector.shape_cast %68 : vector<2xf32> to vector<2x1xf32>
    %70 = vector.broadcast %69 : vector<2x1xf32> to vector<2x8xf32>
    %71 = arith.subf %67, %70 : vector<2x8xf32>
    %72 = math.exp %71 : vector<2x8xf32>
    %cst_56 = arith.constant dense<0.000000e+00> : vector<2xf32>
    %73 = vector.multi_reduction <add>, %72, %cst_56 [1] : vector<2x8xf32> to vector<2xf32>
    %74 = vector.shape_cast %73 : vector<2xf32> to vector<2x1xf32>
    %75 = vector.broadcast %74 : vector<2x1xf32> to vector<2x8xf32>
    %76 = arith.divf %72, %75 : vector<2x8xf32>
    %77 = vector.shape_cast %76 : vector<2x8xf32> to vector<2x8x1xf32>
    %78 = vector.broadcast %77 : vector<2x8x1xf32> to vector<2x8x32xf32>
    %79 = arith.mulf %78, %0 : vector<2x8x32xf32>
    %cst_57 = arith.constant dense<0.000000e+00> : vector<2x32xf32>
    %80 = vector.multi_reduction <add>, %79, %cst_57 [1] : vector<2x8x32xf32> to vector<2x32xf32>
    %cst_58 = arith.constant dense<0.000000e+00> : vector<2x32xf32>
    %81 = tpu.matmul %58, %14, %cst_58 {dimension_numbers = #tpu.dot_dimension_numbers<[1], [0], [0], [1], [0, 0, 1, 1], [], []>} : vector<2x32xf32>, vector<32x32xf32>, vector<2x32xf32> -> vector<2x32xf32>
    %cst_59 = arith.constant dense<0.000000e+00> : vector<2x32xf32>
    %82 = tpu.matmul %80, %15, %cst_59 {dimension_numbers = #tpu.dot_dimension_numbers<[1], [0], [0], [1], [0, 0, 1, 1], [], []>} : vector<2x32xf32>, vector<32x32xf32>, vector<2x32xf32> -> vector<2x32xf32>
    %83 = arith.addf %81, %82 : vector<2x32xf32>
    %84 = vector.broadcast %16 : vector<1x32xf32> to vector<2x32xf32>
    %85 = arith.addf %83, %84 : vector<2x32xf32>
    %86 = tpu.concatenate %85, %21 in 1 : vector<2x32xf32>, vector<2x32xf32> -> vector<2x64xf32>
    %cst_60 = arith.constant dense<0.000000e+00> : vector<2x128xf32>
    %87 = tpu.matmul %86, %10, %cst_60 {dimension_numbers = #tpu.dot_dimension_numbers<[1], [0], [0], [1], [0, 0, 1, 1], [], []>} : vector<2x64xf32>, vector<64x128xf32>, vector<2x128xf32> -> vector<2x128xf32>
    %88 = vector.broadcast %11 : vector<1x128xf32> to vector<2x128xf32>
    %89 = arith.addf %87, %88 : vector<2x128xf32>
    %90 = vector.extract_strided_slice %89 {offsets = [0, 0], sizes = [2, 32], strides = [1, 1]} : vector<2x128xf32> to vector<2x32xf32>
    %91 = arith.negf %90 : vector<2x32xf32>
    %92 = math.exp %91 : vector<2x32xf32>
    %cst_61 = arith.constant 1.000000e+00 : f32
    %93 = vector.broadcast %cst_61 : f32 to vector<2x32xf32>
    %94 = arith.addf %93, %92 : vector<2x32xf32>
    %95 = arith.divf %93, %94 : vector<2x32xf32>
    %96 = vector.extract_strided_slice %89 {offsets = [0, 32], sizes = [2, 32], strides = [1, 1]} : vector<2x128xf32> to vector<2x32xf32>
    %97 = arith.negf %96 : vector<2x32xf32>
    %98 = math.exp %97 : vector<2x32xf32>
    %cst_62 = arith.constant 1.000000e+00 : f32
    %99 = vector.broadcast %cst_62 : f32 to vector<2x32xf32>
    %100 = arith.addf %99, %98 : vector<2x32xf32>
    %101 = arith.divf %99, %100 : vector<2x32xf32>
    %102 = vector.extract_strided_slice %89 {offsets = [0, 64], sizes = [2, 32], strides = [1, 1]} : vector<2x128xf32> to vector<2x32xf32>
    %103 = vector.extract_strided_slice %89 {offsets = [0, 96], sizes = [2, 32], strides = [1, 1]} : vector<2x128xf32> to vector<2x32xf32>
    %104 = arith.mulf %95, %103 : vector<2x32xf32>
    %105 = arith.addf %102, %104 : vector<2x32xf32>
    %106 = math.tanh %105 : vector<2x32xf32>
    %cst_63 = arith.constant 1.000000e+00 : f32
    %107 = vector.broadcast %cst_63 : f32 to vector<2x32xf32>
    %108 = arith.subf %107, %101 : vector<2x32xf32>
    %109 = arith.mulf %108, %106 : vector<2x32xf32>
    %110 = arith.mulf %101, %21 : vector<2x32xf32>
    %111 = arith.addf %109, %110 : vector<2x32xf32>
    %112 = arith.addf %85, %111 : vector<2x32xf32>
    %113 = tpu.concatenate %112, %21 in 1 : vector<2x32xf32>, vector<2x32xf32> -> vector<2x64xf32>
    %cst_64 = arith.constant dense<0.000000e+00> : vector<2x128xf32>
    %114 = tpu.matmul %113, %12, %cst_64 {dimension_numbers = #tpu.dot_dimension_numbers<[1], [0], [0], [1], [0, 0, 1, 1], [], []>} : vector<2x64xf32>, vector<64x128xf32>, vector<2x128xf32> -> vector<2x128xf32>
    %115 = vector.broadcast %13 : vector<1x128xf32> to vector<2x128xf32>
    %116 = arith.addf %114, %115 : vector<2x128xf32>
    %117 = vector.extract_strided_slice %116 {offsets = [0, 0], sizes = [2, 32], strides = [1, 1]} : vector<2x128xf32> to vector<2x32xf32>
    %118 = arith.negf %117 : vector<2x32xf32>
    %119 = math.exp %118 : vector<2x32xf32>
    %cst_65 = arith.constant 1.000000e+00 : f32
    %120 = vector.broadcast %cst_65 : f32 to vector<2x32xf32>
    %121 = arith.addf %120, %119 : vector<2x32xf32>
    %122 = arith.divf %120, %121 : vector<2x32xf32>
    %123 = vector.extract_strided_slice %116 {offsets = [0, 32], sizes = [2, 32], strides = [1, 1]} : vector<2x128xf32> to vector<2x32xf32>
    %124 = arith.negf %123 : vector<2x32xf32>
    %125 = math.exp %124 : vector<2x32xf32>
    %cst_66 = arith.constant 1.000000e+00 : f32
    %126 = vector.broadcast %cst_66 : f32 to vector<2x32xf32>
    %127 = arith.addf %126, %125 : vector<2x32xf32>
    %128 = arith.divf %126, %127 : vector<2x32xf32>
    %129 = vector.extract_strided_slice %116 {offsets = [0, 64], sizes = [2, 32], strides = [1, 1]} : vector<2x128xf32> to vector<2x32xf32>
    %130 = vector.extract_strided_slice %116 {offsets = [0, 96], sizes = [2, 32], strides = [1, 1]} : vector<2x128xf32> to vector<2x32xf32>
    %131 = arith.mulf %122, %130 : vector<2x32xf32>
    %132 = arith.addf %129, %131 : vector<2x32xf32>
    %133 = math.tanh %132 : vector<2x32xf32>
    %cst_67 = arith.constant 1.000000e+00 : f32
    %134 = vector.broadcast %cst_67 : f32 to vector<2x32xf32>
    %135 = arith.subf %134, %128 : vector<2x32xf32>
    %136 = arith.mulf %135, %133 : vector<2x32xf32>
    %137 = arith.mulf %128, %21 : vector<2x32xf32>
    %138 = arith.addf %136, %137 : vector<2x32xf32>
    %139 = arith.addf %112, %138 : vector<2x32xf32>
    %cst_68 = arith.constant dense<0.000000e+00> : vector<2x32xf32>
    %140 = tpu.matmul %139, %17, %cst_68 {dimension_numbers = #tpu.dot_dimension_numbers<[1], [0], [0], [1], [0, 0, 1, 1], [], []>} : vector<2x32xf32>, vector<32x32xf32>, vector<2x32xf32> -> vector<2x32xf32>
    %141 = vector.broadcast %18 : vector<1x32xf32> to vector<2x32xf32>
    %142 = arith.addf %140, %141 : vector<2x32xf32>
    %143 = arith.index_cast %c0_i32 : i32 to index
    %c0_69 = arith.constant 0 : index
    %c0_70 = arith.constant 0 : index
    %144 = vector.load %arg22[%143, %c0_69, %c0_70] : memref<4x2x32xf32, #tpu.memory_space<vmem>>, vector<1x2x32xf32>
    %145 = vector.shape_cast %144 : vector<1x2x32xf32> to vector<2x32xf32>
    %146 = vector.shape_cast %142 : vector<2x32xf32> to vector<1x2x32xf32>
    tpu.vector_store %arg22[%143, %c0_69, %c0_70], %146 {strides = array<i32>} : memref<4x2x32xf32, #tpu.memory_space<vmem>>, vector<1x2x32xf32>,
    %cst_71 = arith.constant dense<0.000000e+00> : vector<2x16xf32>
    %147 = tpu.matmul %139, %19, %cst_71 {dimension_numbers = #tpu.dot_dimension_numbers<[1], [0], [0], [1], [0, 0, 1, 1], [], []>} : vector<2x32xf32>, vector<32x16xf32>, vector<2x16xf32> -> vector<2x16xf32>
    %148 = vector.broadcast %20 : vector<1x16xf32> to vector<2x16xf32>
    %149 = arith.addf %147, %148 : vector<2x16xf32>
    %c1_i32 = arith.constant 1 : i32
    %cst_72 = arith.constant dense<0.000000e+00> : vector<2x32xf32>
    %150 = tpu.matmul %149, %3, %cst_72 {dimension_numbers = #tpu.dot_dimension_numbers<[1], [0], [0], [1], [0, 0, 1, 1], [], []>} : vector<2x16xf32>, vector<16x32xf32>, vector<2x32xf32> -> vector<2x32xf32>
    %151 = vector.broadcast %4 : vector<1x32xf32> to vector<2x32xf32>
    %152 = arith.addf %150, %151 : vector<2x32xf32>
    %cst_73 = arith.constant 0.000000e+00 : f32
    %153 = vector.broadcast %cst_73 : f32 to vector<2x32xf32>
    %154 = arith.maximumf %152, %153 : vector<2x32xf32>
    %cst_74 = arith.constant dense<0.000000e+00> : vector<2x16xf32>
    %155 = tpu.matmul %154, %5, %cst_74 {dimension_numbers = #tpu.dot_dimension_numbers<[1], [0], [0], [1], [0, 0, 1, 1], [], []>} : vector<2x32xf32>, vector<32x16xf32>, vector<2x16xf32> -> vector<2x16xf32>
    %156 = vector.broadcast %6 : vector<1x16xf32> to vector<2x16xf32>
    %157 = arith.addf %155, %156 : vector<2x16xf32>
    %cst_75 = arith.constant 0.000000e+00 : f32
    %158 = vector.broadcast %cst_75 : f32 to vector<2x16xf32>
    %159 = arith.maximumf %157, %158 : vector<2x16xf32>
    %160 = tpu.concatenate %159, %58 in 1 : vector<2x16xf32>, vector<2x32xf32> -> vector<2x48xf32>
    %cst_76 = arith.constant dense<0.000000e+00> : vector<2x128xf32>
    %161 = tpu.matmul %160, %8, %cst_76 {dimension_numbers = #tpu.dot_dimension_numbers<[1], [0], [0], [1], [0, 0, 1, 1], [], []>} : vector<2x48xf32>, vector<48x128xf32>, vector<2x128xf32> -> vector<2x128xf32>
    %162 = vector.broadcast %9 : vector<1x128xf32> to vector<2x128xf32>
    %163 = arith.addf %161, %162 : vector<2x128xf32>
    %164 = vector.extract_strided_slice %163 {offsets = [0, 0], sizes = [2, 32], strides = [1, 1]} : vector<2x128xf32> to vector<2x32xf32>
    %165 = arith.negf %164 : vector<2x32xf32>
    %166 = math.exp %165 : vector<2x32xf32>
    %cst_77 = arith.constant 1.000000e+00 : f32
    %167 = vector.broadcast %cst_77 : f32 to vector<2x32xf32>
    %168 = arith.addf %167, %166 : vector<2x32xf32>
    %169 = arith.divf %167, %168 : vector<2x32xf32>
    %170 = vector.extract_strided_slice %163 {offsets = [0, 32], sizes = [2, 32], strides = [1, 1]} : vector<2x128xf32> to vector<2x32xf32>
    %171 = arith.negf %170 : vector<2x32xf32>
    %172 = math.exp %171 : vector<2x32xf32>
    %cst_78 = arith.constant 1.000000e+00 : f32
    %173 = vector.broadcast %cst_78 : f32 to vector<2x32xf32>
    %174 = arith.addf %173, %172 : vector<2x32xf32>
    %175 = arith.divf %173, %174 : vector<2x32xf32>
    %176 = vector.extract_strided_slice %163 {offsets = [0, 64], sizes = [2, 32], strides = [1, 1]} : vector<2x128xf32> to vector<2x32xf32>
    %177 = vector.extract_strided_slice %163 {offsets = [0, 96], sizes = [2, 32], strides = [1, 1]} : vector<2x128xf32> to vector<2x32xf32>
    %178 = arith.mulf %169, %177 : vector<2x32xf32>
    %179 = arith.addf %176, %178 : vector<2x32xf32>
    %180 = math.tanh %179 : vector<2x32xf32>
    %cst_79 = arith.constant 1.000000e+00 : f32
    %181 = vector.broadcast %cst_79 : f32 to vector<2x32xf32>
    %182 = arith.subf %181, %175 : vector<2x32xf32>
    %183 = arith.mulf %182, %180 : vector<2x32xf32>
    %184 = arith.mulf %175, %58 : vector<2x32xf32>
    %185 = arith.addf %183, %184 : vector<2x32xf32>
    %cst_80 = arith.constant dense<0.000000e+00> : vector<2x32xf32>
    %186 = tpu.matmul %185, %7, %cst_80 {dimension_numbers = #tpu.dot_dimension_numbers<[1], [0], [0], [1], [0, 0, 1, 1], [], []>} : vector<2x32xf32>, vector<32x32xf32>, vector<2x32xf32> -> vector<2x32xf32>
    %187 = vector.shape_cast %186 : vector<2x32xf32> to vector<2x1x32xf32>
    %188 = vector.broadcast %187 : vector<2x1x32xf32> to vector<2x8x32xf32>
    %189 = arith.addf %1, %188 : vector<2x8x32xf32>
    %190 = math.tanh %189 : vector<2x8x32xf32>
    %191 = vector.shape_cast %2 : vector<1x32xf32> to vector<1x1x32xf32>
    %192 = vector.broadcast %191 : vector<1x1x32xf32> to vector<2x8x32xf32>
    %193 = arith.mulf %190, %192 : vector<2x8x32xf32>
    %cst_81 = arith.constant dense<0.000000e+00> : vector<2x8xf32>
    %194 = vector.multi_reduction <add>, %193, %cst_81 [2] : vector<2x8x32xf32> to vector<2x8xf32>
    %cst_82 = arith.constant dense<0xFF800000> : vector<2xf32>
    %195 = vector.multi_reduction <maximumf>, %194, %cst_82 [1] : vector<2x8xf32> to vector<2xf32>
    %196 = vector.shape_cast %195 : vector<2xf32> to vector<2x1xf32>
    %197 = vector.broadcast %196 : vector<2x1xf32> to vector<2x8xf32>
    %198 = arith.subf %194, %197 : vector<2x8xf32>
    %199 = math.exp %198 : vector<2x8xf32>
    %cst_83 = arith.constant dense<0.000000e+00> : vector<2xf32>
    %200 = vector.multi_reduction <add>, %199, %cst_83 [1] : vector<2x8xf32> to vector<2xf32>
    %201 = vector.shape_cast %200 : vector<2xf32> to vector<2x1xf32>
    %202 = vector.broadcast %201 : vector<2x1xf32> to vector<2x8xf32>
    %203 = arith.divf %199, %202 : vector<2x8xf32>
    %204 = vector.shape_cast %203 : vector<2x8xf32> to vector<2x8x1xf32>
    %205 = vector.broadcast %204 : vector<2x8x1xf32> to vector<2x8x32xf32>
    %206 = arith.mulf %205, %0 : vector<2x8x32xf32>
    %cst_84 = arith.constant dense<0.000000e+00> : vector<2x32xf32>
    %207 = vector.multi_reduction <add>, %206, %cst_84 [1] : vector<2x8x32xf32> to vector<2x32xf32>
    %cst_85 = arith.constant dense<0.000000e+00> : vector<2x32xf32>
    %208 = tpu.matmul %185, %14, %cst_85 {dimension_numbers = #tpu.dot_dimension_numbers<[1], [0], [0], [1], [0, 0, 1, 1], [], []>} : vector<2x32xf32>, vector<32x32xf32>, vector<2x32xf32> -> vector<2x32xf32>
    %cst_86 = arith.constant dense<0.000000e+00> : vector<2x32xf32>
    %209 = tpu.matmul %207, %15, %cst_86 {dimension_numbers = #tpu.dot_dimension_numbers<[1], [0], [0], [1], [0, 0, 1, 1], [], []>} : vector<2x32xf32>, vector<32x32xf32>, vector<2x32xf32> -> vector<2x32xf32>
    %210 = arith.addf %208, %209 : vector<2x32xf32>
    %211 = vector.broadcast %16 : vector<1x32xf32> to vector<2x32xf32>
    %212 = arith.addf %210, %211 : vector<2x32xf32>
    %213 = tpu.concatenate %212, %111 in 1 : vector<2x32xf32>, vector<2x32xf32> -> vector<2x64xf32>
    %cst_87 = arith.constant dense<0.000000e+00> : vector<2x128xf32>
    %214 = tpu.matmul %213, %10, %cst_87 {dimension_numbers = #tpu.dot_dimension_numbers<[1], [0], [0], [1], [0, 0, 1, 1], [], []>} : vector<2x64xf32>, vector<64x128xf32>, vector<2x128xf32> -> vector<2x128xf32>
    %215 = vector.broadcast %11 : vector<1x128xf32> to vector<2x128xf32>
    %216 = arith.addf %214, %215 : vector<2x128xf32>
    %217 = vector.extract_strided_slice %216 {offsets = [0, 0], sizes = [2, 32], strides = [1, 1]} : vector<2x128xf32> to vector<2x32xf32>
    %218 = arith.negf %217 : vector<2x32xf32>
    %219 = math.exp %218 : vector<2x32xf32>
    %cst_88 = arith.constant 1.000000e+00 : f32
    %220 = vector.broadcast %cst_88 : f32 to vector<2x32xf32>
    %221 = arith.addf %220, %219 : vector<2x32xf32>
    %222 = arith.divf %220, %221 : vector<2x32xf32>
    %223 = vector.extract_strided_slice %216 {offsets = [0, 32], sizes = [2, 32], strides = [1, 1]} : vector<2x128xf32> to vector<2x32xf32>
    %224 = arith.negf %223 : vector<2x32xf32>
    %225 = math.exp %224 : vector<2x32xf32>
    %cst_89 = arith.constant 1.000000e+00 : f32
    %226 = vector.broadcast %cst_89 : f32 to vector<2x32xf32>
    %227 = arith.addf %226, %225 : vector<2x32xf32>
    %228 = arith.divf %226, %227 : vector<2x32xf32>
    %229 = vector.extract_strided_slice %216 {offsets = [0, 64], sizes = [2, 32], strides = [1, 1]} : vector<2x128xf32> to vector<2x32xf32>
    %230 = vector.extract_strided_slice %216 {offsets = [0, 96], sizes = [2, 32], strides = [1, 1]} : vector<2x128xf32> to vector<2x32xf32>
    %231 = arith.mulf %222, %230 : vector<2x32xf32>
    %232 = arith.addf %229, %231 : vector<2x32xf32>
    %233 = math.tanh %232 : vector<2x32xf32>
    %cst_90 = arith.constant 1.000000e+00 : f32
    %234 = vector.broadcast %cst_90 : f32 to vector<2x32xf32>
    %235 = arith.subf %234, %228 : vector<2x32xf32>
    %236 = arith.mulf %235, %233 : vector<2x32xf32>
    %237 = arith.mulf %228, %111 : vector<2x32xf32>
    %238 = arith.addf %236, %237 : vector<2x32xf32>
    %239 = arith.addf %212, %238 : vector<2x32xf32>
    %240 = tpu.concatenate %239, %138 in 1 : vector<2x32xf32>, vector<2x32xf32> -> vector<2x64xf32>
    %cst_91 = arith.constant dense<0.000000e+00> : vector<2x128xf32>
    %241 = tpu.matmul %240, %12, %cst_91 {dimension_numbers = #tpu.dot_dimension_numbers<[1], [0], [0], [1], [0, 0, 1, 1], [], []>} : vector<2x64xf32>, vector<64x128xf32>, vector<2x128xf32> -> vector<2x128xf32>
    %242 = vector.broadcast %13 : vector<1x128xf32> to vector<2x128xf32>
    %243 = arith.addf %241, %242 : vector<2x128xf32>
    %244 = vector.extract_strided_slice %243 {offsets = [0, 0], sizes = [2, 32], strides = [1, 1]} : vector<2x128xf32> to vector<2x32xf32>
    %245 = arith.negf %244 : vector<2x32xf32>
    %246 = math.exp %245 : vector<2x32xf32>
    %cst_92 = arith.constant 1.000000e+00 : f32
    %247 = vector.broadcast %cst_92 : f32 to vector<2x32xf32>
    %248 = arith.addf %247, %246 : vector<2x32xf32>
    %249 = arith.divf %247, %248 : vector<2x32xf32>
    %250 = vector.extract_strided_slice %243 {offsets = [0, 32], sizes = [2, 32], strides = [1, 1]} : vector<2x128xf32> to vector<2x32xf32>
    %251 = arith.negf %250 : vector<2x32xf32>
    %252 = math.exp %251 : vector<2x32xf32>
    %cst_93 = arith.constant 1.000000e+00 : f32
    %253 = vector.broadcast %cst_93 : f32 to vector<2x32xf32>
    %254 = arith.addf %253, %252 : vector<2x32xf32>
    %255 = arith.divf %253, %254 : vector<2x32xf32>
    %256 = vector.extract_strided_slice %243 {offsets = [0, 64], sizes = [2, 32], strides = [1, 1]} : vector<2x128xf32> to vector<2x32xf32>
    %257 = vector.extract_strided_slice %243 {offsets = [0, 96], sizes = [2, 32], strides = [1, 1]} : vector<2x128xf32> to vector<2x32xf32>
    %258 = arith.mulf %249, %257 : vector<2x32xf32>
    %259 = arith.addf %256, %258 : vector<2x32xf32>
    %260 = math.tanh %259 : vector<2x32xf32>
    %cst_94 = arith.constant 1.000000e+00 : f32
    %261 = vector.broadcast %cst_94 : f32 to vector<2x32xf32>
    %262 = arith.subf %261, %255 : vector<2x32xf32>
    %263 = arith.mulf %262, %260 : vector<2x32xf32>
    %264 = arith.mulf %255, %138 : vector<2x32xf32>
    %265 = arith.addf %263, %264 : vector<2x32xf32>
    %266 = arith.addf %239, %265 : vector<2x32xf32>
    %cst_95 = arith.constant dense<0.000000e+00> : vector<2x32xf32>
    %267 = tpu.matmul %266, %17, %cst_95 {dimension_numbers = #tpu.dot_dimension_numbers<[1], [0], [0], [1], [0, 0, 1, 1], [], []>} : vector<2x32xf32>, vector<32x32xf32>, vector<2x32xf32> -> vector<2x32xf32>
    %268 = vector.broadcast %18 : vector<1x32xf32> to vector<2x32xf32>
    %269 = arith.addf %267, %268 : vector<2x32xf32>
    %270 = arith.index_cast %c1_i32 : i32 to index
    %c0_96 = arith.constant 0 : index
    %c0_97 = arith.constant 0 : index
    %271 = vector.load %arg22[%270, %c0_96, %c0_97] : memref<4x2x32xf32, #tpu.memory_space<vmem>>, vector<1x2x32xf32>
    %272 = vector.shape_cast %271 : vector<1x2x32xf32> to vector<2x32xf32>
    %273 = vector.shape_cast %269 : vector<2x32xf32> to vector<1x2x32xf32>
    tpu.vector_store %arg22[%270, %c0_96, %c0_97], %273 {strides = array<i32>} : memref<4x2x32xf32, #tpu.memory_space<vmem>>, vector<1x2x32xf32>,
    %cst_98 = arith.constant dense<0.000000e+00> : vector<2x16xf32>
    %274 = tpu.matmul %266, %19, %cst_98 {dimension_numbers = #tpu.dot_dimension_numbers<[1], [0], [0], [1], [0, 0, 1, 1], [], []>} : vector<2x32xf32>, vector<32x16xf32>, vector<2x16xf32> -> vector<2x16xf32>
    %275 = vector.broadcast %20 : vector<1x16xf32> to vector<2x16xf32>
    %276 = arith.addf %274, %275 : vector<2x16xf32>
    %c2_i32 = arith.constant 2 : i32
    %cst_99 = arith.constant dense<0.000000e+00> : vector<2x32xf32>
    %277 = tpu.matmul %276, %3, %cst_99 {dimension_numbers = #tpu.dot_dimension_numbers<[1], [0], [0], [1], [0, 0, 1, 1], [], []>} : vector<2x16xf32>, vector<16x32xf32>, vector<2x32xf32> -> vector<2x32xf32>
    %278 = vector.broadcast %4 : vector<1x32xf32> to vector<2x32xf32>
    %279 = arith.addf %277, %278 : vector<2x32xf32>
    %cst_100 = arith.constant 0.000000e+00 : f32
    %280 = vector.broadcast %cst_100 : f32 to vector<2x32xf32>
    %281 = arith.maximumf %279, %280 : vector<2x32xf32>
    %cst_101 = arith.constant dense<0.000000e+00> : vector<2x16xf32>
    %282 = tpu.matmul %281, %5, %cst_101 {dimension_numbers = #tpu.dot_dimension_numbers<[1], [0], [0], [1], [0, 0, 1, 1], [], []>} : vector<2x32xf32>, vector<32x16xf32>, vector<2x16xf32> -> vector<2x16xf32>
    %283 = vector.broadcast %6 : vector<1x16xf32> to vector<2x16xf32>
    %284 = arith.addf %282, %283 : vector<2x16xf32>
    %cst_102 = arith.constant 0.000000e+00 : f32
    %285 = vector.broadcast %cst_102 : f32 to vector<2x16xf32>
    %286 = arith.maximumf %284, %285 : vector<2x16xf32>
    %287 = tpu.concatenate %286, %185 in 1 : vector<2x16xf32>, vector<2x32xf32> -> vector<2x48xf32>
    %cst_103 = arith.constant dense<0.000000e+00> : vector<2x128xf32>
    %288 = tpu.matmul %287, %8, %cst_103 {dimension_numbers = #tpu.dot_dimension_numbers<[1], [0], [0], [1], [0, 0, 1, 1], [], []>} : vector<2x48xf32>, vector<48x128xf32>, vector<2x128xf32> -> vector<2x128xf32>
    %289 = vector.broadcast %9 : vector<1x128xf32> to vector<2x128xf32>
    %290 = arith.addf %288, %289 : vector<2x128xf32>
    %291 = vector.extract_strided_slice %290 {offsets = [0, 0], sizes = [2, 32], strides = [1, 1]} : vector<2x128xf32> to vector<2x32xf32>
    %292 = arith.negf %291 : vector<2x32xf32>
    %293 = math.exp %292 : vector<2x32xf32>
    %cst_104 = arith.constant 1.000000e+00 : f32
    %294 = vector.broadcast %cst_104 : f32 to vector<2x32xf32>
    %295 = arith.addf %294, %293 : vector<2x32xf32>
    %296 = arith.divf %294, %295 : vector<2x32xf32>
    %297 = vector.extract_strided_slice %290 {offsets = [0, 32], sizes = [2, 32], strides = [1, 1]} : vector<2x128xf32> to vector<2x32xf32>
    %298 = arith.negf %297 : vector<2x32xf32>
    %299 = math.exp %298 : vector<2x32xf32>
    %cst_105 = arith.constant 1.000000e+00 : f32
    %300 = vector.broadcast %cst_105 : f32 to vector<2x32xf32>
    %301 = arith.addf %300, %299 : vector<2x32xf32>
    %302 = arith.divf %300, %301 : vector<2x32xf32>
    %303 = vector.extract_strided_slice %290 {offsets = [0, 64], sizes = [2, 32], strides = [1, 1]} : vector<2x128xf32> to vector<2x32xf32>
    %304 = vector.extract_strided_slice %290 {offsets = [0, 96], sizes = [2, 32], strides = [1, 1]} : vector<2x128xf32> to vector<2x32xf32>
    %305 = arith.mulf %296, %304 : vector<2x32xf32>
    %306 = arith.addf %303, %305 : vector<2x32xf32>
    %307 = math.tanh %306 : vector<2x32xf32>
    %cst_106 = arith.constant 1.000000e+00 : f32
    %308 = vector.broadcast %cst_106 : f32 to vector<2x32xf32>
    %309 = arith.subf %308, %302 : vector<2x32xf32>
    %310 = arith.mulf %309, %307 : vector<2x32xf32>
    %311 = arith.mulf %302, %185 : vector<2x32xf32>
    %312 = arith.addf %310, %311 : vector<2x32xf32>
    %cst_107 = arith.constant dense<0.000000e+00> : vector<2x32xf32>
    %313 = tpu.matmul %312, %7, %cst_107 {dimension_numbers = #tpu.dot_dimension_numbers<[1], [0], [0], [1], [0, 0, 1, 1], [], []>} : vector<2x32xf32>, vector<32x32xf32>, vector<2x32xf32> -> vector<2x32xf32>
    %314 = vector.shape_cast %313 : vector<2x32xf32> to vector<2x1x32xf32>
    %315 = vector.broadcast %314 : vector<2x1x32xf32> to vector<2x8x32xf32>
    %316 = arith.addf %1, %315 : vector<2x8x32xf32>
    %317 = math.tanh %316 : vector<2x8x32xf32>
    %318 = vector.shape_cast %2 : vector<1x32xf32> to vector<1x1x32xf32>
    %319 = vector.broadcast %318 : vector<1x1x32xf32> to vector<2x8x32xf32>
    %320 = arith.mulf %317, %319 : vector<2x8x32xf32>
    %cst_108 = arith.constant dense<0.000000e+00> : vector<2x8xf32>
    %321 = vector.multi_reduction <add>, %320, %cst_108 [2] : vector<2x8x32xf32> to vector<2x8xf32>
    %cst_109 = arith.constant dense<0xFF800000> : vector<2xf32>
    %322 = vector.multi_reduction <maximumf>, %321, %cst_109 [1] : vector<2x8xf32> to vector<2xf32>
    %323 = vector.shape_cast %322 : vector<2xf32> to vector<2x1xf32>
    %324 = vector.broadcast %323 : vector<2x1xf32> to vector<2x8xf32>
    %325 = arith.subf %321, %324 : vector<2x8xf32>
    %326 = math.exp %325 : vector<2x8xf32>
    %cst_110 = arith.constant dense<0.000000e+00> : vector<2xf32>
    %327 = vector.multi_reduction <add>, %326, %cst_110 [1] : vector<2x8xf32> to vector<2xf32>
    %328 = vector.shape_cast %327 : vector<2xf32> to vector<2x1xf32>
    %329 = vector.broadcast %328 : vector<2x1xf32> to vector<2x8xf32>
    %330 = arith.divf %326, %329 : vector<2x8xf32>
    %331 = vector.shape_cast %330 : vector<2x8xf32> to vector<2x8x1xf32>
    %332 = vector.broadcast %331 : vector<2x8x1xf32> to vector<2x8x32xf32>
    %333 = arith.mulf %332, %0 : vector<2x8x32xf32>
    %cst_111 = arith.constant dense<0.000000e+00> : vector<2x32xf32>
    %334 = vector.multi_reduction <add>, %333, %cst_111 [1] : vector<2x8x32xf32> to vector<2x32xf32>
    %cst_112 = arith.constant dense<0.000000e+00> : vector<2x32xf32>
    %335 = tpu.matmul %312, %14, %cst_112 {dimension_numbers = #tpu.dot_dimension_numbers<[1], [0], [0], [1], [0, 0, 1, 1], [], []>} : vector<2x32xf32>, vector<32x32xf32>, vector<2x32xf32> -> vector<2x32xf32>
    %cst_113 = arith.constant dense<0.000000e+00> : vector<2x32xf32>
    %336 = tpu.matmul %334, %15, %cst_113 {dimension_numbers = #tpu.dot_dimension_numbers<[1], [0], [0], [1], [0, 0, 1, 1], [], []>} : vector<2x32xf32>, vector<32x32xf32>, vector<2x32xf32> -> vector<2x32xf32>
    %337 = arith.addf %335, %336 : vector<2x32xf32>
    %338 = vector.broadcast %16 : vector<1x32xf32> to vector<2x32xf32>
    %339 = arith.addf %337, %338 : vector<2x32xf32>
    %340 = tpu.concatenate %339, %238 in 1 : vector<2x32xf32>, vector<2x32xf32> -> vector<2x64xf32>
    %cst_114 = arith.constant dense<0.000000e+00> : vector<2x128xf32>
    %341 = tpu.matmul %340, %10, %cst_114 {dimension_numbers = #tpu.dot_dimension_numbers<[1], [0], [0], [1], [0, 0, 1, 1], [], []>} : vector<2x64xf32>, vector<64x128xf32>, vector<2x128xf32> -> vector<2x128xf32>
    %342 = vector.broadcast %11 : vector<1x128xf32> to vector<2x128xf32>
    %343 = arith.addf %341, %342 : vector<2x128xf32>
    %344 = vector.extract_strided_slice %343 {offsets = [0, 0], sizes = [2, 32], strides = [1, 1]} : vector<2x128xf32> to vector<2x32xf32>
    %345 = arith.negf %344 : vector<2x32xf32>
    %346 = math.exp %345 : vector<2x32xf32>
    %cst_115 = arith.constant 1.000000e+00 : f32
    %347 = vector.broadcast %cst_115 : f32 to vector<2x32xf32>
    %348 = arith.addf %347, %346 : vector<2x32xf32>
    %349 = arith.divf %347, %348 : vector<2x32xf32>
    %350 = vector.extract_strided_slice %343 {offsets = [0, 32], sizes = [2, 32], strides = [1, 1]} : vector<2x128xf32> to vector<2x32xf32>
    %351 = arith.negf %350 : vector<2x32xf32>
    %352 = math.exp %351 : vector<2x32xf32>
    %cst_116 = arith.constant 1.000000e+00 : f32
    %353 = vector.broadcast %cst_116 : f32 to vector<2x32xf32>
    %354 = arith.addf %353, %352 : vector<2x32xf32>
    %355 = arith.divf %353, %354 : vector<2x32xf32>
    %356 = vector.extract_strided_slice %343 {offsets = [0, 64], sizes = [2, 32], strides = [1, 1]} : vector<2x128xf32> to vector<2x32xf32>
    %357 = vector.extract_strided_slice %343 {offsets = [0, 96], sizes = [2, 32], strides = [1, 1]} : vector<2x128xf32> to vector<2x32xf32>
    %358 = arith.mulf %349, %357 : vector<2x32xf32>
    %359 = arith.addf %356, %358 : vector<2x32xf32>
    %360 = math.tanh %359 : vector<2x32xf32>
    %cst_117 = arith.constant 1.000000e+00 : f32
    %361 = vector.broadcast %cst_117 : f32 to vector<2x32xf32>
    %362 = arith.subf %361, %355 : vector<2x32xf32>
    %363 = arith.mulf %362, %360 : vector<2x32xf32>
    %364 = arith.mulf %355, %238 : vector<2x32xf32>
    %365 = arith.addf %363, %364 : vector<2x32xf32>
    %366 = arith.addf %339, %365 : vector<2x32xf32>
    %367 = tpu.concatenate %366, %265 in 1 : vector<2x32xf32>, vector<2x32xf32> -> vector<2x64xf32>
    %cst_118 = arith.constant dense<0.000000e+00> : vector<2x128xf32>
    %368 = tpu.matmul %367, %12, %cst_118 {dimension_numbers = #tpu.dot_dimension_numbers<[1], [0], [0], [1], [0, 0, 1, 1], [], []>} : vector<2x64xf32>, vector<64x128xf32>, vector<2x128xf32> -> vector<2x128xf32>
    %369 = vector.broadcast %13 : vector<1x128xf32> to vector<2x128xf32>
    %370 = arith.addf %368, %369 : vector<2x128xf32>
    %371 = vector.extract_strided_slice %370 {offsets = [0, 0], sizes = [2, 32], strides = [1, 1]} : vector<2x128xf32> to vector<2x32xf32>
    %372 = arith.negf %371 : vector<2x32xf32>
    %373 = math.exp %372 : vector<2x32xf32>
    %cst_119 = arith.constant 1.000000e+00 : f32
    %374 = vector.broadcast %cst_119 : f32 to vector<2x32xf32>
    %375 = arith.addf %374, %373 : vector<2x32xf32>
    %376 = arith.divf %374, %375 : vector<2x32xf32>
    %377 = vector.extract_strided_slice %370 {offsets = [0, 32], sizes = [2, 32], strides = [1, 1]} : vector<2x128xf32> to vector<2x32xf32>
    %378 = arith.negf %377 : vector<2x32xf32>
    %379 = math.exp %378 : vector<2x32xf32>
    %cst_120 = arith.constant 1.000000e+00 : f32
    %380 = vector.broadcast %cst_120 : f32 to vector<2x32xf32>
    %381 = arith.addf %380, %379 : vector<2x32xf32>
    %382 = arith.divf %380, %381 : vector<2x32xf32>
    %383 = vector.extract_strided_slice %370 {offsets = [0, 64], sizes = [2, 32], strides = [1, 1]} : vector<2x128xf32> to vector<2x32xf32>
    %384 = vector.extract_strided_slice %370 {offsets = [0, 96], sizes = [2, 32], strides = [1, 1]} : vector<2x128xf32> to vector<2x32xf32>
    %385 = arith.mulf %376, %384 : vector<2x32xf32>
    %386 = arith.addf %383, %385 : vector<2x32xf32>
    %387 = math.tanh %386 : vector<2x32xf32>
    %cst_121 = arith.constant 1.000000e+00 : f32
    %388 = vector.broadcast %cst_121 : f32 to vector<2x32xf32>
    %389 = arith.subf %388, %382 : vector<2x32xf32>
    %390 = arith.mulf %389, %387 : vector<2x32xf32>
    %391 = arith.mulf %382, %265 : vector<2x32xf32>
    %392 = arith.addf %390, %391 : vector<2x32xf32>
    %393 = arith.addf %366, %392 : vector<2x32xf32>
    %cst_122 = arith.constant dense<0.000000e+00> : vector<2x32xf32>
    %394 = tpu.matmul %393, %17, %cst_122 {dimension_numbers = #tpu.dot_dimension_numbers<[1], [0], [0], [1], [0, 0, 1, 1], [], []>} : vector<2x32xf32>, vector<32x32xf32>, vector<2x32xf32> -> vector<2x32xf32>
    %395 = vector.broadcast %18 : vector<1x32xf32> to vector<2x32xf32>
    %396 = arith.addf %394, %395 : vector<2x32xf32>
    %397 = arith.index_cast %c2_i32 : i32 to index
    %c0_123 = arith.constant 0 : index
    %c0_124 = arith.constant 0 : index
    %398 = vector.load %arg22[%397, %c0_123, %c0_124] : memref<4x2x32xf32, #tpu.memory_space<vmem>>, vector<1x2x32xf32>
    %399 = vector.shape_cast %398 : vector<1x2x32xf32> to vector<2x32xf32>
    %400 = vector.shape_cast %396 : vector<2x32xf32> to vector<1x2x32xf32>
    tpu.vector_store %arg22[%397, %c0_123, %c0_124], %400 {strides = array<i32>} : memref<4x2x32xf32, #tpu.memory_space<vmem>>, vector<1x2x32xf32>,
    %cst_125 = arith.constant dense<0.000000e+00> : vector<2x16xf32>
    %401 = tpu.matmul %393, %19, %cst_125 {dimension_numbers = #tpu.dot_dimension_numbers<[1], [0], [0], [1], [0, 0, 1, 1], [], []>} : vector<2x32xf32>, vector<32x16xf32>, vector<2x16xf32> -> vector<2x16xf32>
    %402 = vector.broadcast %20 : vector<1x16xf32> to vector<2x16xf32>
    %403 = arith.addf %401, %402 : vector<2x16xf32>
    %c3_i32 = arith.constant 3 : i32
    %cst_126 = arith.constant dense<0.000000e+00> : vector<2x32xf32>
    %404 = tpu.matmul %403, %3, %cst_126 {dimension_numbers = #tpu.dot_dimension_numbers<[1], [0], [0], [1], [0, 0, 1, 1], [], []>} : vector<2x16xf32>, vector<16x32xf32>, vector<2x32xf32> -> vector<2x32xf32>
    %405 = vector.broadcast %4 : vector<1x32xf32> to vector<2x32xf32>
    %406 = arith.addf %404, %405 : vector<2x32xf32>
    %cst_127 = arith.constant 0.000000e+00 : f32
    %407 = vector.broadcast %cst_127 : f32 to vector<2x32xf32>
    %408 = arith.maximumf %406, %407 : vector<2x32xf32>
    %cst_128 = arith.constant dense<0.000000e+00> : vector<2x16xf32>
    %409 = tpu.matmul %408, %5, %cst_128 {dimension_numbers = #tpu.dot_dimension_numbers<[1], [0], [0], [1], [0, 0, 1, 1], [], []>} : vector<2x32xf32>, vector<32x16xf32>, vector<2x16xf32> -> vector<2x16xf32>
    %410 = vector.broadcast %6 : vector<1x16xf32> to vector<2x16xf32>
    %411 = arith.addf %409, %410 : vector<2x16xf32>
    %cst_129 = arith.constant 0.000000e+00 : f32
    %412 = vector.broadcast %cst_129 : f32 to vector<2x16xf32>
    %413 = arith.maximumf %411, %412 : vector<2x16xf32>
    %414 = tpu.concatenate %413, %312 in 1 : vector<2x16xf32>, vector<2x32xf32> -> vector<2x48xf32>
    %cst_130 = arith.constant dense<0.000000e+00> : vector<2x128xf32>
    %415 = tpu.matmul %414, %8, %cst_130 {dimension_numbers = #tpu.dot_dimension_numbers<[1], [0], [0], [1], [0, 0, 1, 1], [], []>} : vector<2x48xf32>, vector<48x128xf32>, vector<2x128xf32> -> vector<2x128xf32>
    %416 = vector.broadcast %9 : vector<1x128xf32> to vector<2x128xf32>
    %417 = arith.addf %415, %416 : vector<2x128xf32>
    %418 = vector.extract_strided_slice %417 {offsets = [0, 0], sizes = [2, 32], strides = [1, 1]} : vector<2x128xf32> to vector<2x32xf32>
    %419 = arith.negf %418 : vector<2x32xf32>
    %420 = math.exp %419 : vector<2x32xf32>
    %cst_131 = arith.constant 1.000000e+00 : f32
    %421 = vector.broadcast %cst_131 : f32 to vector<2x32xf32>
    %422 = arith.addf %421, %420 : vector<2x32xf32>
    %423 = arith.divf %421, %422 : vector<2x32xf32>
    %424 = vector.extract_strided_slice %417 {offsets = [0, 32], sizes = [2, 32], strides = [1, 1]} : vector<2x128xf32> to vector<2x32xf32>
    %425 = arith.negf %424 : vector<2x32xf32>
    %426 = math.exp %425 : vector<2x32xf32>
    %cst_132 = arith.constant 1.000000e+00 : f32
    %427 = vector.broadcast %cst_132 : f32 to vector<2x32xf32>
    %428 = arith.addf %427, %426 : vector<2x32xf32>
    %429 = arith.divf %427, %428 : vector<2x32xf32>
    %430 = vector.extract_strided_slice %417 {offsets = [0, 64], sizes = [2, 32], strides = [1, 1]} : vector<2x128xf32> to vector<2x32xf32>
    %431 = vector.extract_strided_slice %417 {offsets = [0, 96], sizes = [2, 32], strides = [1, 1]} : vector<2x128xf32> to vector<2x32xf32>
    %432 = arith.mulf %423, %431 : vector<2x32xf32>
    %433 = arith.addf %430, %432 : vector<2x32xf32>
    %434 = math.tanh %433 : vector<2x32xf32>
    %cst_133 = arith.constant 1.000000e+00 : f32
    %435 = vector.broadcast %cst_133 : f32 to vector<2x32xf32>
    %436 = arith.subf %435, %429 : vector<2x32xf32>
    %437 = arith.mulf %436, %434 : vector<2x32xf32>
    %438 = arith.mulf %429, %312 : vector<2x32xf32>
    %439 = arith.addf %437, %438 : vector<2x32xf32>
    %cst_134 = arith.constant dense<0.000000e+00> : vector<2x32xf32>
    %440 = tpu.matmul %439, %7, %cst_134 {dimension_numbers = #tpu.dot_dimension_numbers<[1], [0], [0], [1], [0, 0, 1, 1], [], []>} : vector<2x32xf32>, vector<32x32xf32>, vector<2x32xf32> -> vector<2x32xf32>
    %441 = vector.shape_cast %440 : vector<2x32xf32> to vector<2x1x32xf32>
    %442 = vector.broadcast %441 : vector<2x1x32xf32> to vector<2x8x32xf32>
    %443 = arith.addf %1, %442 : vector<2x8x32xf32>
    %444 = math.tanh %443 : vector<2x8x32xf32>
    %445 = vector.shape_cast %2 : vector<1x32xf32> to vector<1x1x32xf32>
    %446 = vector.broadcast %445 : vector<1x1x32xf32> to vector<2x8x32xf32>
    %447 = arith.mulf %444, %446 : vector<2x8x32xf32>
    %cst_135 = arith.constant dense<0.000000e+00> : vector<2x8xf32>
    %448 = vector.multi_reduction <add>, %447, %cst_135 [2] : vector<2x8x32xf32> to vector<2x8xf32>
    %cst_136 = arith.constant dense<0xFF800000> : vector<2xf32>
    %449 = vector.multi_reduction <maximumf>, %448, %cst_136 [1] : vector<2x8xf32> to vector<2xf32>
    %450 = vector.shape_cast %449 : vector<2xf32> to vector<2x1xf32>
    %451 = vector.broadcast %450 : vector<2x1xf32> to vector<2x8xf32>
    %452 = arith.subf %448, %451 : vector<2x8xf32>
    %453 = math.exp %452 : vector<2x8xf32>
    %cst_137 = arith.constant dense<0.000000e+00> : vector<2xf32>
    %454 = vector.multi_reduction <add>, %453, %cst_137 [1] : vector<2x8xf32> to vector<2xf32>
    %455 = vector.shape_cast %454 : vector<2xf32> to vector<2x1xf32>
    %456 = vector.broadcast %455 : vector<2x1xf32> to vector<2x8xf32>
    %457 = arith.divf %453, %456 : vector<2x8xf32>
    %458 = vector.shape_cast %457 : vector<2x8xf32> to vector<2x8x1xf32>
    %459 = vector.broadcast %458 : vector<2x8x1xf32> to vector<2x8x32xf32>
    %460 = arith.mulf %459, %0 : vector<2x8x32xf32>
    %cst_138 = arith.constant dense<0.000000e+00> : vector<2x32xf32>
    %461 = vector.multi_reduction <add>, %460, %cst_138 [1] : vector<2x8x32xf32> to vector<2x32xf32>
    %cst_139 = arith.constant dense<0.000000e+00> : vector<2x32xf32>
    %462 = tpu.matmul %439, %14, %cst_139 {dimension_numbers = #tpu.dot_dimension_numbers<[1], [0], [0], [1], [0, 0, 1, 1], [], []>} : vector<2x32xf32>, vector<32x32xf32>, vector<2x32xf32> -> vector<2x32xf32>
    %cst_140 = arith.constant dense<0.000000e+00> : vector<2x32xf32>
    %463 = tpu.matmul %461, %15, %cst_140 {dimension_numbers = #tpu.dot_dimension_numbers<[1], [0], [0], [1], [0, 0, 1, 1], [], []>} : vector<2x32xf32>, vector<32x32xf32>, vector<2x32xf32> -> vector<2x32xf32>
    %464 = arith.addf %462, %463 : vector<2x32xf32>
    %465 = vector.broadcast %16 : vector<1x32xf32> to vector<2x32xf32>
    %466 = arith.addf %464, %465 : vector<2x32xf32>
    %467 = tpu.concatenate %466, %365 in 1 : vector<2x32xf32>, vector<2x32xf32> -> vector<2x64xf32>
    %cst_141 = arith.constant dense<0.000000e+00> : vector<2x128xf32>
    %468 = tpu.matmul %467, %10, %cst_141 {dimension_numbers = #tpu.dot_dimension_numbers<[1], [0], [0], [1], [0, 0, 1, 1], [], []>} : vector<2x64xf32>, vector<64x128xf32>, vector<2x128xf32> -> vector<2x128xf32>
    %469 = vector.broadcast %11 : vector<1x128xf32> to vector<2x128xf32>
    %470 = arith.addf %468, %469 : vector<2x128xf32>
    %471 = vector.extract_strided_slice %470 {offsets = [0, 0], sizes = [2, 32], strides = [1, 1]} : vector<2x128xf32> to vector<2x32xf32>
    %472 = arith.negf %471 : vector<2x32xf32>
    %473 = math.exp %472 : vector<2x32xf32>
    %cst_142 = arith.constant 1.000000e+00 : f32
    %474 = vector.broadcast %cst_142 : f32 to vector<2x32xf32>
    %475 = arith.addf %474, %473 : vector<2x32xf32>
    %476 = arith.divf %474, %475 : vector<2x32xf32>
    %477 = vector.extract_strided_slice %470 {offsets = [0, 32], sizes = [2, 32], strides = [1, 1]} : vector<2x128xf32> to vector<2x32xf32>
    %478 = arith.negf %477 : vector<2x32xf32>
    %479 = math.exp %478 : vector<2x32xf32>
    %cst_143 = arith.constant 1.000000e+00 : f32
    %480 = vector.broadcast %cst_143 : f32 to vector<2x32xf32>
    %481 = arith.addf %480, %479 : vector<2x32xf32>
    %482 = arith.divf %480, %481 : vector<2x32xf32>
    %483 = vector.extract_strided_slice %470 {offsets = [0, 64], sizes = [2, 32], strides = [1, 1]} : vector<2x128xf32> to vector<2x32xf32>
    %484 = vector.extract_strided_slice %470 {offsets = [0, 96], sizes = [2, 32], strides = [1, 1]} : vector<2x128xf32> to vector<2x32xf32>
    %485 = arith.mulf %476, %484 : vector<2x32xf32>
    %486 = arith.addf %483, %485 : vector<2x32xf32>
    %487 = math.tanh %486 : vector<2x32xf32>
    %cst_144 = arith.constant 1.000000e+00 : f32
    %488 = vector.broadcast %cst_144 : f32 to vector<2x32xf32>
    %489 = arith.subf %488, %482 : vector<2x32xf32>
    %490 = arith.mulf %489, %487 : vector<2x32xf32>
    %491 = arith.mulf %482, %365 : vector<2x32xf32>
    %492 = arith.addf %490, %491 : vector<2x32xf32>
    %493 = arith.addf %466, %492 : vector<2x32xf32>
    %494 = tpu.concatenate %493, %392 in 1 : vector<2x32xf32>, vector<2x32xf32> -> vector<2x64xf32>
    %cst_145 = arith.constant dense<0.000000e+00> : vector<2x128xf32>
    %495 = tpu.matmul %494, %12, %cst_145 {dimension_numbers = #tpu.dot_dimension_numbers<[1], [0], [0], [1], [0, 0, 1, 1], [], []>} : vector<2x64xf32>, vector<64x128xf32>, vector<2x128xf32> -> vector<2x128xf32>
    %496 = vector.broadcast %13 : vector<1x128xf32> to vector<2x128xf32>
    %497 = arith.addf %495, %496 : vector<2x128xf32>
    %498 = vector.extract_strided_slice %497 {offsets = [0, 0], sizes = [2, 32], strides = [1, 1]} : vector<2x128xf32> to vector<2x32xf32>
    %499 = arith.negf %498 : vector<2x32xf32>
    %500 = math.exp %499 : vector<2x32xf32>
    %cst_146 = arith.constant 1.000000e+00 : f32
    %501 = vector.broadcast %cst_146 : f32 to vector<2x32xf32>
    %502 = arith.addf %501, %500 : vector<2x32xf32>
    %503 = arith.divf %501, %502 : vector<2x32xf32>
    %504 = vector.extract_strided_slice %497 {offsets = [0, 32], sizes = [2, 32], strides = [1, 1]} : vector<2x128xf32> to vector<2x32xf32>
    %505 = arith.negf %504 : vector<2x32xf32>
    %506 = math.exp %505 : vector<2x32xf32>
    %cst_147 = arith.constant 1.000000e+00 : f32
    %507 = vector.broadcast %cst_147 : f32 to vector<2x32xf32>
    %508 = arith.addf %507, %506 : vector<2x32xf32>
    %509 = arith.divf %507, %508 : vector<2x32xf32>
    %510 = vector.extract_strided_slice %497 {offsets = [0, 64], sizes = [2, 32], strides = [1, 1]} : vector<2x128xf32> to vector<2x32xf32>
    %511 = vector.extract_strided_slice %497 {offsets = [0, 96], sizes = [2, 32], strides = [1, 1]} : vector<2x128xf32> to vector<2x32xf32>
    %512 = arith.mulf %503, %511 : vector<2x32xf32>
    %513 = arith.addf %510, %512 : vector<2x32xf32>
    %514 = math.tanh %513 : vector<2x32xf32>
    %cst_148 = arith.constant 1.000000e+00 : f32
    %515 = vector.broadcast %cst_148 : f32 to vector<2x32xf32>
    %516 = arith.subf %515, %509 : vector<2x32xf32>
    %517 = arith.mulf %516, %514 : vector<2x32xf32>
    %518 = arith.mulf %509, %392 : vector<2x32xf32>
    %519 = arith.addf %517, %518 : vector<2x32xf32>
    %520 = arith.addf %493, %519 : vector<2x32xf32>
    %cst_149 = arith.constant dense<0.000000e+00> : vector<2x32xf32>
    %521 = tpu.matmul %520, %17, %cst_149 {dimension_numbers = #tpu.dot_dimension_numbers<[1], [0], [0], [1], [0, 0, 1, 1], [], []>} : vector<2x32xf32>, vector<32x32xf32>, vector<2x32xf32> -> vector<2x32xf32>
    %522 = vector.broadcast %18 : vector<1x32xf32> to vector<2x32xf32>
    %523 = arith.addf %521, %522 : vector<2x32xf32>
    %524 = arith.index_cast %c3_i32 : i32 to index
    %c0_150 = arith.constant 0 : index
    %c0_151 = arith.constant 0 : index
    %525 = vector.load %arg22[%524, %c0_150, %c0_151] : memref<4x2x32xf32, #tpu.memory_space<vmem>>, vector<1x2x32xf32>
    %526 = vector.shape_cast %525 : vector<1x2x32xf32> to vector<2x32xf32>
    %527 = vector.shape_cast %523 : vector<2x32xf32> to vector<1x2x32xf32>
    tpu.vector_store %arg22[%524, %c0_150, %c0_151], %527 {strides = array<i32>} : memref<4x2x32xf32, #tpu.memory_space<vmem>>, vector<1x2x32xf32>,
    %cst_152 = arith.constant dense<0.000000e+00> : vector<2x16xf32>
    %528 = tpu.matmul %520, %19, %cst_152 {dimension_numbers = #tpu.dot_dimension_numbers<[1], [0], [0], [1], [0, 0, 1, 1], [], []>} : vector<2x32xf32>, vector<32x16xf32>, vector<2x16xf32> -> vector<2x16xf32>
    %529 = vector.broadcast %20 : vector<1x16xf32> to vector<2x16xf32>
    %530 = arith.addf %528, %529 : vector<2x16xf32>
    %c4_i32 = arith.constant 4 : i32
    return
  }
}

</mosaic_0001>

<bundles_post_ra>
// kernel: tpu_custom_call.1
= control target key start
LH: loop header
LB: loop body
LE: loop exit
PB: predicated region body
PF: predicated region fallthrough
CT: control target
= control target key end

     0   :  { %s6906_s0 = inlined_call_operand.hbm [shape: f32[2,16], index: 0, kind: input, shape index: {}]   ;;  %s6907_s1 = inlined_call_operand.hbm [shape: f32[2,8,32], index: 1, kind: input, shape index: {}]   ;;  %s6908_s2 = inlined_call_operand.hbm [shape: f32[2,8,32], index: 2, kind: input, shape index: {}]   ;;  %s6909_s3 = inlined_call_operand.hbm [shape: f32[16,32], index: 3, kind: input, shape index: {}]   ;;  %s6910_s4 = inlined_call_operand.hbm [shape: f32[1,32], index: 4, kind: input, shape index: {}]   ;;  %s6911_s5 = inlined_call_operand.vmem [shape: f32[32,16], index: 5, kind: input, shape index: {}]   ;;  %s6912_s6 = inlined_call_operand.hbm [shape: f32[1,16], index: 6, kind: input, shape index: {}]   ;;  %s6913_s7 = inlined_call_operand.hbm [shape: f32[32,32], index: 7, kind: input, shape index: {}]   ;;  %s6914_s8 = inlined_call_operand.hbm [shape: f32[1,32], index: 8, kind: input, shape index: {}]   ;;  %s6915_s9 = inlined_call_operand.hbm [shape: f32[48,128], index: 9, kind: input, shape index: {}]   ;;  %s6916_s10 = inlined_call_operand.hbm [shape: f32[1,128], index: 10, kind: input, shape index: {}]   ;;  %s6917_s11 = inlined_call_operand.vmem [shape: f32[64,128], index: 11, kind: input, shape index: {}]   ;;  %s6918_s12 = inlined_call_operand.hbm [shape: f32[1,128], index: 12, kind: input, shape index: {}]   ;;  %s6919_s13 = inlined_call_operand.vmem [shape: f32[64,128], index: 13, kind: input, shape index: {}]   ;;  %s6920_s14 = inlined_call_operand.hbm [shape: f32[1,128], index: 14, kind: input, shape index: {}]   ;;  %s6921_s15 = inlined_call_operand.hbm [shape: f32[32,32], index: 15, kind: input, shape index: {}]   ;;  %s6922_s16 = inlined_call_operand.hbm [shape: f32[32,32], index: 16, kind: input, shape index: {}]   ;;  %s6923_s17 = inlined_call_operand.hbm [shape: f32[1,32], index: 17, kind: input, shape index: {}]   ;;  %s6924_s18 = inlined_call_operand.vmem [shape: f32[32,32], index: 18, kind: input, shape index: {}]   ;;  %s6925_s19 = inlined_call_operand.vmem [shape: f32[1,32], index: 19, kind: input, shape index: {}]   ;;  %s6926_s20 = inlined_call_operand.vmem [shape: f32[32,16], index: 20, kind: input, shape index: {}]   ;;  %s6927_s21 = inlined_call_operand.vmem [shape: f32[1,16], index: 21, kind: input, shape index: {}]   ;;  %s6928_s22 = inlined_call_operand.hbm [shape: f32[4,2,32], index: 22, kind: output, shape index: {}]  }
   0x1   :  { %6938 = sst [smem:[#allocation36_spill]] %s6906_s0 }
   0x2   :  { %6939 = sst [smem:[#allocation37_spill]] %s6907_s1 }
   0x3   :  { %6940 = sst [smem:[#allocation38_spill]] %s6908_s2 }
   0x4   :  { %6941 = sst [smem:[#allocation39_spill]] %s6909_s3 }
   0x5   :  { %6942 = sst [smem:[#allocation40_spill]] %s6910_s4 }
   0x6   :  { %6943 = sst [smem:[#allocation41_spill]] %s6911_s5 }
   0x7   :  { %6944 = sst [smem:[#allocation42_spill]] %s6912_s6 }
   0x8   :  { %6945 = sst [smem:[#allocation43_spill]] %s6925_s19 }
   0x9   :  { %6946 = sst [smem:[#allocation44_spill]] %s6927_s21 }
   0xa   :  { %6947 = sst [smem:[#allocation45_spill]] %s6928_s22 }
   0xb   :  { %27 = vsyncpa [#allocation3], 0 }
   0xc   :  { %28 = vsyncpa [#allocation6], 0 }
   0xd   :  { %29 = vsyncpa [#allocation9], 0 }
   0xe   :  { %30 = vsyncpa [#allocation12], 0 }
   0xf   :  { %31 = vsyncpa [#allocation15], 0 }
  0x10   :  { %32 = vsyncpa [#allocation18], 0 }
  0x11   :  { %33 = vsyncpa [#allocation21], 0 }
  0x12   :  { %34 = vsyncpa [#allocation24], 0 }
  0x13   :  { %35 = vsyncpa [#allocation4], 0  ;;  %s5780_s3 = smov [#allocation5]   ;;  %s6948_s4 = sld [smem:[#allocation37_spill]] }
  0x14   :  { %s51_s28 = sshll.u32 %s5780_s3, 4  ;;  %s52_s28 = int_to_ptr.vmem [resolvable:$true] %s51_s28 }
  0x19   :  { %s5410_s0 = scalar_lea.hbm %s6948_s4, 256 }
  0x1a   :  { %p5411_p0 = scmp.ne.s32.totalorder %s6948_s4, %s5410_s0  ;;  %p5414_p1 = scmp.lt.u32.totalorder %s5410_s0, %s6948_s4 }
  0x1c   :  { %p5416_p2 = pnand %p5414_p1, %p5411_p0 }
  0x1e   :  { %5419 = shalt.err (!%p5416_p2)
}
  0x1f   :  { %s5420_s6 = scalar_lea.vmem %s52_s28, 256  ;;  %p5425_p4 = scmp.lt.s32.totalorder %s52_s28, %s52_s28 }
  0x20   :  { %p5421_p3 = scmp.ne.s32.totalorder %s52_s28, %s5420_s6  ;;  %p5426_p5 = scmp.lt.s32.totalorder %s5420_s6, %s5420_s6 }
  0x22   :  { %p5427_p6 = por %p5426_p5, %p5425_p4 }
  0x24   :  { %p5428_p7 = pnand %p5427_p6, %p5421_p3 }
  0x26   :  { %5431 = shalt.err (!%p5428_p7)
}
  0x27   :  { %s5781_s25 = smov 128   ;;  %s5782_s26 = smov 8  }
  0x28   :  { %57 = dma.hbm_to_vmem [thread:$0]  %s6948_s4, 256, %s52_s28, [#allocation6], %s5781_s25, %s5781_s25, %s5782_s26  }
  0x29   :  { %s5783_s3 = smov [#allocation8]   ;;  %s5784_s30 = smov [#allocation11]  }
  0x2a   :  { %s75_s29 = sshll.u32 %s5783_s3, 4  ;;  %s100_s0 = sshll.u32 %s5784_s30, 4  ;;  %s76_s29 = int_to_ptr.vmem [resolvable:$true] %s75_s29  ;;  %s101_s0 = int_to_ptr.vmem [resolvable:$true] %s100_s0 }
  0x2b   :  { %s6949_s5 = sld [smem:[#allocation39_spill]] }
  0x31   :  { %s5432_s24 = scalar_lea.hbm %s6949_s5, 256 }
  0x32   :  { %p5433_p8 = scmp.ne.s32.totalorder %s6949_s5, %s5432_s24  ;;  %p5436_p9 = scmp.lt.u32.totalorder %s5432_s24, %s6949_s5 }
  0x34   :  { %p5438_p10 = pnand %p5436_p9, %p5433_p8 }
  0x36   :  { %5441 = shalt.err (!%p5438_p10)
}
  0x37   :  { %s5442_s28 = scalar_lea.vmem %s76_s29, 256  ;;  %p5447_p12 = scmp.lt.s32.totalorder %s76_s29, %s76_s29 }
  0x38   :  { %p5443_p11 = scmp.ne.s32.totalorder %s76_s29, %s5442_s28  ;;  %p5448_p13 = scmp.lt.s32.totalorder %s5442_s28, %s5442_s28 }
  0x3a   :  { %p5449_p0 = por %p5448_p13, %p5447_p12 }
  0x3c   :  { %p5450_p1 = pnand %p5449_p0, %p5443_p11 }
  0x3e   :  { %5453 = shalt.err (!%p5450_p1)
}
  0x3f   :  { %81 = dma.hbm_to_vmem [thread:$0]  %s6949_s5, 256, %s76_s29, [#allocation9], %s5781_s25, %s5781_s25, %s5782_s26  }
  0x40   :  { %s6950_s21 = sld [smem:[#allocation42_spill]] }
  0x46   :  { %s5454_s27 = scalar_lea.hbm %s6950_s21, 16 }
  0x47   :  { %p5455_p2 = scmp.ne.s32.totalorder %s6950_s21, %s5454_s27  ;;  %p5458_p3 = scmp.lt.u32.totalorder %s5454_s27, %s6950_s21 }
  0x49   :  { %p5460_p4 = pnand %p5458_p3, %p5455_p2 }
  0x4b   :  { %5463 = shalt.err (!%p5460_p4)
}
  0x4c   :  { %s5464_s24 = scalar_lea.vmem %s101_s0, 16  ;;  %s5468_s6 = scalar_lea.vmem %s101_s0, 32 }
  0x4d   :  { %p5465_p5 = scmp.ne.s32.totalorder %s101_s0, %s5464_s24  ;;  %p5469_p6 = scmp.lt.s32.totalorder %s101_s0, %s101_s0 }
  0x4e   :  { %p5470_p7 = scmp.lt.s32.totalorder %s5468_s6, %s5464_s24 }
  0x50   :  { %p5471_p8 = por %p5470_p7, %p5469_p6 }
  0x52   :  { %p5472_p9 = pnand %p5471_p8, %p5465_p5 }
  0x54   :  { %5475 = shalt.err (!%p5472_p9)
}
  0x55   :  { %103 = dma.hbm_to_vmem [thread:$0]  %s6950_s21, 16, %s101_s0, [#allocation12]  }
  0x56   :  { %s5785_s28 = smov [#allocation14]   ;;  %s5786_s2 = smov [#allocation17]  }
  0x57   :  { %s122_s4 = sshll.u32 %s5785_s28, 4  ;;  %s144_s22 = sshll.u32 %s5786_s2, 4  ;;  %s123_s4 = int_to_ptr.vmem [resolvable:$true] %s122_s4  ;;  %s145_s22 = int_to_ptr.vmem [resolvable:$true] %s144_s22 }
  0x58   :  { %s5476_s3 = scalar_lea.hbm %s6914_s8, 16 }
  0x59   :  { %p5477_p10 = scmp.ne.s32.totalorder %s6914_s8, %s5476_s3  ;;  %p5480_p11 = scmp.lt.u32.totalorder %s5476_s3, %s6914_s8 }
  0x5b   :  { %p5482_p12 = pnand %p5480_p11, %p5477_p10 }
  0x5d   :  { %5485 = shalt.err (!%p5482_p12)
}
  0x5e   :  { %s5486_s0 = scalar_lea.vmem %s123_s4, 16  ;;  %s5490_s21 = scalar_lea.vmem %s123_s4, 32 }
  0x5f   :  { %p5487_p13 = scmp.ne.s32.totalorder %s123_s4, %s5486_s0  ;;  %p5491_p0 = scmp.lt.s32.totalorder %s123_s4, %s123_s4 }
  0x60   :  { %p5492_p1 = scmp.lt.s32.totalorder %s5490_s21, %s5486_s0 }
  0x62   :  { %p5493_p2 = por %p5492_p1, %p5491_p0 }
  0x64   :  { %p5494_p3 = pnand %p5493_p2, %p5487_p13 }
  0x66   :  { %5497 = shalt.err (!%p5494_p3)
}
  0x67   :  { %125 = dma.hbm_to_vmem [thread:$0]  %s6914_s8, 16, %s123_s4, [#allocation15]  }
  0x68   :  { %s5498_s2 = scalar_lea.hbm %s6916_s10, 16 }
  0x69   :  { %p5499_p4 = scmp.ne.s32.totalorder %s6916_s10, %s5498_s2  ;;  %p5502_p5 = scmp.lt.u32.totalorder %s5498_s2, %s6916_s10 }
  0x6b   :  { %p5504_p6 = pnand %p5502_p5, %p5499_p4 }
  0x6d   :  { %5507 = shalt.err (!%p5504_p6)
}
  0x6e   :  { %s5508_s23 = scalar_lea.vmem %s145_s22, 16  ;;  %s5512_s1 = scalar_lea.vmem %s145_s22, 32 }
  0x6f   :  { %p5509_p7 = scmp.ne.s32.totalorder %s145_s22, %s5508_s23  ;;  %p5513_p8 = scmp.lt.s32.totalorder %s145_s22, %s145_s22 }
  0x70   :  { %p5514_p9 = scmp.lt.s32.totalorder %s5512_s1, %s5508_s23 }
  0x72   :  { %p5515_p10 = por %p5514_p9, %p5513_p8 }
  0x74   :  { %p5516_p11 = pnand %p5515_p10, %p5509_p7 }
  0x76   :  { %5519 = shalt.err (!%p5516_p11)
}
  0x77   :  { %147 = dma.hbm_to_vmem [thread:$0]  %s6916_s10, 16, %s145_s22, [#allocation18]  }
  0x78   :  { %s5787_s24 = smov [#allocation20]   ;;  %s5788_s21 = smov [#allocation23]  }
  0x79   :  { %s168_s0 = sshll.u32 %s5787_s24, 4  ;;  %s189_s6 = sshll.u32 %s5788_s21, 4  ;;  %s169_s0 = int_to_ptr.vmem [resolvable:$true] %s168_s0  ;;  %s190_s6 = int_to_ptr.vmem [resolvable:$true] %s189_s6 }
  0x7a   :  { %s5520_s28 = scalar_lea.hbm %s6920_s14, 16 }
  0x7b   :  { %p5521_p12 = scmp.ne.s32.totalorder %s6920_s14, %s5520_s28  ;;  %p5524_p13 = scmp.lt.u32.totalorder %s5520_s28, %s6920_s14 }
  0x7d   :  { %p5526_p0 = pnand %p5524_p13, %p5521_p12 }
  0x7f   :  { %5529 = shalt.err (!%p5526_p0)
}
  0x80   :  { %s5530_s10 = scalar_lea.vmem %s169_s0, 16  ;;  %s5534_s22 = scalar_lea.vmem %s169_s0, 32 }
  0x81   :  { %p5531_p1 = scmp.ne.s32.totalorder %s169_s0, %s5530_s10  ;;  %p5535_p2 = scmp.lt.s32.totalorder %s169_s0, %s169_s0 }
  0x82   :  { %p5536_p3 = scmp.lt.s32.totalorder %s5534_s22, %s5530_s10 }
  0x84   :  { %p5537_p4 = por %p5536_p3, %p5535_p2 }
  0x86   :  { %p5538_p5 = pnand %p5537_p4, %p5531_p1 }
  0x88   :  { %5541 = shalt.err (!%p5538_p5)
}
  0x89   :  { %171 = dma.hbm_to_vmem [thread:$0]  %s6920_s14, 16, %s169_s0, [#allocation21]  }
  0x8a   :  { %s5542_s4 = scalar_lea.hbm %s6922_s16, 512 }
  0x8b   :  { %p5543_p6 = scmp.ne.s32.totalorder %s6922_s16, %s5542_s4  ;;  %p5546_p7 = scmp.lt.u32.totalorder %s5542_s4, %s6922_s16 }
  0x8d   :  { %p5548_p8 = pnand %p5546_p7, %p5543_p6 }
  0x8f   :  { %5551 = shalt.err (!%p5548_p8)
}
  0x90   :  { %s5552_s28 = scalar_lea.vmem %s190_s6, 512  ;;  %p5557_p10 = scmp.lt.s32.totalorder %s190_s6, %s190_s6 }
  0x91   :  { %p5553_p9 = scmp.ne.s32.totalorder %s190_s6, %s5552_s28  ;;  %p5558_p11 = scmp.lt.s32.totalorder %s5552_s28, %s5552_s28 }
  0x93   :  { %p5559_p12 = por %p5558_p11, %p5557_p10 }
  0x95   :  { %p5560_p13 = pnand %p5559_p12, %p5553_p9 }
  0x97   :  { %5563 = shalt.err (!%p5560_p13)
}
  0x98   :  { %195 = dma.hbm_to_vmem [thread:$0]  %s6922_s16, 512, %s190_s6, [#allocation24], %s5781_s25, %s5781_s25, %s5782_s26  }
  0x99   :  { %s5789_s2 = smov [#allocation2]   ;;  %s5790_s27 = smov [#allocation7]  }
  0x9a   :  { %s42_s19 = sshll.u32 %s5789_s2, 4  ;;  %s63_s3 = sshll.u32 %s5790_s27, 4  ;;  %s43_s19 = int_to_ptr.vmem [resolvable:$true] %s42_s19  ;;  %s64_s3 = int_to_ptr.vmem [resolvable:$true] %s63_s3 }
  0x9b   :  { %s6951_s30 = sld [smem:[#allocation36_spill]] }
  0xa1   :  { %s5564_s23 = scalar_lea.hbm %s6951_s30, 32 }
  0xa2   :  { %p5565_p0 = scmp.ne.s32.totalorder %s6951_s30, %s5564_s23  ;;  %p5568_p1 = scmp.lt.u32.totalorder %s5564_s23, %s6951_s30 }
  0xa4   :  { %p5570_p2 = pnand %p5568_p1, %p5565_p0 }
  0xa6   :  { %5573 = shalt.err (!%p5570_p2)
}
  0xa7   :  { %s5574_s16 = scalar_lea.vmem %s43_s19, 32  ;;  %p5579_p4 = scmp.lt.s32.totalorder %s43_s19, %s43_s19 }
  0xa8   :  { %p5575_p3 = scmp.ne.s32.totalorder %s43_s19, %s5574_s16  ;;  %p5580_p5 = scmp.lt.s32.totalorder %s5574_s16, %s5574_s16 }
  0xaa   :  { %p5581_p6 = por %p5580_p5, %p5579_p4 }
  0xac   :  { %p5582_p7 = pnand %p5581_p6, %p5575_p3 }
  0xae   :  { %5585 = shalt.err (!%p5582_p7)
}
  0xaf   :  { %45 = dma.hbm_to_vmem [thread:$0]  %s6951_s30, 32, %s43_s19, [#allocation3]  }
  0xb0   :  { %s6952_s28 = sld [smem:[#allocation38_spill]] }
  0xb6   :  { %s5586_s14 = scalar_lea.hbm %s6952_s28, 256 }
  0xb7   :  { %p5587_p8 = scmp.ne.s32.totalorder %s6952_s28, %s5586_s14  ;;  %p5590_p9 = scmp.lt.u32.totalorder %s5586_s14, %s6952_s28 }
  0xb9   :  { %p5592_p10 = pnand %p5590_p9, %p5587_p8 }
  0xbb   :  { %5595 = shalt.err (!%p5592_p10)
}
  0xbc   :  { %s5596_s22 = scalar_lea.vmem %s64_s3, 256  ;;  %p5601_p12 = scmp.lt.s32.totalorder %s64_s3, %s64_s3 }
  0xbd   :  { %p5597_p11 = scmp.ne.s32.totalorder %s64_s3, %s5596_s22  ;;  %p5602_p13 = scmp.lt.s32.totalorder %s5596_s22, %s5596_s22 }
  0xbf   :  { %p5603_p0 = por %p5602_p13, %p5601_p12 }
  0xc1   :  { %p5604_p1 = pnand %p5603_p0, %p5597_p11 }
  0xc3   :  { %5607 = shalt.err (!%p5604_p1)
}
  0xc4   :  { %69 = dma.hbm_to_vmem [thread:$0]  %s6952_s28, 256, %s64_s3, [#allocation6], %s5781_s25, %s5781_s25, %s5782_s26  }
  0xc5   :  { %s5791_s23 = smov [#allocation10]   ;;  %s5792_s8 = smov [#allocation13]  }
  0xc6   :  { %s88_s1 = sshll.u32 %s5791_s23, 4  ;;  %s109_s4 = sshll.u32 %s5792_s8, 4  ;;  %s89_s1 = int_to_ptr.vmem [resolvable:$true] %s88_s1  ;;  %s110_s4 = int_to_ptr.vmem [resolvable:$true] %s109_s4 }
  0xc7   :  { %s6953_s6 = sld [smem:[#allocation40_spill]] }
  0xcd   :  { %s5608_s21 = scalar_lea.hbm %s6953_s6, 16 }
  0xce   :  { %p5609_p2 = scmp.ne.s32.totalorder %s6953_s6, %s5608_s21  ;;  %p5612_p3 = scmp.lt.u32.totalorder %s5608_s21, %s6953_s6 }
  0xd0   :  { %p5614_p4 = pnand %p5612_p3, %p5609_p2 }
  0xd2   :  { %5617 = shalt.err (!%p5614_p4)
}
  0xd3   :  { %s5618_s3 = scalar_lea.vmem %s89_s1, 16  ;;  %s5622_s28 = scalar_lea.vmem %s89_s1, 32 }
  0xd4   :  { %p5619_p5 = scmp.ne.s32.totalorder %s89_s1, %s5618_s3  ;;  %p5623_p6 = scmp.lt.s32.totalorder %s89_s1, %s89_s1 }
  0xd5   :  { %p5624_p7 = scmp.lt.s32.totalorder %s5622_s28, %s5618_s3 }
  0xd7   :  { %p5625_p8 = por %p5624_p7, %p5623_p6 }
  0xd9   :  { %p5626_p9 = pnand %p5625_p8, %p5619_p5 }
  0xdb   :  { %5629 = shalt.err (!%p5626_p9)
}
  0xdc   :  { %91 = dma.hbm_to_vmem [thread:$0]  %s6953_s6, 16, %s89_s1, [#allocation9]  }
  0xdd   :  { %s5630_s19 = scalar_lea.hbm %s6913_s7, 512 }
  0xde   :  { %p5631_p10 = scmp.ne.s32.totalorder %s6913_s7, %s5630_s19  ;;  %p5634_p11 = scmp.lt.u32.totalorder %s5630_s19, %s6913_s7 }
  0xe0   :  { %p5636_p12 = pnand %p5634_p11, %p5631_p10 }
  0xe2   :  { %5639 = shalt.err (!%p5636_p12)
}
  0xe3   :  { %s5640_s16 = scalar_lea.vmem %s110_s4, 512  ;;  %p5645_p0 = scmp.lt.s32.totalorder %s110_s4, %s110_s4 }
  0xe4   :  { %p5641_p13 = scmp.ne.s32.totalorder %s110_s4, %s5640_s16  ;;  %p5646_p1 = scmp.lt.s32.totalorder %s5640_s16, %s5640_s16 }
  0xe6   :  { %p5647_p2 = por %p5646_p1, %p5645_p0 }
  0xe8   :  { %p5648_p3 = pnand %p5647_p2, %p5641_p13 }
  0xea   :  { %5651 = shalt.err (!%p5648_p3)
}
  0xeb   :  { %115 = dma.hbm_to_vmem [thread:$0]  %s6913_s7, 512, %s110_s4, [#allocation12], %s5781_s25, %s5781_s25, %s5782_s26  }
  0xec   :  { %s5793_s21 = smov [#allocation16]   ;;  %s5794_s5 = smov [#allocation19]  }
  0xed   :  { %s131_s29 = sshll.u32 %s5793_s21, 4  ;;  %s156_s14 = sshll.u32 %s5794_s5, 4  ;;  %s132_s29 = int_to_ptr.vmem [resolvable:$true] %s131_s29  ;;  %s157_s14 = int_to_ptr.vmem [resolvable:$true] %s156_s14 }
  0xee   :  { %s5652_s28 = scalar_lea.hbm %s6915_s9, 768 }
  0xef   :  { %p5653_p4 = scmp.ne.s32.totalorder %s6915_s9, %s5652_s28  ;;  %p5656_p5 = scmp.lt.u32.totalorder %s5652_s28, %s6915_s9 }
  0xf1   :  { %p5658_p6 = pnand %p5656_p5, %p5653_p4 }
  0xf3   :  { %5661 = shalt.err (!%p5658_p6)
}
  0xf4   :  { %s5662_s7 = scalar_lea.vmem %s132_s29, 768  ;;  %p5667_p8 = scmp.lt.s32.totalorder %s132_s29, %s132_s29 }
  0xf5   :  { %p5663_p7 = scmp.ne.s32.totalorder %s132_s29, %s5662_s7  ;;  %p5668_p9 = scmp.lt.s32.totalorder %s5662_s7, %s5662_s7 }
  0xf7   :  { %p5669_p10 = por %p5668_p9, %p5667_p8 }
  0xf9   :  { %p5670_p11 = pnand %p5669_p10, %p5663_p7 }
  0xfb   :  { %5673 = shalt.err (!%p5670_p11)
}
  0xfc   :  { %137 = dma.hbm_to_vmem [thread:$0]  %s6915_s9, 768, %s132_s29, [#allocation15], %s5781_s25, %s5781_s25, %s5782_s26  }
  0xfd   :  { %s5674_s8 = scalar_lea.hbm %s6918_s12, 16 }
  0xfe   :  { %p5675_p12 = scmp.ne.s32.totalorder %s6918_s12, %s5674_s8  ;;  %p5678_p13 = scmp.lt.u32.totalorder %s5674_s8, %s6918_s12 }
 0x100   :  { %p5680_p0 = pnand %p5678_p13, %p5675_p12 }
 0x102   :  { %5683 = shalt.err (!%p5680_p0)
}
 0x103   :  { %s5684_s21 = scalar_lea.vmem %s157_s14, 16  ;;  %s5688_s5 = scalar_lea.vmem %s157_s14, 32 }
 0x104   :  { %p5685_p1 = scmp.ne.s32.totalorder %s157_s14, %s5684_s21  ;;  %p5689_p2 = scmp.lt.s32.totalorder %s157_s14, %s157_s14 }
 0x105   :  { %p5690_p3 = scmp.lt.s32.totalorder %s5688_s5, %s5684_s21 }
 0x107   :  { %p5691_p4 = por %p5690_p3, %p5689_p2 }
 0x109   :  { %p5692_p5 = pnand %p5691_p4, %p5685_p1 }
 0x10b   :  { %5695 = shalt.err (!%p5692_p5)
}
 0x10c   :  { %159 = dma.hbm_to_vmem [thread:$0]  %s6918_s12, 16, %s157_s14, [#allocation18]  }
 0x10d   :  { %s5795_s0 = smov [#allocation22]   ;;  %s5796_s28 = smov [#allocation25]  }
 0x10e   :  { %s177_s3 = sshll.u32 %s5795_s0, 4  ;;  %s202_s2 = sshll.u32 %s5796_s28, 4  ;;  %s178_s3 = int_to_ptr.vmem [resolvable:$true] %s177_s3  ;;  %s203_s2 = int_to_ptr.vmem [resolvable:$true] %s202_s2 }
 0x10f   :  { %s5696_s22 = scalar_lea.hbm %s6921_s15, 512 }
 0x110   :  { %p5697_p6 = scmp.ne.s32.totalorder %s6921_s15, %s5696_s22  ;;  %p5700_p7 = scmp.lt.u32.totalorder %s5696_s22, %s6921_s15 }
 0x112   :  { %p5702_p8 = pnand %p5700_p7, %p5697_p6 }
 0x114   :  { %5705 = shalt.err (!%p5702_p8)
}
 0x115   :  { %s5706_s12 = scalar_lea.vmem %s178_s3, 512  ;;  %p5711_p10 = scmp.lt.s32.totalorder %s178_s3, %s178_s3 }
 0x116   :  { %p5707_p9 = scmp.ne.s32.totalorder %s178_s3, %s5706_s12  ;;  %p5712_p11 = scmp.lt.s32.totalorder %s5706_s12, %s5706_s12 }
 0x118   :  { %p5713_p12 = por %p5712_p11, %p5711_p10 }
 0x11a   :  { %p5714_p13 = pnand %p5713_p12, %p5707_p9 }
 0x11c   :  { %5717 = shalt.err (!%p5714_p13)
}
 0x11d   :  { %183 = dma.hbm_to_vmem [thread:$0]  %s6921_s15, 512, %s178_s3, [#allocation21], %s5781_s25, %s5781_s25, %s5782_s26  }
 0x11e   :  { %s5718_s16 = scalar_lea.hbm %s6923_s17, 16 }
 0x11f   :  { %p5719_p0 = scmp.ne.s32.totalorder %s6923_s17, %s5718_s16  ;;  %p5722_p1 = scmp.lt.u32.totalorder %s5718_s16, %s6923_s17 }
 0x121   :  { %p5724_p2 = pnand %p5722_p1, %p5719_p0 }
 0x123   :  { %5727 = shalt.err (!%p5724_p2)
}
 0x124   :  { %s5728_s9 = scalar_lea.vmem %s203_s2, 16  ;;  %s5732_s29 = scalar_lea.vmem %s203_s2, 32 }
 0x125   :  { %p5729_p3 = scmp.ne.s32.totalorder %s203_s2, %s5728_s9  ;;  %p5733_p4 = scmp.lt.s32.totalorder %s203_s2, %s203_s2 }
 0x126   :  { %p5734_p5 = scmp.lt.s32.totalorder %s5732_s29, %s5728_s9 }
 0x128   :  { %p5735_p6 = por %p5734_p5, %p5733_p4 }
 0x12a   :  { %p5736_p7 = pnand %p5735_p6, %p5729_p3 }
 0x12c   :  { %5739 = shalt.err (!%p5736_p7)
}
 0x12d   :  { %205 = dma.hbm_to_vmem [thread:$0]  %s6923_s17, 16, %s203_s2, [#allocation24]  }
 0x12e   :  { %5762 = dma.done.wait [#allocation3], 32  }
 0x12f   :  { %5763 = vsyncadd [#allocation3], 4294967264 }
 0x130   :  { %5764 = dma.done.wait [#allocation6], 512  }
 0x131   :  { %5765 = vsyncadd [#allocation6], 4294966784 }
 0x132   :  { %5766 = dma.done.wait [#allocation9], 272  }
 0x133   :  { %5767 = vsyncadd [#allocation9], 4294967024 }
 0x134   :  { %5768 = dma.done.wait [#allocation12], 528  }
 0x135   :  { %5769 = vsyncadd [#allocation12], 4294966768 }
 0x136   :  { %5770 = dma.done.wait [#allocation15], 784  }
 0x137   :  { %5771 = vsyncadd [#allocation15], 4294966512 }
 0x138   :  { %5772 = dma.done.wait [#allocation18], 32  }
 0x139   :  { %5773 = vsyncadd [#allocation18], 4294967264 }
 0x13a   :  { %5774 = dma.done.wait [#allocation21], 528  }
 0x13b   :  { %5775 = vsyncadd [#allocation21], 4294966768 }
 0x13c   :  { %5776 = dma.done.wait [#allocation24], 528  }
 0x13d   :  { %5777 = vsyncadd [#allocation24], 4294966768  ;;  %v5797_v0 = vmov 0.0|0.0   ;;  %vm5798_vm0 = vmmov 0   ;;  %v5799_v1 = vmov 0.0   ;;  %v264_v2 = vld [vmem:[#allocation8] sm:$0xff] }
 0x13e   :  { %4966 = vmatprep.subr.bf16.mxu1 %v5797_v0  ;;  %4477 = vmatprep.mubr.msk.f32.mxu1 %vm5798_vm0, %v5799_v1  ;;  %v265_v3 = vld [vmem:[#allocation8 + $0x8] sm:$0xff]  ;;  %s6954_s0 = sld [smem:[#allocation41_spill]]  ;;  %v320_v7 = vld [vmem:[#allocation2] sm:$0x3]  ;;  %vm327_vm1 = vcmask 130048   ;;  %v276_v12 = vld [vmem:[#allocation16] sm:$0xff] }
 0x13f   :  { %4975 = vmatprep.subr.bf16.mxu0 %v5797_v0  ;;  %4503 = vmatprep.mubr.msk.f32.mxu0 %vm5798_vm0, %v5799_v1  ;;  %v6130_v4 = vpack.c.bf16 %v265_v3, %v264_v2  ;;  %v277_v13 = vld [vmem:[#allocation16 + $0x8] sm:$0xff]  ;;  %v278_v14 = vld [vmem:[#allocation16 + $0x10] sm:$0xff]  ;;  %v279_v16 = vld [vmem:[#allocation16 + $0x18] sm:$0xff]  ;;  %vm408_vm2 = vcmask 261120   ;;  %vm490_vm3 = vcmask 392192   ;;  %s5800_s7 = smov 32   ;;  %v668_v3 = vlaneseq }
 0x140   :  { %v6157_v15 = vpack.c.bf16 %v277_v13, %v276_v12  ;;  %v6160_v17 = vpack.c.bf16 %v279_v16, %v278_v14  ;;  %v6165_v18 = vld [vmem:[#allocation10] ss:$0 sm:$0xff]  ;;  %v280_v23 = vld [vmem:[#allocation16 + $0x20] sm:$0xff]  ;;  %v281_v24 = vld [vmem:[#allocation16 + $0x28] sm:$0xff]  ;;  %s5801_s4 = smov 64   ;;  %s5802_s19 = smov 96  }
 0x141   :  { %4968 = vmatpush3.bf16.msra.mxu1 %v6130_v4  ;;  %v6171_v25 = vpack.c.bf16 %v281_v24, %v280_v23  ;;  %v6175_v26 = vld [vmem:[#allocation11] ss:$0 sm:$0xff]  ;;  %v6182_v32 = vld [vmem:[#allocation17] ss:$0 sm:$0xff]  ;;  %v272_v44 = vld [vmem:[#allocation13] sm:$0xff]  ;;  %vm727_vm4 = vcmask 1041409  }
 0x142   :  { %4969 = vmatprep.subr.bf16.mxu1 %v5797_v0  ;;  %4977 = vmatpush3.bf16.msra.mxu0 %v6157_v15  ;;  %v273_v45 = vld [vmem:[#allocation13 + $0x8] sm:$0xff]  ;;  %v274_v46 = vld [vmem:[#allocation13 + $0x10] sm:$0xff]  ;;  %v275_v48 = vld [vmem:[#allocation13 + $0x18] sm:$0xff]  ;;  %v5803_v63 = vmov 1966171168   ;;  %vm730_vm5 = vcmask 58368  }
 0x143   :  { %4978 = vmatprep.subr.bf16.mxu0 %v5797_v0  ;;  %v6187_v47 = vpack.c.bf16 %v273_v45, %v272_v44  ;;  %v6190_v49 = vpack.c.bf16 %v275_v48, %v274_v46  ;;  %v301_v56 = vld [vmem:[#allocation22] sm:$0xff]  ;;  %v302_v57 = vld [vmem:[#allocation22 + $0x8] sm:$0xff]  ;;  %v303_v59 = vld [vmem:[#allocation22 + $0x10] sm:$0xff]  ;;  %v666_v2 = vunpack.c.l.s4 %v5803_v63  ;;  %v5804_v46 = vmov 0   ;;  %s6955_s10 = sld [smem:[#allocation43_spill]]  ;;  %s6956_s12 = sld [smem:[#allocation44_spill]] }
 0x144   :  { %v267_v5 = vld [vmem:[%s6954_s0] sm:$0xff]  ;;  %v268_v6 = vld [vmem:[%s6954_s0 + $0x8] sm:$0xff]  ;;  %4478 = vmatmul.mubr.msk.f32.vlgmr.msra.gmra.mrb[0].mxu1 %vm327_vm1, %v320_v7  ;;  %v269_v9 = vld [vmem:[%s6954_s0 + $0x10] sm:$0xff]  ;;  %v6200_v58 = vpack.c.bf16 %v302_v57, %v301_v56  ;;  %5277 = vset.pattern.permute.xlu1 %v5804_v46  ;;  %vm972_vm6 = vcmask 523264   ;;  %vm1265_vm7 = vcmask 254976   ;;  %s5806_s14 = smov [#allocation26]  }
 0x145   :  { %v6139_v8 = vpack.c.bf16 %v268_v6, %v267_v5  ;;  %4488 = vmatprep.mubr.msk.f32.mxu1 %vm5798_vm0, %v5799_v1  ;;  %v270_v10 = vld [vmem:[%s6954_s0 + $0x18] sm:$0xff]  ;;  %v304_v60 = vld [vmem:[#allocation22 + $0x18] sm:$0xff]  ;;  %v667_v5 = vunpack.c.0.s8 %v666_v2  ;;  %v669_v6 = vshrl.u32 %v668_v3, 7  ;;  %5276 = vset.pattern.permute.xlu0 %v5804_v46 }
 0x146   :  { %v6153_v11 = vpack.c.bf16 %v270_v10, %v269_v9  ;;  %4980 = vmatpush3.bf16.msra.mxu0 %v6160_v17  ;;  %v6204_v62 = vpack.c.bf16 %v304_v60, %v303_v59 }
 0x147   :  { %4971 = vmatpush3.bf16.msra.mxu1 %v6139_v8  ;;  %4981 = vmatprep.subr.bf16.mxu0 %v5797_v0  ;;  %v6214_v7 = vsub.s32 %v667_v5, %v669_v6  ;;  %v6217_v12 = vsub.s32 0, %v669_v6  ;;  %v6243_v48 = vsub.s32 1, %v669_v6 }
 0x148   :  { %4972 = vmatprep.subr.bf16.mxu1 %v5797_v0 }
 0x14a   :  { %4983 = vmatpush3.bf16.msra.mxu0 %v6171_v25 }
 0x14b   :  { %4974 = vmatpush3.bf16.msra.mxu1 %v6153_v11  ;;  %4990 = vmatprep.subr.bf16.mxu0 %v5797_v0 }
 0x14c   :  { %4984 = vmatprep.subr.bf16.mxu1 %v5797_v0 }
 0x217   :  { %v397_v19 = vpop.f32.mrb[0].mxu1 }
 0x218   :  { %v398_v20 = vadd.f32 %v6165_v18, %v397_v19  ;;  %v4479_v21 = vpop.f32.mrb[1].mxu1  ;;  %v6220_v19 = vld [vmem:[#allocation7] sm:$0xff] }
 0x21a   :  { %v401_v22 = vmax.f32 %v398_v20, 0.0 }
 0x21c   :  { %4489 = vmatmul.mubr.msk.f32.vlgmr.msra.gmra.mrb[2].mxu1 %vm408_vm2, %v401_v22  ;;  %v6224_v22 = vld [vmem:[#allocation7 + $0x8] sm:$0xff] }
 0x21d   :  { %4514 = vmatprep.mubr.msk.f32.mxu1 %vm5798_vm0, %v5799_v1  ;;  %4986 = vmatpush3.bf16.msra.mxu1 %v6187_v47 }
 0x21e   :  { %4987 = vmatprep.subr.bf16.mxu1 %v5797_v0 }
 0x221   :  { %4989 = vmatpush3.bf16.msra.mxu1 %v6190_v49 }
 0x222   :  { %4996 = vmatprep.subr.bf16.mxu1 %v5797_v0 }
 0x2ef   :  { %v478_v27 = vpop.f32.mrb[2].mxu1 }
 0x2f0   :  { %v479_v28 = vadd.f32 %v6175_v26, %v478_v27  ;;  %v4490_v29 = vpop.f32.mrb[3].mxu1 }
 0x2f2   :  { %v482_v30 = vmax.f32 %v479_v28, 0.0 }
 0x2f4   :  { %v483_v31 = vsel %vm327_vm1, %v482_v30, 0.0  ;;  %v6231_v30 = vld [vmem:[#allocation14] ss:$0 sm:$0xff] }
 0x2f5   :  { %4504 = vmatmul.mubr.msk.f32.vlgmr.msra.gmra.mrb[0].mxu0 %vm490_vm3, %v483_v31 }
 0x2f6   :  { %4525 = vmatprep.mubr.msk.f32.mxu0 %vm5798_vm0, %v5799_v1 }
 0x3c8   :  { %v560_v33 = vpop.f32.mrb[0].mxu0 }
 0x3c9   :  { %v561_v34 = vadd.f32 %v6182_v32, %v560_v33  ;;  %v4505_v35 = vpop.f32.mrb[1].mxu0 }
 0x3cb   :  { %571 = vrot.lane.b32.xlu0 %v561_v34, %s5800_s7  ;;  %v4192_v36 = vmul.f32 -1.442695, %v561_v34 }
 0x3cd   :  { %5278 = vpow2.f32 %v4192_v36 }
 0x3d7   :  { %v5279_v37 = vpop.eup %5278 }
 0x3d8   :  { %v567_v38 = vadd.f32 1.0, %v5279_v37 }
 0x3da   :  { %5280 = vrcp.f32 %v567_v38  ;;  %v718_v38 = vand.u32 127, %v668_v3 }
 0x3e4   :  { %v5281_v39 = vpop.eup %5280 }
 0x3e5   :  { %v581_v51 = vsub.f32 1.0, %v5281_v39  ;;  %v587_v53 = vmul.f32 0.0, %v5281_v39 }
 0x43d   :  { %v572_v40 = vpop.permute.xlu0 %571 }
 0x43e   :  { %v574_v41 = vmul.f32 %v5281_v39, %v572_v40  ;;  %v6237_v39 = vsub.s32 %v718_v38, %v669_v6 }
 0x440   :  { %576 = vrot.lane.b32.xlu0 %v574_v41, %s5801_s4 }
 0x4b2   :  { %v577_v42 = vpop.permute.xlu0 %576 }
 0x4b3   :  { %v579_v43 = vadd.f32 %v577_v42, %v561_v34 }
 0x4b5   :  { %5282 = vtanh.f32 %v579_v43 }
 0x4bf   :  { %v5283_v50 = vpop.eup %5282 }
 0x4c0   :  { %583 = vrot.lane.b32.xlu1 %v5283_v50, %s5802_s19 }
 0x532   :  { %v584_v52 = vpop.permute.xlu1 %583 }
 0x533   :  { %v586_v54 = vmul.f32 %v584_v52, %v581_v51 }
 0x535   :  { %v6196_v55 = vadd.f32 %v587_v53, %v586_v54 }
 0x537   :  { %590 = vrot.lane.b32.xlu1 %v6196_v55, %s5802_s19 }
 0x5a9   :  { %v591_v61 = vpop.permute.xlu1 %590 }
 0x5aa   :  { %4515 = vmatmul.mubr.msk.f32.vlgmr.msra.gmra.mrb[4].mxu1 %vm408_vm2, %v591_v61 }
 0x5ab   :  { %4998 = vmatpush3.bf16.msra.mxu1 %v6200_v58  ;;  %4536 = vmatprep.mubr.msk.f32.mxu1 %vm5798_vm0, %v5799_v1 }
 0x5ac   :  { %4999 = vmatprep.subr.bf16.mxu1 %v5797_v0 }
 0x5af   :  { %5001 = vmatpush3.bf16.msra.mxu1 %v6204_v62 }
 0x5b0   :  { %5014 = vmatprep.subr.bf16.mxu1 %v5797_v0 }
 0x5b2   :  { %4537 = vmatmul.mubr.msk.f32.vlgmr.msra.gmra.mrb[6].mxu1 %vm408_vm2, %v591_v61 }
 0x5b3   :  { %4574 = vmatprep.mubr.msk.f32.mxu1 %vm5798_vm0, %v5799_v1 }
 0x67d   :  { %v660_v9 = vpop.f32.mrb[4].mxu1 }
 0x67e   :  { %v671_v10 = vrot.slane %v660_v9, %v6214_v7  ;;  %v4516_v13 = vpop.f32.mrb[5].mxu1 }
 0x680   :  { %v672_v14 = vcombine.high %v671_v10, %v671_v10  ;;  %v679_v16 = vrot.slane %v671_v10, %v6214_v7 }
 0x682   :  { %v686_v20 = vrot.slane %v672_v14, %v6214_v7  ;;  %v690_v21 = vrot.slane %v679_v16, %v6217_v12 }
 0x684   :  { %v694_v23 = vrot.slane %v686_v20, %v6217_v12  ;;  %v697_v24 = vadd.f32 %v690_v21, %v6220_v19 }
 0x685   :  { %v6228_v27 = vpop.f32.mrb[6].mxu1 }
 0x686   :  { %v698_v28 = vadd.f32 %v694_v23, %v6224_v22  ;;  %5284 = vtanh.f32 %v697_v24  ;;  %v4538_v29 = vpop.f32.mrb[7].mxu1  ;;  %v305_v23 = vld [vmem:[#allocation23] sm:$0xff]  ;;  %v306_v24 = vld [vmem:[#allocation23 + $0x8] sm:$0xff] }
 0x687   :  { %v307_v29 = vld [vmem:[#allocation23 + $0x10] sm:$0xff] }
 0x688   :  { %5286 = vtanh.f32 %v698_v28  ;;  %v6253_v28 = vpack.c.bf16 %v306_v24, %v305_v23 }
 0x68a   :  { %4992 = vmatpush3.bf16.msra.mxu0 %v6253_v28 }
 0x68b   :  { %4993 = vmatprep.subr.bf16.mxu0 %v5797_v0 }
 0x690   :  { %v5285_v31 = vpop.eup %5284 }
 0x691   :  { %v707_v33 = vmul.f32 %v5285_v31, %v6231_v30  ;;  %v308_v31 = vld [vmem:[#allocation23 + $0x18] sm:$0xff] }
 0x692   :  { %v5287_v34 = vpop.eup %5286 }
 0x693   :  { %v709_v35 = vsel %vm408_vm2, %v707_v33, 0.0  ;;  %v708_v36 = vmul.f32 %v5287_v34, %v6231_v30  ;;  %v6257_v33 = vpack.c.bf16 %v308_v31, %v307_v29  ;;  %v6261_v34 = vld [vmem:[#allocation5] sm:$0xff] }
 0x694   :  { %710 = vadd.xlane.f32.xlu0 %v709_v35 }
 0x695   :  { %v712_v37 = vsel %vm408_vm2, %v708_v36, 0.0  ;;  %4995 = vmatpush3.bf16.msra.mxu0 %v6257_v33 }
 0x696   :  { %713 = vadd.xlane.f32.xlu1 %v712_v37  ;;  %5002 = vmatprep.subr.bf16.mxu0 %v5797_v0  ;;  %v6264_v37 = vld [vmem:[#allocation5 + $0x8] sm:$0xff] }
 0x721   :  { %v711_v40 = vpop.xlane.xlu0 %710 }
 0x722   :  { %v722_v42 = vrot.slane %v711_v40, %v6237_v39 }
 0x723   :  { %v714_v41 = vpop.xlane.xlu1 %713 }
 0x724   :  { %v726_v43 = vrot.slane %v714_v41, %v6237_v39 }
 0x726   :  { %v728_v44 = vsel %vm727_vm4, %v726_v43, %v722_v42 }
 0x727   :  { %v731_v45 = vsel %vm730_vm5, %v728_v44, -inf }
 0x728   :  { %732 = vmax.xlane.f32.xlu0 %v731_v45 }
 0x7b5   :  { %v733_v50 = vpop.xlane.xlu0 %732 }
 0x7b6   :  { %v738_v51 = vrot.slane %v733_v50, %v6217_v12  ;;  %v742_v52 = vrot.slane %v733_v50, %v6243_v48 }
 0x7b8   :  { %v745_v53 = vsub.f32 %v711_v40, %v738_v51  ;;  %v746_v54 = vsub.f32 %v714_v41, %v742_v52 }
 0x7ba   :  { %v747_v56 = vmul.f32 1.442695, %v745_v53  ;;  %v749_v57 = vmul.f32 1.442695, %v746_v54 }
 0x7bc   :  { %5288 = vpow2.f32 %v747_v56  ;;  %v283_v56 = vld [vmem:[%s6917_s11] sm:$0xff] }
 0x7bd   :  { %5290 = vpow2.f32 %v749_v57  ;;  %v284_v57 = vld [vmem:[%s6917_s11 + $0x8] sm:$0xff] }
 0x7c6   :  { %v5289_v59 = vpop.eup %5288 }
 0x7c7   :  { %v5291_v60 = vpop.eup %5290  ;;  %754 = vperm.xlu0 %5276, %v5289_v59  }
 0x7c8   :  { %757 = vperm.xlu1 %5277, %v5291_v60  }
 0x846   :  { %v755_v61 = vpop.permute.xlu0 %754 }
 0x847   :  { %v758_v63 = vpop.permute.xlu1 %757  ;;  %v762_v2 = vrot.slane %v755_v61, %v6237_v39 }
 0x848   :  { %v766_v3 = vrot.slane %v758_v63, %v6237_v39  ;;  %v6275_v63 = vpack.c.bf16 %v284_v57, %v283_v56  ;;  %v295_v57 = vld [vmem:[%s6919_s13 + $0x18] sm:$0xff] }
 0x84a   :  { %v767_v5 = vsel %vm727_vm4, %v766_v3, %v762_v2  ;;  %v285_v2 = vld [vmem:[%s6917_s11 + $0x10] sm:$0xff]  ;;  %v286_v3 = vld [vmem:[%s6917_s11 + $0x18] sm:$0xff] }
 0x84b   :  { %v769_v6 = vsel %vm730_vm5, %v767_v5, 0.0 }
 0x84c   :  { %770 = vadd.xlane.f32.xlu1 %v769_v6  ;;  %v6286_v6 = vpack.c.bf16 %v286_v3, %v285_v2 }
 0x8d9   :  { %v771_v9 = vpop.xlane.xlu1 %770 }
 0x8da   :  { %v776_v10 = vrot.slane %v771_v9, %v6217_v12  ;;  %v780_v13 = vrot.slane %v771_v9, %v6243_v48  ;;  %v287_v9 = vld [vmem:[%s6917_s11 + $0x20] sm:$0xff] }
 0x8dc   :  { %5292 = vrcp.f32 %v776_v10  ;;  %v288_v10 = vld [vmem:[%s6917_s11 + $0x28] sm:$0xff] }
 0x8dd   :  { %5294 = vrcp.f32 %v780_v13  ;;  %v6298_v13 = vpack.c.bf16 %v288_v10, %v287_v9  ;;  %v299_v9 = vld [vmem:[%s6919_s13 + $0x38] sm:$0xff] }
 0x8e6   :  { %v5293_v14 = vpop.eup %5292 }
 0x8e7   :  { %v784_v16 = vmul.f32 %v5293_v14, %v5289_v59  ;;  %v5295_v20 = vpop.eup %5294  ;;  %v289_v14 = vld [vmem:[%s6917_s11 + $0x30] sm:$0xff] }
 0x8e8   :  { %v786_v21 = vmul.f32 %v5295_v20, %v5291_v60 }
 0x8e9   :  { %789 = vperm.xlu0 %5276, %v784_v16   ;;  %v290_v16 = vld [vmem:[%s6917_s11 + $0x38] sm:$0xff] }
 0x8ea   :  { %v6309_v20 = vpack.c.bf16 %v290_v16, %v289_v14 }
 0x8ed   :  { %794 = vperm.xlu0 %5276, %v786_v21   ;;  %v6313_v21 = vld [vmem:[#allocation25] ss:$0 sm:$0xff] }
 0x968   :  { %v790_v35 = vpop.permute.xlu0 %789 }
 0x969   :  { %v797_v36 = vmul.f32 %v790_v35, %v6261_v34 }
 0x96b   :  { %v799_v38 = vsel %vm408_vm2, %v797_v36, 0.0  ;;  %v6321_v36 = vld [vmem:[#allocation19] ss:$0 sm:$0xff] }
 0x96c   :  { %v800_v40 = vrot.slane %v799_v38, 4  ;;  %v795_v41 = vpop.permute.xlu0 %794 }
 0x96d   :  { %v798_v42 = vmul.f32 %v795_v41, %v6264_v37 }
 0x96e   :  { %v801_v43 = vadd.f32 %v800_v40, %v799_v38 }
 0x96f   :  { %v806_v44 = vsel %vm408_vm2, %v798_v42, 0.0 }
 0x970   :  { %v802_v45 = vrot.slane %v801_v43, 2  ;;  %v807_v46 = vrot.slane %v806_v44, 4 }
 0x972   :  { %v803_v50 = vadd.f32 %v802_v45, %v801_v43  ;;  %v808_v51 = vadd.f32 %v807_v46, %v806_v44 }
 0x974   :  { %v809_v52 = vrot.slane %v808_v51, 2  ;;  %v804_v53 = vrot.slane %v803_v50, 1 }
 0x976   :  { %v810_v54 = vadd.f32 %v809_v52, %v808_v51  ;;  %v805_v60 = vadd.f32 %v804_v53, %v803_v50  ;;  %v292_v52 = vld [vmem:[%s6919_s13] sm:$0xff]  ;;  %v293_v53 = vld [vmem:[%s6919_s13 + $0x8] sm:$0xff] }
 0x977   :  { %v6335_v56 = vpack.c.bf16 %v293_v53, %v292_v52 }
 0x978   :  { %v811_v59 = vrot.slane %v810_v54, 1 }
 0x979   :  { %5016 = vmatpush3.bf16.msra.mxu1 %v6335_v56 }
 0x97a   :  { %v812_v61 = vadd.f32 %v811_v59, %v810_v54  ;;  %v294_v54 = vld [vmem:[%s6919_s13 + $0x10] sm:$0xff]  ;;  %5017 = vmatprep.subr.bf16.mxu1 %v5797_v0 }
 0x97b   :  { %v6341_v59 = vpack.c.bf16 %v295_v57, %v294_v54  ;;  %v310_v54 = vld [vmem:[%s6924_s18] sm:$0xff]  ;;  %v311_v57 = vld [vmem:[%s6924_s18 + $0x8] sm:$0xff] }
 0x97c   :  { %v815_v5 = vsel %vm727_vm4, %v812_v61, %v805_v60  ;;  %v296_v60 = vld [vmem:[%s6919_s13 + $0x20] sm:$0xff]  ;;  %v297_v61 = vld [vmem:[%s6919_s13 + $0x28] sm:$0xff] }
 0x97d   :  { %4526 = vmatmul.mubr.msk.f32.vlgmr.msra.gmra.mrb[2].mxu0 %vm408_vm2, %v815_v5  ;;  %5019 = vmatpush3.bf16.msra.mxu1 %v6341_v59  ;;  %v6351_v2 = vpack.c.bf16 %v297_v61, %v296_v60  ;;  %v298_v5 = vld [vmem:[%s6919_s13 + $0x30] sm:$0xff]  ;;  %v315_v60 = vld [vmem:[%s6926_s20] sm:$0xff]  ;;  %v6389_v61 = vpack.c.bf16 %v311_v57, %v310_v54 }
 0x97e   :  { %5004 = vmatpush3.bf16.msra.mxu0 %v6275_v63  ;;  %4555 = vmatprep.mubr.msk.f32.mxu0 %vm5798_vm0, %v5799_v1  ;;  %v6363_v10 = vpack.c.bf16 %v299_v9, %v298_v5  ;;  %v312_v5 = vld [vmem:[%s6924_s18 + $0x10] sm:$0xff]  ;;  %v313_v9 = vld [vmem:[%s6924_s18 + $0x18] sm:$0xff]  ;;  %s5805_s18 = smov 112  }
 0x97f   :  { %5005 = vmatprep.subr.bf16.mxu0 %v5797_v0  ;;  %5020 = vmatprep.subr.bf16.mxu1 %v5797_v0 }
 0x981   :  { %5022 = vmatpush3.bf16.msra.mxu1 %v6351_v2 }
 0x982   :  { %5007 = vmatpush3.bf16.msra.mxu0 %v6286_v6  ;;  %5023 = vmatprep.subr.bf16.mxu1 %v5797_v0 }
 0x983   :  { %5008 = vmatprep.subr.bf16.mxu0 %v5797_v0 }
 0x985   :  { %5025 = vmatpush3.bf16.msra.mxu1 %v6363_v10 }
 0x986   :  { %5010 = vmatpush3.bf16.msra.mxu0 %v6298_v13  ;;  %5032 = vmatprep.subr.bf16.mxu1 %v5797_v0 }
 0x987   :  { %5011 = vmatprep.subr.bf16.mxu0 %v5797_v0 }
 0x98a   :  { %5013 = vmatpush3.bf16.msra.mxu0 %v6309_v20 }
 0x98b   :  { %5026 = vmatprep.subr.bf16.mxu0 %v5797_v0 }
 0xa50   :  { %v884_v23 = vpop.f32.mrb[2].mxu0 }
 0xa51   :  { %v955_v24 = vadd.f32 %v6228_v27, %v884_v23  ;;  %v4527_v29 = vpop.f32.mrb[3].mxu0 }
 0xa53   :  { %v964_v31 = vadd.f32 %v6313_v21, %v955_v24 }
 0xa55   :  { %v965_v35 = vsel %vm408_vm2, %v964_v31, 0.0 }
 0xa56   :  { %4556 = vmatmul.mubr.msk.f32.vlgmr.msra.gmra.mrb[4].mxu0 %vm972_vm6, %v965_v35 }
 0xa57   :  { %4585 = vmatprep.mubr.msk.f32.mxu0 %vm5798_vm0, %v5799_v1  ;;  %5028 = vmatpush3.bf16.msra.mxu0 %v6389_v61 }
 0xa58   :  { %5029 = vmatprep.subr.bf16.mxu0 %v5797_v0 }
 0xb29   :  { %v1042_v38 = vpop.f32.mrb[4].mxu0 }
 0xb2a   :  { %v1043_v40 = vadd.f32 %v6321_v36, %v1042_v38  ;;  %v4557_v41 = vpop.f32.mrb[5].mxu0 }
 0xb2b   :  { %v6375_v41 = vld [vmem:[#allocation20] ss:$0 sm:$0xff] }
 0xb2c   :  { %1053 = vrot.lane.b32.xlu0 %v1043_v40, %s5800_s7  ;;  %v4200_v27 = vmul.f32 -1.442695, %v1043_v40 }
 0xb2e   :  { %5296 = vpow2.f32 %v4200_v27 }
 0xb38   :  { %v5297_v42 = vpop.eup %5296 }
 0xb39   :  { %v1049_v43 = vadd.f32 1.0, %v5297_v42 }
 0xb3b   :  { %5298 = vrcp.f32 %v1049_v43 }
 0xb45   :  { %v5299_v44 = vpop.eup %5298 }
 0xb46   :  { %v1063_v14 = vsub.f32 1.0, %v5299_v44  ;;  %v1069_v23 = vmul.f32 0.0, %v5299_v44 }
 0xb9e   :  { %v1054_v45 = vpop.permute.xlu0 %1053 }
 0xb9f   :  { %v1056_v46 = vmul.f32 %v5299_v44, %v1054_v45 }
 0xba1   :  { %1058 = vrot.lane.b32.xlu1 %v1056_v46, %s5801_s4 }
 0xc13   :  { %v1059_v50 = vpop.permute.xlu1 %1058 }
 0xc14   :  { %v1061_v51 = vadd.f32 %v1059_v50, %v1043_v40 }
 0xc16   :  { %5300 = vtanh.f32 %v1061_v51 }
 0xc20   :  { %v5301_v3 = vpop.eup %5300 }
 0xc21   :  { %1065 = vrot.lane.b32.xlu0 %v5301_v3, %s5802_s19  ;;  %v316_v3 = vld [vmem:[%s6926_s20 + $0x8] sm:$0xff] }
 0xc93   :  { %v1066_v16 = vpop.permute.xlu0 %1065 }
 0xc94   :  { %v1068_v24 = vmul.f32 %v1066_v16, %v1063_v14  ;;  %v6400_v14 = vpack.c.bf16 %v316_v3, %v315_v60  ;;  %v317_v16 = vld [vmem:[%s6926_s20 + $0x10] sm:$0xff] }
 0xc96   :  { %v6367_v29 = vadd.f32 %v1069_v23, %v1068_v24  ;;  %v318_v23 = vld [vmem:[%s6926_s20 + $0x18] sm:$0xff]  ;;  %v6409_v24 = vpack.c.bf16 %v313_v9, %v312_v5 }
 0xc98   :  { %1072 = vrot.lane.b32.xlu0 %v6367_v29, %s5802_s19  ;;  %5031 = vmatpush3.bf16.msra.mxu0 %v6409_v24 }
 0xc99   :  { %5038 = vmatprep.subr.bf16.mxu0 %v5797_v0 }
 0xd0a   :  { %v1073_v35 = vpop.permute.xlu0 %1072 }
 0xd0b   :  { %v1075_v38 = vadd.f32 %v1073_v35, %v964_v31  ;;  %v6413_v35 = vpack.c.bf16 %v318_v23, %v317_v16 }
 0xd0d   :  { %v1076_v40 = vsel %vm408_vm2, %v1075_v38, 0.0 }
 0xd0e   :  { %4575 = vmatmul.mubr.msk.f32.vlgmr.msra.gmra.mrb[8].mxu1 %vm972_vm6, %v1076_v40 }
 0xd0f   :  { %4596 = vmatprep.mubr.msk.f32.mxu1 %vm5798_vm0, %v5799_v1  ;;  %5034 = vmatpush3.bf16.msra.mxu1 %v6400_v14 }
 0xd10   :  { %5035 = vmatprep.subr.bf16.mxu1 %v5797_v0 }
 0xd13   :  { %5037 = vmatpush3.bf16.msra.mxu1 %v6413_v35 }
 0xd14   :  { %5041 = vmatprep.subr.bf16.mxu1 %v5797_v0 }
 0xde1   :  { %v1152_v27 = vpop.f32.mrb[8].mxu1 }
 0xde2   :  { %v1153_v42 = vadd.f32 %v6375_v41, %v1152_v27  ;;  %v4576_v43 = vpop.f32.mrb[9].mxu1 }
 0xde4   :  { %1163 = vrot.lane.b32.xlu0 %v1153_v42, %s5800_s7  ;;  %v4203_v44 = vmul.f32 -1.442695, %v1153_v42 }
 0xde6   :  { %5302 = vpow2.f32 %v4203_v44 }
 0xdf0   :  { %v5303_v45 = vpop.eup %5302 }
 0xdf1   :  { %v1159_v46 = vadd.f32 1.0, %v5303_v45 }
 0xdf3   :  { %5304 = vrcp.f32 %v1159_v46 }
 0xdfd   :  { %v5305_v31 = vpop.eup %5304 }
 0xdfe   :  { %v1173_v27 = vsub.f32 1.0, %v5305_v31  ;;  %v1179_v43 = vmul.f32 0.0, %v5305_v31 }
 0xe56   :  { %v1164_v50 = vpop.permute.xlu0 %1163 }
 0xe57   :  { %v1166_v51 = vmul.f32 %v5305_v31, %v1164_v50  ;;  %v6447_v31 = vld [vmem:[%s6956_s12] ss:$0 sm:$0xff] }
 0xe59   :  { %1168 = vrot.lane.b32.xlu0 %v1166_v51, %s5801_s4 }
 0xecb   :  { %v1169_v52 = vpop.permute.xlu0 %1168 }
 0xecc   :  { %v1171_v53 = vadd.f32 %v1169_v52, %v1153_v42 }
 0xece   :  { %5306 = vtanh.f32 %v1171_v53 }
 0xed8   :  { %v5307_v40 = vpop.eup %5306 }
 0xed9   :  { %1175 = vrot.lane.b32.xlu1 %v5307_v40, %s5802_s19 }
 0xedd   :  { %1491 = vrot.lane.b32.xlu1 %v6196_v55, %s5805_s18 }
 0xf4b   :  { %v1176_v42 = vpop.permute.xlu1 %1175 }
 0xf4c   :  { %v1178_v44 = vmul.f32 %v1176_v42, %v1173_v27 }
 0xf4e   :  { %v6423_v45 = vadd.f32 %v1179_v43, %v1178_v44 }
 0xf4f   :  { %v1492_v42 = vpop.permute.xlu1 %1491 }
 0xf50   :  { %1182 = vrot.lane.b32.xlu0 %v6423_v45, %s5802_s19 }
 0xfc2   :  { %v1183_v46 = vpop.permute.xlu0 %1182 }
 0xfc3   :  { %v1185_v50 = vadd.f32 %v1183_v46, %v1075_v38  ;;  %v6442_v38 = vld [vmem:[%s6955_s10] ss:$0 sm:$0xff] }
 0xfc5   :  { %4586 = vmatmul.mubr.msk.f32.vlgmr.msra.gmra.mrb[6].mxu0 %vm408_vm2, %v1185_v50  ;;  %4597 = vmatmul.mubr.msk.f32.vlgmr.msra.gmra.mrb[10].mxu1 %vm408_vm2, %v1185_v50 }
 0xfc6   :  { %5040 = vmatpush3.bf16.msra.mxu0 %v6130_v4  ;;  %4603 = vmatprep.mubr.msk.f32.mxu0 %vm5798_vm0, %v5799_v1 }
 0xfc7   :  { %5043 = vmatpush3.bf16.msra.mxu1 %v6139_v8  ;;  %4614 = vmatprep.mubr.msk.f32.mxu1 %vm5798_vm0, %v5799_v1 }
 0xfc8   :  { %5044 = vmatprep.subr.bf16.mxu1 %v5797_v0  ;;  %5047 = vmatprep.subr.bf16.mxu0 %v5797_v0 }
 0xfcb   :  { %5046 = vmatpush3.bf16.msra.mxu1 %v6153_v11 }
 0xfcc   :  { %5056 = vmatprep.subr.bf16.mxu1 %v5797_v0 }
0x1098   :  { %v1261_v51 = vpop.f32.mrb[6].mxu0  ;;  %v1339_v52 = vpop.f32.mrb[10].mxu1 }
0x1099   :  { %v1262_v53 = vadd.f32 %v6442_v38, %v1261_v51  ;;  %v1340_v54 = vadd.f32 %v6447_v31, %v1339_v52  ;;  %v4587_v57 = vpop.f32.mrb[7].mxu0  ;;  %v4598_v60 = vpop.f32.mrb[11].mxu1 }
0x109b   :  { %1266 = vst.msk [vmem:[#allocation26] sm:$0x3] %vm1265_vm7, %v1262_v53  ;;  %4604 = vmatmul.mubr.msk.f32.vlgmr.msra.gmra.mrb[8].mxu0 %vm327_vm1, %v1340_v54 }
0x109c   :  { %5049 = vmatpush3.bf16.msra.mxu0 %v6157_v15  ;;  %4629 = vmatprep.mubr.msk.f32.mxu0 %vm5798_vm0, %v5799_v1 }
0x109d   :  { %5050 = vmatprep.subr.bf16.mxu0 %v5797_v0 }
0x10a0   :  { %5052 = vmatpush3.bf16.msra.mxu0 %v6160_v17 }
0x10a1   :  { %5053 = vmatprep.subr.bf16.mxu0 %v5797_v0 }
0x10a4   :  { %5055 = vmatpush3.bf16.msra.mxu0 %v6171_v25 }
0x10a5   :  { %5062 = vmatprep.subr.bf16.mxu0 %v5797_v0 }
0x116e   :  { %v1412_v3 = vpop.f32.mrb[8].mxu0 }
0x116f   :  { %v1413_v5 = vadd.f32 %v6165_v18, %v1412_v3  ;;  %v4605_v9 = vpop.f32.mrb[9].mxu0 }
0x1171   :  { %v1416_v16 = vmax.f32 %v1413_v5, 0.0 }
0x1173   :  { %4615 = vmatmul.mubr.msk.f32.vlgmr.msra.gmra.mrb[12].mxu1 %vm408_vm2, %v1416_v16 }
0x1174   :  { %5058 = vmatpush3.bf16.msra.mxu1 %v6187_v47  ;;  %4640 = vmatprep.mubr.msk.f32.mxu1 %vm5798_vm0, %v5799_v1 }
0x1175   :  { %5059 = vmatprep.subr.bf16.mxu1 %v5797_v0 }
0x1178   :  { %5061 = vmatpush3.bf16.msra.mxu1 %v6190_v49 }
0x1179   :  { %5068 = vmatprep.subr.bf16.mxu1 %v5797_v0 }
0x1246   :  { %v1486_v23 = vpop.f32.mrb[12].mxu1 }
0x1247   :  { %v1487_v40 = vadd.f32 %v6175_v26, %v1486_v23  ;;  %v4616_v27 = vpop.f32.mrb[13].mxu1 }
0x1249   :  { %v1490_v18 = vmax.f32 %v1487_v40, 0.0 }
0x124b   :  { %v1494_v43 = vsel %vm327_vm1, %v1490_v18, %v1492_v42 }
0x124c   :  { %4630 = vmatmul.mubr.msk.f32.vlgmr.msra.gmra.mrb[10].mxu0 %vm490_vm3, %v1494_v43 }
0x124d   :  { %5064 = vmatpush3.bf16.msra.mxu0 %v6253_v28  ;;  %4651 = vmatprep.mubr.msk.f32.mxu0 %vm5798_vm0, %v5799_v1 }
0x124e   :  { %5065 = vmatprep.subr.bf16.mxu0 %v5797_v0 }
0x1251   :  { %5067 = vmatpush3.bf16.msra.mxu0 %v6257_v33 }
0x1252   :  { %5074 = vmatprep.subr.bf16.mxu0 %v5797_v0 }
0x131f   :  { %v1564_v44 = vpop.f32.mrb[10].mxu0 }
0x1320   :  { %v1565_v26 = vadd.f32 %v6182_v32, %v1564_v44  ;;  %v4631_v46 = vpop.f32.mrb[11].mxu0 }
0x1322   :  { %1575 = vrot.lane.b32.xlu0 %v1565_v26, %s5800_s7  ;;  %v4211_v50 = vmul.f32 -1.442695, %v1565_v26 }
0x1324   :  { %5308 = vpow2.f32 %v4211_v50 }
0x132e   :  { %v5309_v51 = vpop.eup %5308 }
0x132f   :  { %v1571_v52 = vadd.f32 1.0, %v5309_v51 }
0x1331   :  { %5310 = vrcp.f32 %v1571_v52 }
0x133b   :  { %v5311_v53 = vpop.eup %5310 }
0x133c   :  { %v1585_v32 = vsub.f32 1.0, %v5311_v53  ;;  %v1591_v16 = vmul.f32 %v5311_v53, %v6196_v55 }
0x1394   :  { %v1576_v54 = vpop.permute.xlu0 %1575 }
0x1395   :  { %v1578_v57 = vmul.f32 %v5311_v53, %v1576_v54 }
0x1397   :  { %1580 = vrot.lane.b32.xlu1 %v1578_v57, %s5801_s4 }
0x1409   :  { %v1581_v60 = vpop.permute.xlu1 %1580 }
0x140a   :  { %v1583_v3 = vadd.f32 %v1581_v60, %v1565_v26 }
0x140c   :  { %5312 = vtanh.f32 %v1583_v3 }
0x1416   :  { %v5313_v5 = vpop.eup %5312 }
0x1417   :  { %1587 = vrot.lane.b32.xlu0 %v5313_v5, %s5802_s19 }
0x1489   :  { %v1588_v9 = vpop.permute.xlu0 %1587 }
0x148a   :  { %v1590_v23 = vmul.f32 %v1588_v9, %v1585_v32 }
0x148c   :  { %v6483_v40 = vadd.f32 %v1591_v16, %v1590_v23 }
0x148e   :  { %1594 = vrot.lane.b32.xlu1 %v6483_v40, %s5802_s19 }
0x1500   :  { %v1595_v27 = vpop.permute.xlu1 %1594 }
0x1501   :  { %4641 = vmatmul.mubr.msk.f32.vlgmr.msra.gmra.mrb[14].mxu1 %vm408_vm2, %v1595_v27 }
0x1502   :  { %5070 = vmatpush3.bf16.msra.mxu1 %v6200_v58  ;;  %4662 = vmatprep.mubr.msk.f32.mxu1 %vm5798_vm0, %v5799_v1 }
0x1503   :  { %5071 = vmatprep.subr.bf16.mxu1 %v5797_v0 }
0x1506   :  { %5073 = vmatpush3.bf16.msra.mxu1 %v6204_v62 }
0x1507   :  { %5086 = vmatprep.subr.bf16.mxu1 %v5797_v0 }
0x1509   :  { %4663 = vmatmul.mubr.msk.f32.vlgmr.msra.gmra.mrb[16].mxu1 %vm408_vm2, %v1595_v27 }
0x150a   :  { %5088 = vmatpush3.bf16.msra.mxu1 %v6335_v56  ;;  %4700 = vmatprep.mubr.msk.f32.mxu1 %vm5798_vm0, %v5799_v1 }
0x150b   :  { %5089 = vmatprep.subr.bf16.mxu1 %v5797_v0 }
0x150e   :  { %5091 = vmatpush3.bf16.msra.mxu1 %v6341_v59 }
0x150f   :  { %5092 = vmatprep.subr.bf16.mxu1 %v5797_v0 }
0x1512   :  { %5094 = vmatpush3.bf16.msra.mxu1 %v6351_v2 }
0x1513   :  { %5095 = vmatprep.subr.bf16.mxu1 %v5797_v0 }
0x1516   :  { %5097 = vmatpush3.bf16.msra.mxu1 %v6363_v10 }
0x1517   :  { %5104 = vmatprep.subr.bf16.mxu1 %v5797_v0 }
0x15d4   :  { %v1664_v55 = vpop.f32.mrb[14].mxu1 }
0x15d5   :  { %v1675_v18 = vrot.slane %v1664_v55, %v6214_v7  ;;  %v4642_v42 = vpop.f32.mrb[15].mxu1 }
0x15d7   :  { %v1676_v43 = vcombine.high %v1675_v18, %v1675_v18  ;;  %v1683_v44 = vrot.slane %v1675_v18, %v6214_v7 }
0x15d9   :  { %v1690_v26 = vrot.slane %v1676_v43, %v6214_v7  ;;  %v1694_v46 = vrot.slane %v1683_v44, %v6217_v12 }
0x15db   :  { %v1698_v50 = vrot.slane %v1690_v26, %v6217_v12  ;;  %v1701_v51 = vadd.f32 %v1694_v46, %v6220_v19 }
0x15dc   :  { %v6511_v52 = vpop.f32.mrb[16].mxu1 }
0x15dd   :  { %v1702_v53 = vadd.f32 %v1698_v50, %v6224_v22  ;;  %5314 = vtanh.f32 %v1701_v51  ;;  %v4664_v54 = vpop.f32.mrb[17].mxu1 }
0x15df   :  { %5316 = vtanh.f32 %v1702_v53 }
0x15e7   :  { %v5315_v57 = vpop.eup %5314 }
0x15e8   :  { %v1705_v60 = vmul.f32 %v5315_v57, %v6231_v30 }
0x15e9   :  { %v5317_v3 = vpop.eup %5316 }
0x15ea   :  { %v1707_v5 = vsel %vm408_vm2, %v1705_v60, 0.0  ;;  %v1706_v32 = vmul.f32 %v5317_v3, %v6231_v30 }
0x15eb   :  { %1708 = vadd.xlane.f32.xlu0 %v1707_v5 }
0x15ec   :  { %v1710_v9 = vsel %vm408_vm2, %v1706_v32, 0.0 }
0x15ed   :  { %1711 = vadd.xlane.f32.xlu1 %v1710_v9 }
0x1678   :  { %v1709_v19 = vpop.xlane.xlu0 %1708 }
0x1679   :  { %v1718_v23 = vrot.slane %v1709_v19, %v6237_v39 }
0x167a   :  { %v1712_v16 = vpop.xlane.xlu1 %1711 }
0x167b   :  { %v1722_v22 = vrot.slane %v1712_v16, %v6237_v39 }
0x167d   :  { %v1723_v27 = vsel %vm727_vm4, %v1722_v22, %v1718_v23 }
0x167e   :  { %v1725_v55 = vsel %vm730_vm5, %v1723_v27, -inf }
0x167f   :  { %1726 = vmax.xlane.f32.xlu0 %v1725_v55 }
0x170c   :  { %v1727_v18 = vpop.xlane.xlu0 %1726 }
0x170d   :  { %v1732_v42 = vrot.slane %v1727_v18, %v6217_v12  ;;  %v1736_v30 = vrot.slane %v1727_v18, %v6243_v48 }
0x170f   :  { %v1739_v43 = vsub.f32 %v1709_v19, %v1732_v42  ;;  %v1740_v44 = vsub.f32 %v1712_v16, %v1736_v30 }
0x1711   :  { %v1741_v26 = vmul.f32 1.442695, %v1739_v43  ;;  %v1743_v46 = vmul.f32 1.442695, %v1740_v44 }
0x1713   :  { %5318 = vpow2.f32 %v1741_v26 }
0x1714   :  { %5320 = vpow2.f32 %v1743_v46 }
0x171d   :  { %v5319_v50 = vpop.eup %5318 }
0x171e   :  { %v5321_v51 = vpop.eup %5320  ;;  %1748 = vperm.xlu0 %5276, %v5319_v50  }
0x171f   :  { %1751 = vperm.xlu1 %5277, %v5321_v51  }
0x179d   :  { %v1749_v53 = vpop.permute.xlu0 %1748 }
0x179e   :  { %v1752_v54 = vpop.permute.xlu1 %1751  ;;  %v1756_v57 = vrot.slane %v1749_v53, %v6237_v39 }
0x179f   :  { %v1760_v60 = vrot.slane %v1752_v54, %v6237_v39 }
0x17a1   :  { %v1761_v3 = vsel %vm727_vm4, %v1760_v60, %v1756_v57 }
0x17a2   :  { %v1763_v5 = vsel %vm730_vm5, %v1761_v3, 0.0 }
0x17a3   :  { %1764 = vadd.xlane.f32.xlu1 %v1763_v5 }
0x1830   :  { %v1765_v32 = vpop.xlane.xlu1 %1764 }
0x1831   :  { %v1770_v9 = vrot.slane %v1765_v32, %v6217_v12  ;;  %v1774_v19 = vrot.slane %v1765_v32, %v6243_v48 }
0x1833   :  { %5322 = vrcp.f32 %v1770_v9 }
0x1834   :  { %5324 = vrcp.f32 %v1774_v19 }
0x183d   :  { %v5323_v16 = vpop.eup %5322 }
0x183e   :  { %v1778_v23 = vmul.f32 %v5323_v16, %v5319_v50  ;;  %v5325_v22 = vpop.eup %5324 }
0x183f   :  { %v1780_v27 = vmul.f32 %v5325_v22, %v5321_v51 }
0x1840   :  { %1783 = vperm.xlu0 %5276, %v1778_v23  }
0x1844   :  { %1788 = vperm.xlu0 %5276, %v1780_v27  }
0x18bf   :  { %v1784_v55 = vpop.permute.xlu0 %1783 }
0x18c0   :  { %v1791_v18 = vmul.f32 %v1784_v55, %v6261_v34 }
0x18c2   :  { %v1793_v42 = vsel %vm408_vm2, %v1791_v18, 0.0 }
0x18c3   :  { %v1794_v30 = vrot.slane %v1793_v42, 4  ;;  %v1789_v43 = vpop.permute.xlu0 %1788 }
0x18c4   :  { %v1792_v44 = vmul.f32 %v1789_v43, %v6264_v37 }
0x18c5   :  { %v1795_v26 = vadd.f32 %v1794_v30, %v1793_v42 }
0x18c6   :  { %v1800_v46 = vsel %vm408_vm2, %v1792_v44, 0.0 }
0x18c7   :  { %v1796_v53 = vrot.slane %v1795_v26, 2  ;;  %v1801_v54 = vrot.slane %v1800_v46, 4 }
0x18c9   :  { %v1797_v57 = vadd.f32 %v1796_v53, %v1795_v26  ;;  %v1802_v50 = vadd.f32 %v1801_v54, %v1800_v46 }
0x18cb   :  { %v1803_v60 = vrot.slane %v1802_v50, 2  ;;  %v1798_v3 = vrot.slane %v1797_v57, 1 }
0x18cd   :  { %v1804_v51 = vadd.f32 %v1803_v60, %v1802_v50  ;;  %v1799_v32 = vadd.f32 %v1798_v3, %v1797_v57 }
0x18cf   :  { %v1805_v5 = vrot.slane %v1804_v51, 1 }
0x18d1   :  { %v1806_v9 = vadd.f32 %v1805_v5, %v1804_v51 }
0x18d3   :  { %v1809_v34 = vsel %vm727_vm4, %v1806_v9, %v1799_v32 }
0x18d4   :  { %4652 = vmatmul.mubr.msk.f32.vlgmr.msra.gmra.mrb[12].mxu0 %vm408_vm2, %v1809_v34 }
0x18d5   :  { %5076 = vmatpush3.bf16.msra.mxu0 %v6275_v63  ;;  %4681 = vmatprep.mubr.msk.f32.mxu0 %vm5798_vm0, %v5799_v1 }
0x18d6   :  { %5077 = vmatprep.subr.bf16.mxu0 %v5797_v0 }
0x18d9   :  { %5079 = vmatpush3.bf16.msra.mxu0 %v6286_v6 }
0x18da   :  { %5080 = vmatprep.subr.bf16.mxu0 %v5797_v0 }
0x18dd   :  { %5082 = vmatpush3.bf16.msra.mxu0 %v6298_v13 }
0x18de   :  { %5083 = vmatprep.subr.bf16.mxu0 %v5797_v0 }
0x18e1   :  { %5085 = vmatpush3.bf16.msra.mxu0 %v6309_v20 }
0x18e2   :  { %5098 = vmatprep.subr.bf16.mxu0 %v5797_v0 }
0x19a7   :  { %v1878_v37 = vpop.f32.mrb[12].mxu0 }
0x19a8   :  { %v1949_v19 = vadd.f32 %v6511_v52, %v1878_v37  ;;  %v4653_v16 = vpop.f32.mrb[13].mxu0 }
0x19aa   :  { %v1952_v23 = vadd.f32 %v6313_v21, %v1949_v19 }
0x19ac   :  { %v1953_v22 = vsel %vm408_vm2, %v1952_v23, %v6367_v29 }
0x19ad   :  { %4682 = vmatmul.mubr.msk.f32.vlgmr.msra.gmra.mrb[14].mxu0 %vm972_vm6, %v1953_v22 }
0x19ae   :  { %5100 = vmatpush3.bf16.msra.mxu0 %v6389_v61  ;;  %4711 = vmatprep.mubr.msk.f32.mxu0 %vm5798_vm0, %v5799_v1 }
0x19af   :  { %5101 = vmatprep.subr.bf16.mxu0 %v5797_v0 }
0x19b2   :  { %5103 = vmatpush3.bf16.msra.mxu0 %v6409_v24 }
0x19b3   :  { %5110 = vmatprep.subr.bf16.mxu0 %v5797_v0 }
0x1a80   :  { %v2023_v52 = vpop.f32.mrb[14].mxu0 }
0x1a81   :  { %v2024_v27 = vadd.f32 %v6321_v36, %v2023_v52  ;;  %v4683_v21 = vpop.f32.mrb[15].mxu0 }
0x1a83   :  { %2034 = vrot.lane.b32.xlu0 %v2024_v27, %s5800_s7  ;;  %v4216_v55 = vmul.f32 -1.442695, %v2024_v27 }
0x1a85   :  { %5326 = vpow2.f32 %v4216_v55 }
0x1a8f   :  { %v5327_v18 = vpop.eup %5326 }
0x1a90   :  { %v2030_v42 = vadd.f32 1.0, %v5327_v18 }
0x1a92   :  { %5328 = vrcp.f32 %v2030_v42 }
0x1a9c   :  { %v5329_v30 = vpop.eup %5328 }
0x1a9d   :  { %v2044_v36 = vsub.f32 1.0, %v5329_v30  ;;  %v2050_v57 = vmul.f32 %v5329_v30, %v6367_v29 }
0x1af5   :  { %v2035_v43 = vpop.permute.xlu0 %2034 }
0x1af6   :  { %v2037_v44 = vmul.f32 %v5329_v30, %v2035_v43 }
0x1af8   :  { %2039 = vrot.lane.b32.xlu0 %v2037_v44, %s5801_s4 }
0x1b6a   :  { %v2040_v26 = vpop.permute.xlu0 %2039 }
0x1b6b   :  { %v2042_v46 = vadd.f32 %v2040_v26, %v2024_v27 }
0x1b6d   :  { %5330 = vtanh.f32 %v2042_v46 }
0x1b77   :  { %v5331_v53 = vpop.eup %5330 }
0x1b78   :  { %2046 = vrot.lane.b32.xlu0 %v5331_v53, %s5802_s19 }
0x1bea   :  { %v2047_v54 = vpop.permute.xlu0 %2046 }
0x1beb   :  { %v2049_v50 = vmul.f32 %v2047_v54, %v2044_v36 }
0x1bed   :  { %v6562_v60 = vadd.f32 %v2050_v57, %v2049_v50  ;;  %v6610_v50 = vld [vmem:[#allocation10] ss:$0 sm:$0xff] }
0x1bef   :  { %2053 = vrot.lane.b32.xlu0 %v6562_v60, %s5802_s19 }
0x1c61   :  { %v2054_v3 = vpop.permute.xlu0 %2053 }
0x1c62   :  { %v2056_v51 = vadd.f32 %v2054_v3, %v1952_v23 }
0x1c64   :  { %v2057_v5 = vsel %vm408_vm2, %v2056_v51, %v6423_v45 }
0x1c65   :  { %4701 = vmatmul.mubr.msk.f32.vlgmr.msra.gmra.mrb[18].mxu1 %vm972_vm6, %v2057_v5 }
0x1c66   :  { %5106 = vmatpush3.bf16.msra.mxu1 %v6400_v14  ;;  %4722 = vmatprep.mubr.msk.f32.mxu1 %vm5798_vm0, %v5799_v1 }
0x1c67   :  { %5107 = vmatprep.subr.bf16.mxu1 %v5797_v0 }
0x1c6a   :  { %5109 = vmatpush3.bf16.msra.mxu1 %v6413_v35 }
0x1c6b   :  { %5113 = vmatprep.subr.bf16.mxu1 %v5797_v0 }
0x1d38   :  { %v2127_v29 = vpop.f32.mrb[18].mxu1 }
0x1d39   :  { %v2128_v32 = vadd.f32 %v6375_v41, %v2127_v29  ;;  %v4702_v9 = vpop.f32.mrb[19].mxu1 }
0x1d3b   :  { %2138 = vrot.lane.b32.xlu0 %v2128_v32, %s5800_s7  ;;  %v4218_v34 = vmul.f32 -1.442695, %v2128_v32 }
0x1d3d   :  { %5332 = vpow2.f32 %v4218_v34 }
0x1d47   :  { %v5333_v37 = vpop.eup %5332 }
0x1d48   :  { %v2134_v19 = vadd.f32 1.0, %v5333_v37 }
0x1d4a   :  { %5334 = vrcp.f32 %v2134_v19 }
0x1d54   :  { %v5335_v16 = vpop.eup %5334 }
0x1d55   :  { %v2148_v41 = vsub.f32 1.0, %v5335_v16  ;;  %v2154_v18 = vmul.f32 %v5335_v16, %v6423_v45 }
0x1dad   :  { %v2139_v23 = vpop.permute.xlu0 %2138 }
0x1dae   :  { %v2141_v22 = vmul.f32 %v5335_v16, %v2139_v23 }
0x1db0   :  { %2143 = vrot.lane.b32.xlu0 %v2141_v22, %s5801_s4  ;;  %v6631_v22 = vld [vmem:[#allocation17] ss:$0 sm:$0xff] }
0x1e22   :  { %v2144_v52 = vpop.permute.xlu0 %2143 }
0x1e23   :  { %v2146_v27 = vadd.f32 %v2144_v52, %v2128_v32  ;;  %v6620_v32 = vld [vmem:[#allocation11] ss:$0 sm:$0xff] }
0x1e25   :  { %5336 = vtanh.f32 %v2146_v27 }
0x1e2f   :  { %v5337_v21 = vpop.eup %5336 }
0x1e30   :  { %2150 = vrot.lane.b32.xlu0 %v5337_v21, %s5802_s19 }
0x1e34   :  { %2454 = vrot.lane.b32.xlu0 %v6483_v40, %s5805_s18 }
0x1ea2   :  { %v2151_v55 = vpop.permute.xlu0 %2150 }
0x1ea3   :  { %v2153_v42 = vmul.f32 %v2151_v55, %v2148_v41 }
0x1ea5   :  { %v6582_v30 = vadd.f32 %v2154_v18, %v2153_v42 }
0x1ea6   :  { %v2455_v19 = vpop.permute.xlu0 %2454 }
0x1ea7   :  { %2157 = vrot.lane.b32.xlu1 %v6582_v30, %s5802_s19 }
0x1f19   :  { %v2158_v43 = vpop.permute.xlu1 %2157 }
0x1f1a   :  { %v2160_v44 = vadd.f32 %v2158_v43, %v2056_v51 }
0x1f1c   :  { %4712 = vmatmul.mubr.msk.f32.vlgmr.msra.gmra.mrb[16].mxu0 %vm408_vm2, %v2160_v44  ;;  %4723 = vmatmul.mubr.msk.f32.vlgmr.msra.gmra.mrb[20].mxu1 %vm408_vm2, %v2160_v44 }
0x1f1d   :  { %5112 = vmatpush3.bf16.msra.mxu0 %v6130_v4  ;;  %4729 = vmatprep.mubr.msk.f32.mxu0 %vm5798_vm0, %v5799_v1 }
0x1f1e   :  { %5115 = vmatpush3.bf16.msra.mxu1 %v6139_v8  ;;  %4740 = vmatprep.mubr.msk.f32.mxu1 %vm5798_vm0, %v5799_v1 }
0x1f1f   :  { %5116 = vmatprep.subr.bf16.mxu1 %v5797_v0  ;;  %5119 = vmatprep.subr.bf16.mxu0 %v5797_v0 }
0x1f22   :  { %5118 = vmatpush3.bf16.msra.mxu1 %v6153_v11 }
0x1f23   :  { %5128 = vmatprep.subr.bf16.mxu1 %v5797_v0 }
0x1fef   :  { %v2230_v45 = vpop.f32.mrb[16].mxu0  ;;  %v2302_v26 = vpop.f32.mrb[20].mxu1 }
0x1ff0   :  { %v2231_v46 = vadd.f32 %v6442_v38, %v2230_v45  ;;  %v2303_v53 = vadd.f32 %v6447_v31, %v2302_v26  ;;  %v4713_v36 = vpop.f32.mrb[17].mxu0  ;;  %v4724_v54 = vpop.f32.mrb[21].mxu1 }
0x1ff2   :  { %2235 = vst.msk [vmem:[#allocation26 + $0x2] sm:$0x3] %vm1265_vm7, %v2231_v46  ;;  %4730 = vmatmul.mubr.msk.f32.vlgmr.msra.gmra.mrb[18].mxu0 %vm327_vm1, %v2303_v53 }
0x1ff3   :  { %5121 = vmatpush3.bf16.msra.mxu0 %v6157_v15  ;;  %4755 = vmatprep.mubr.msk.f32.mxu0 %vm5798_vm0, %v5799_v1 }
0x1ff4   :  { %5122 = vmatprep.subr.bf16.mxu0 %v5797_v0 }
0x1ff7   :  { %5124 = vmatpush3.bf16.msra.mxu0 %v6160_v17 }
0x1ff8   :  { %5125 = vmatprep.subr.bf16.mxu0 %v5797_v0 }
0x1ffb   :  { %5127 = vmatpush3.bf16.msra.mxu0 %v6171_v25 }
0x1ffc   :  { %5134 = vmatprep.subr.bf16.mxu0 %v5797_v0 }
0x20c5   :  { %v2375_v57 = vpop.f32.mrb[18].mxu0 }
0x20c6   :  { %v2376_v3 = vadd.f32 %v6610_v50, %v2375_v57  ;;  %v4731_v51 = vpop.f32.mrb[19].mxu0 }
0x20c8   :  { %v2379_v5 = vmax.f32 %v2376_v3, 0.0 }
0x20ca   :  { %4741 = vmatmul.mubr.msk.f32.vlgmr.msra.gmra.mrb[22].mxu1 %vm408_vm2, %v2379_v5 }
0x20cb   :  { %5130 = vmatpush3.bf16.msra.mxu1 %v6187_v47  ;;  %4766 = vmatprep.mubr.msk.f32.mxu1 %vm5798_vm0, %v5799_v1 }
0x20cc   :  { %5131 = vmatprep.subr.bf16.mxu1 %v5797_v0 }
0x20cf   :  { %5133 = vmatpush3.bf16.msra.mxu1 %v6190_v49 }
0x20d0   :  { %5140 = vmatprep.subr.bf16.mxu1 %v5797_v0 }
0x219d   :  { %v2449_v29 = vpop.f32.mrb[22].mxu1 }
0x219e   :  { %v2450_v9 = vadd.f32 %v6620_v32, %v2449_v29  ;;  %v4742_v34 = vpop.f32.mrb[23].mxu1 }
0x21a0   :  { %v2453_v37 = vmax.f32 %v2450_v9, 0.0 }
0x21a2   :  { %v2457_v16 = vsel %vm327_vm1, %v2453_v37, %v2455_v19 }
0x21a3   :  { %4756 = vmatmul.mubr.msk.f32.vlgmr.msra.gmra.mrb[20].mxu0 %vm490_vm3, %v2457_v16  ;;  %v6665_v16 = vld [vmem:[#allocation7] sm:$0xff] }
0x21a4   :  { %5136 = vmatpush3.bf16.msra.mxu0 %v6253_v28  ;;  %4777 = vmatprep.mubr.msk.f32.mxu0 %vm5798_vm0, %v5799_v1 }
0x21a5   :  { %5137 = vmatprep.subr.bf16.mxu0 %v5797_v0 }
0x21a8   :  { %5139 = vmatpush3.bf16.msra.mxu0 %v6257_v33 }
0x21a9   :  { %5146 = vmatprep.subr.bf16.mxu0 %v5797_v0 }
0x2276   :  { %v2527_v23 = vpop.f32.mrb[20].mxu0 }
0x2277   :  { %v2528_v52 = vadd.f32 %v6631_v22, %v2527_v23  ;;  %v4757_v27 = vpop.f32.mrb[21].mxu0 }
0x2278   :  { %v6670_v27 = vld [vmem:[#allocation7 + $0x8] sm:$0xff] }
0x2279   :  { %2538 = vrot.lane.b32.xlu0 %v2528_v52, %s5800_s7  ;;  %v4224_v21 = vmul.f32 -1.442695, %v2528_v52 }
0x227b   :  { %5338 = vpow2.f32 %v4224_v21 }
0x2285   :  { %v5339_v41 = vpop.eup %5338 }
0x2286   :  { %v2534_v55 = vadd.f32 1.0, %v5339_v41 }
0x2288   :  { %5340 = vrcp.f32 %v2534_v55 }
0x2292   :  { %v5341_v18 = vpop.eup %5340 }
0x2293   :  { %v2548_v46 = vsub.f32 1.0, %v5341_v18  ;;  %v2554_v36 = vmul.f32 %v5341_v18, %v6483_v40 }
0x22eb   :  { %v2539_v42 = vpop.permute.xlu0 %2538 }
0x22ec   :  { %v2541_v43 = vmul.f32 %v5341_v18, %v2539_v42  ;;  %v6673_v18 = vld [vmem:[#allocation14] ss:$0 sm:$0xff] }
0x22ee   :  { %2543 = vrot.lane.b32.xlu0 %v2541_v43, %s5801_s4 }
0x2360   :  { %v2544_v44 = vpop.permute.xlu0 %2543 }
0x2361   :  { %v2546_v45 = vadd.f32 %v2544_v44, %v2528_v52 }
0x2363   :  { %5342 = vtanh.f32 %v2546_v45 }
0x236d   :  { %v5343_v26 = vpop.eup %5342 }
0x236e   :  { %2550 = vrot.lane.b32.xlu0 %v5343_v26, %s5802_s19 }
0x23e0   :  { %v2551_v53 = vpop.permute.xlu0 %2550 }
0x23e1   :  { %v2553_v54 = vmul.f32 %v2551_v53, %v2548_v46 }
0x23e3   :  { %v6638_v57 = vadd.f32 %v2554_v36, %v2553_v54 }
0x23e5   :  { %2557 = vrot.lane.b32.xlu0 %v6638_v57, %s5802_s19 }
0x2457   :  { %v2558_v3 = vpop.permute.xlu0 %2557 }
0x2458   :  { %4767 = vmatmul.mubr.msk.f32.vlgmr.msra.gmra.mrb[24].mxu1 %vm408_vm2, %v2558_v3 }
0x2459   :  { %5142 = vmatpush3.bf16.msra.mxu1 %v6200_v58  ;;  %4788 = vmatprep.mubr.msk.f32.mxu1 %vm5798_vm0, %v5799_v1 }
0x245a   :  { %5143 = vmatprep.subr.bf16.mxu1 %v5797_v0 }
0x245d   :  { %5145 = vmatpush3.bf16.msra.mxu1 %v6204_v62 }
0x245e   :  { %5158 = vmatprep.subr.bf16.mxu1 %v5797_v0 }
0x2460   :  { %4789 = vmatmul.mubr.msk.f32.vlgmr.msra.gmra.mrb[26].mxu1 %vm408_vm2, %v2558_v3 }
0x2461   :  { %5160 = vmatpush3.bf16.msra.mxu1 %v6335_v56  ;;  %4826 = vmatprep.mubr.msk.f32.mxu1 %vm5798_vm0, %v5799_v1 }
0x2462   :  { %5161 = vmatprep.subr.bf16.mxu1 %v5797_v0 }
0x2465   :  { %5163 = vmatpush3.bf16.msra.mxu1 %v6341_v59 }
0x2466   :  { %5164 = vmatprep.subr.bf16.mxu1 %v5797_v0 }
0x2469   :  { %5166 = vmatpush3.bf16.msra.mxu1 %v6351_v2 }
0x246a   :  { %5167 = vmatprep.subr.bf16.mxu1 %v5797_v0 }
0x246d   :  { %5169 = vmatpush3.bf16.msra.mxu1 %v6363_v10 }
0x246e   :  { %5176 = vmatprep.subr.bf16.mxu1 %v5797_v0 }
0x252b   :  { %v2627_v40 = vpop.f32.mrb[24].mxu1 }
0x252c   :  { %v2638_v51 = vrot.slane %v2627_v40, %v6214_v7  ;;  %v4768_v5 = vpop.f32.mrb[25].mxu1 }
0x252e   :  { %v2639_v29 = vcombine.high %v2638_v51, %v2638_v51  ;;  %v2646_v9 = vrot.slane %v2638_v51, %v6214_v7 }
0x2530   :  { %v2653_v34 = vrot.slane %v2639_v29, %v6214_v7  ;;  %v2657_v37 = vrot.slane %v2646_v9, %v6217_v12 }
0x2532   :  { %v2661_v19 = vrot.slane %v2653_v34, %v6217_v12  ;;  %v2664_v23 = vadd.f32 %v6665_v16, %v2657_v37 }
0x2533   :  { %v6668_v52 = vpop.f32.mrb[26].mxu1 }
0x2534   :  { %v2665_v21 = vadd.f32 %v6670_v27, %v2661_v19  ;;  %5344 = vtanh.f32 %v2664_v23  ;;  %v4790_v41 = vpop.f32.mrb[27].mxu1 }
0x2536   :  { %5346 = vtanh.f32 %v2665_v21 }
0x253e   :  { %v5345_v55 = vpop.eup %5344 }
0x253f   :  { %v2668_v42 = vmul.f32 %v6673_v18, %v5345_v55 }
0x2540   :  { %v5347_v43 = vpop.eup %5346 }
0x2541   :  { %v2670_v44 = vsel %vm408_vm2, %v2668_v42, 0.0  ;;  %v2669_v45 = vmul.f32 %v6673_v18, %v5347_v43 }
0x2542   :  { %2671 = vadd.xlane.f32.xlu1 %v2670_v44 }
0x2543   :  { %v2673_v26 = vsel %vm408_vm2, %v2669_v45, 0.0 }
0x2544   :  { %2674 = vadd.xlane.f32.xlu0 %v2673_v26 }
0x25cf   :  { %v2672_v46 = vpop.xlane.xlu1 %2671 }
0x25d0   :  { %v2681_v36 = vrot.slane %v2672_v46, %v6237_v39 }
0x25d1   :  { %v2675_v53 = vpop.xlane.xlu0 %2674 }
0x25d2   :  { %v2685_v54 = vrot.slane %v2675_v53, %v6237_v39 }
0x25d4   :  { %v2686_v3 = vsel %vm727_vm4, %v2685_v54, %v2681_v36 }
0x25d5   :  { %v2688_v40 = vsel %vm730_vm5, %v2686_v3, -inf }
0x25d6   :  { %2689 = vmax.xlane.f32.xlu0 %v2688_v40 }
0x2663   :  { %v2690_v51 = vpop.xlane.xlu0 %2689 }
0x2664   :  { %v2695_v5 = vrot.slane %v2690_v51, %v6217_v12  ;;  %v2699_v29 = vrot.slane %v2690_v51, %v6243_v48 }
0x2666   :  { %v2702_v9 = vsub.f32 %v2672_v46, %v2695_v5  ;;  %v2703_v34 = vsub.f32 %v2675_v53, %v2699_v29  ;;  %v6691_v5 = vld [vmem:[#allocation5] sm:$0xff] }
0x2668   :  { %v2704_v37 = vmul.f32 1.442695, %v2702_v9  ;;  %v2706_v19 = vmul.f32 1.442695, %v2703_v34 }
0x266a   :  { %5348 = vpow2.f32 %v2704_v37 }
0x266b   :  { %5350 = vpow2.f32 %v2706_v19  ;;  %v6695_v19 = vld [vmem:[#allocation5 + $0x8] sm:$0xff] }
0x2674   :  { %v5349_v23 = vpop.eup %5348 }
0x2675   :  { %v5351_v21 = vpop.eup %5350  ;;  %2711 = vperm.xlu1 %5277, %v5349_v23  }
0x2676   :  { %2714 = vperm.xlu0 %5276, %v5351_v21  }
0x26f4   :  { %v2712_v41 = vpop.permute.xlu1 %2711 }
0x26f5   :  { %v2715_v55 = vpop.permute.xlu0 %2714  ;;  %v2719_v42 = vrot.slane %v2712_v41, %v6237_v39 }
0x26f6   :  { %v2723_v43 = vrot.slane %v2715_v55, %v6237_v39 }
0x26f8   :  { %v2724_v44 = vsel %vm727_vm4, %v2723_v43, %v2719_v42 }
0x26f9   :  { %v2726_v45 = vsel %vm730_vm5, %v2724_v44, 0.0 }
0x26fa   :  { %2727 = vadd.xlane.f32.xlu1 %v2726_v45 }
0x2787   :  { %v2728_v26 = vpop.xlane.xlu1 %2727 }
0x2788   :  { %v2733_v46 = vrot.slane %v2728_v26, %v6217_v12  ;;  %v2737_v53 = vrot.slane %v2728_v26, %v6243_v48 }
0x278a   :  { %5352 = vrcp.f32 %v2733_v46 }
0x278b   :  { %5354 = vrcp.f32 %v2737_v53 }
0x2794   :  { %v5353_v36 = vpop.eup %5352 }
0x2795   :  { %v2741_v54 = vmul.f32 %v5353_v36, %v5349_v23  ;;  %v5355_v3 = vpop.eup %5354 }
0x2796   :  { %v2743_v40 = vmul.f32 %v5355_v3, %v5351_v21 }
0x2797   :  { %2746 = vperm.xlu0 %5276, %v2741_v54  }
0x279b   :  { %2751 = vperm.xlu0 %5276, %v2743_v40  }
0x2816   :  { %v2747_v51 = vpop.permute.xlu0 %2746 }
0x2817   :  { %v2754_v29 = vmul.f32 %v6691_v5, %v2747_v51 }
0x2819   :  { %v2756_v9 = vsel %vm408_vm2, %v2754_v29, 0.0 }
0x281a   :  { %v2757_v34 = vrot.slane %v2756_v9, 4  ;;  %v2752_v37 = vpop.permute.xlu0 %2751 }
0x281b   :  { %v2755_v41 = vmul.f32 %v6695_v19, %v2752_v37 }
0x281c   :  { %v2758_v55 = vadd.f32 %v2757_v34, %v2756_v9  ;;  %v6712_v9 = vld [vmem:[#allocation25] ss:$0 sm:$0xff] }
0x281d   :  { %v2763_v23 = vsel %vm408_vm2, %v2755_v41, 0.0  ;;  %v6724_v41 = vld [vmem:[#allocation19] ss:$0 sm:$0xff] }
0x281e   :  { %v2759_v42 = vrot.slane %v2758_v55, 2  ;;  %v2764_v43 = vrot.slane %v2763_v23, 4 }
0x2820   :  { %v2760_v21 = vadd.f32 %v2759_v42, %v2758_v55  ;;  %v2765_v44 = vadd.f32 %v2764_v43, %v2763_v23 }
0x2822   :  { %v2766_v45 = vrot.slane %v2765_v44, 2  ;;  %v2761_v26 = vrot.slane %v2760_v21, 1 }
0x2824   :  { %v2767_v46 = vadd.f32 %v2766_v45, %v2765_v44  ;;  %v2762_v36 = vadd.f32 %v2761_v26, %v2760_v21 }
0x2826   :  { %v2768_v53 = vrot.slane %v2767_v46, 1 }
0x2828   :  { %v2769_v54 = vadd.f32 %v2768_v53, %v2767_v46 }
0x282a   :  { %v2772_v3 = vsel %vm727_vm4, %v2769_v54, %v2762_v36 }
0x282b   :  { %4778 = vmatmul.mubr.msk.f32.vlgmr.msra.gmra.mrb[22].mxu0 %vm408_vm2, %v2772_v3 }
0x282c   :  { %5148 = vmatpush3.bf16.msra.mxu0 %v6275_v63  ;;  %4807 = vmatprep.mubr.msk.f32.mxu0 %vm5798_vm0, %v5799_v1 }
0x282d   :  { %5149 = vmatprep.subr.bf16.mxu0 %v5797_v0 }
0x2830   :  { %5151 = vmatpush3.bf16.msra.mxu0 %v6286_v6 }
0x2831   :  { %5152 = vmatprep.subr.bf16.mxu0 %v5797_v0 }
0x2834   :  { %5154 = vmatpush3.bf16.msra.mxu0 %v6298_v13 }
0x2835   :  { %5155 = vmatprep.subr.bf16.mxu0 %v5797_v0 }
0x2838   :  { %5157 = vmatpush3.bf16.msra.mxu0 %v6309_v20 }
0x2839   :  { %5170 = vmatprep.subr.bf16.mxu0 %v5797_v0 }
0x28fe   :  { %v2841_v40 = vpop.f32.mrb[22].mxu0 }
0x28ff   :  { %v2912_v51 = vadd.f32 %v6668_v52, %v2841_v40  ;;  %v4779_v29 = vpop.f32.mrb[23].mxu0 }
0x2901   :  { %v2915_v34 = vadd.f32 %v6712_v9, %v2912_v51 }
0x2903   :  { %v2916_v37 = vsel %vm408_vm2, %v2915_v34, %v6562_v60 }
0x2904   :  { %4808 = vmatmul.mubr.msk.f32.vlgmr.msra.gmra.mrb[24].mxu0 %vm972_vm6, %v2916_v37 }
0x2905   :  { %5172 = vmatpush3.bf16.msra.mxu0 %v6389_v61  ;;  %4837 = vmatprep.mubr.msk.f32.mxu0 %vm5798_vm0, %v5799_v1 }
0x2906   :  { %5173 = vmatprep.subr.bf16.mxu0 %v5797_v0 }
0x2909   :  { %5175 = vmatpush3.bf16.msra.mxu0 %v6409_v24 }
0x290a   :  { %5182 = vmatprep.subr.bf16.mxu0 %v5797_v0 }
0x29d7   :  { %v2986_v52 = vpop.f32.mrb[24].mxu0 }
0x29d8   :  { %v2987_v55 = vadd.f32 %v6724_v41, %v2986_v52  ;;  %v4809_v23 = vpop.f32.mrb[25].mxu0 }
0x29da   :  { %2997 = vrot.lane.b32.xlu0 %v2987_v55, %s5800_s7  ;;  %v4229_v42 = vmul.f32 -1.442695, %v2987_v55 }
0x29dc   :  { %5356 = vpow2.f32 %v4229_v42 }
0x29e6   :  { %v5357_v43 = vpop.eup %5356 }
0x29e7   :  { %v2993_v21 = vadd.f32 1.0, %v5357_v43 }
0x29e9   :  { %5358 = vrcp.f32 %v2993_v21 }
0x29f3   :  { %v5359_v44 = vpop.eup %5358 }
0x29f4   :  { %v3007_v54 = vsub.f32 1.0, %v5359_v44  ;;  %v3013_v40 = vmul.f32 %v5359_v44, %v6562_v60 }
0x2a4c   :  { %v2998_v45 = vpop.permute.xlu0 %2997 }
0x2a4d   :  { %v3000_v26 = vmul.f32 %v5359_v44, %v2998_v45 }
0x2a4f   :  { %3002 = vrot.lane.b32.xlu0 %v3000_v26, %s5801_s4 }
0x2ac1   :  { %v3003_v46 = vpop.permute.xlu0 %3002 }
0x2ac2   :  { %v3005_v53 = vadd.f32 %v3003_v46, %v2987_v55  ;;  %v6744_v55 = vld [vmem:[#allocation20] ss:$0 sm:$0xff] }
0x2ac4   :  { %5360 = vtanh.f32 %v3005_v53 }
0x2ace   :  { %v5361_v36 = vpop.eup %5360 }
0x2acf   :  { %3009 = vrot.lane.b32.xlu0 %v5361_v36, %s5802_s19 }
0x2b41   :  { %v3010_v3 = vpop.permute.xlu0 %3009 }
0x2b42   :  { %v3012_v51 = vmul.f32 %v3010_v3, %v3007_v54 }
0x2b44   :  { %v6731_v29 = vadd.f32 %v3013_v40, %v3012_v51 }
0x2b46   :  { %3016 = vrot.lane.b32.xlu0 %v6731_v29, %s5802_s19 }
0x2bb8   :  { %v3017_v37 = vpop.permute.xlu0 %3016 }
0x2bb9   :  { %v3019_v52 = vadd.f32 %v3017_v37, %v2915_v34 }
0x2bbb   :  { %v3020_v23 = vsel %vm408_vm2, %v3019_v52, %v6582_v30 }
0x2bbc   :  { %4827 = vmatmul.mubr.msk.f32.vlgmr.msra.gmra.mrb[28].mxu1 %vm972_vm6, %v3020_v23 }
0x2bbd   :  { %5178 = vmatpush3.bf16.msra.mxu1 %v6400_v14  ;;  %4848 = vmatprep.mubr.msk.f32.mxu1 %vm5798_vm0, %v5799_v1 }
0x2bbe   :  { %5179 = vmatprep.subr.bf16.mxu1 %v5797_v0 }
0x2bc1   :  { %5181 = vmatpush3.bf16.msra.mxu1 %v6413_v35 }
0x2bc2   :  { %5185 = vmatprep.subr.bf16.mxu1 %v5797_v0 }
0x2c8f   :  { %v3090_v60 = vpop.f32.mrb[28].mxu1 }
0x2c90   :  { %v3091_v34 = vadd.f32 %v6744_v55, %v3090_v60  ;;  %v4828_v42 = vpop.f32.mrb[29].mxu1 }
0x2c92   :  { %3101 = vrot.lane.b32.xlu0 %v3091_v34, %s5800_s7  ;;  %v4231_v43 = vmul.f32 -1.442695, %v3091_v34 }
0x2c94   :  { %5362 = vpow2.f32 %v4231_v43 }
0x2c9e   :  { %v5363_v14 = vpop.eup %5362 }
0x2c9f   :  { %v3097_v21 = vadd.f32 1.0, %v5363_v14 }
0x2ca1   :  { %5364 = vrcp.f32 %v3097_v21 }
0x2cab   :  { %v5365_v44 = vpop.eup %5364 }
0x2cac   :  { %v3111_v36 = vsub.f32 1.0, %v5365_v44  ;;  %v3117_v3 = vmul.f32 %v5365_v44, %v6582_v30 }
0x2d04   :  { %v3102_v45 = vpop.permute.xlu0 %3101 }
0x2d05   :  { %v3104_v26 = vmul.f32 %v5365_v44, %v3102_v45 }
0x2d07   :  { %3106 = vrot.lane.b32.xlu0 %v3104_v26, %s5801_s4 }
0x2d79   :  { %v3107_v35 = vpop.permute.xlu0 %3106 }
0x2d7a   :  { %v3109_v46 = vadd.f32 %v3107_v35, %v3091_v34 }
0x2d7c   :  { %5366 = vtanh.f32 %v3109_v46 }
0x2d86   :  { %v5367_v53 = vpop.eup %5366 }
0x2d87   :  { %3113 = vrot.lane.b32.xlu1 %v5367_v53, %s5802_s19 }
0x2df9   :  { %v3114_v54 = vpop.permute.xlu1 %3113 }
0x2dfa   :  { %v3116_v40 = vmul.f32 %v3114_v54, %v3111_v36 }
0x2dfc   :  { %v6751_v51 = vadd.f32 %v3117_v3, %v3116_v40 }
0x2dfe   :  { %3120 = vrot.lane.b32.xlu0 %v6751_v51, %s5802_s19 }
0x2e02   :  { %3417 = vrot.lane.b32.xlu0 %v6638_v57, %s5805_s18 }
0x2e70   :  { %v3121_v37 = vpop.permute.xlu0 %3120 }
0x2e71   :  { %v3123_v23 = vadd.f32 %v3121_v37, %v3019_v52 }
0x2e73   :  { %4838 = vmatmul.mubr.msk.f32.vlgmr.msra.gmra.mrb[26].mxu0 %vm408_vm2, %v3123_v23  ;;  %4849 = vmatmul.mubr.msk.f32.vlgmr.msra.gmra.mrb[30].mxu1 %vm408_vm2, %v3123_v23 }
0x2e74   :  { %5184 = vmatpush3.bf16.msra.mxu0 %v6130_v4  ;;  %4855 = vmatprep.mubr.msk.f32.mxu0 %vm5798_vm0, %v5799_v1  ;;  %v3418_v43 = vpop.permute.xlu0 %3417 }
0x2e75   :  { %5187 = vmatpush3.bf16.msra.mxu1 %v6139_v8  ;;  %4866 = vmatprep.mubr.msk.f32.mxu1 %vm5798_vm0, %v5799_v1 }
0x2e76   :  { %5188 = vmatprep.subr.bf16.mxu1 %v5797_v0  ;;  %5191 = vmatprep.subr.bf16.mxu0 %v5797_v0 }
0x2e79   :  { %5190 = vmatpush3.bf16.msra.mxu1 %v6153_v11 }
0x2e7a   :  { %5200 = vmatprep.subr.bf16.mxu1 %v5797_v0 }
0x2f46   :  { %v3193_v30 = vpop.f32.mrb[26].mxu0  ;;  %v3265_v52 = vpop.f32.mrb[30].mxu1 }
0x2f47   :  { %v3194_v4 = vadd.f32 %v6442_v38, %v3193_v30  ;;  %v3266_v60 = vadd.f32 %v6447_v31, %v3265_v52  ;;  %v4839_v34 = vpop.f32.mrb[27].mxu0  ;;  %v4850_v42 = vpop.f32.mrb[31].mxu1 }
0x2f49   :  { %3198 = vst.msk [vmem:[#allocation26 + $0x4] sm:$0x3] %vm1265_vm7, %v3194_v4  ;;  %4856 = vmatmul.mubr.msk.f32.vlgmr.msra.gmra.mrb[28].mxu0 %vm327_vm1, %v3266_v60 }
0x2f4a   :  { %5193 = vmatpush3.bf16.msra.mxu0 %v6157_v15  ;;  %4881 = vmatprep.mubr.msk.f32.mxu0 %vm5798_vm0, %v5799_v1 }
0x2f4b   :  { %5194 = vmatprep.subr.bf16.mxu0 %v5797_v0 }
0x2f4e   :  { %5196 = vmatpush3.bf16.msra.mxu0 %v6160_v17 }
0x2f4f   :  { %5197 = vmatprep.subr.bf16.mxu0 %v5797_v0 }
0x2f52   :  { %5199 = vmatpush3.bf16.msra.mxu0 %v6171_v25 }
0x2f53   :  { %5206 = vmatprep.subr.bf16.mxu0 %v5797_v0 }
0x301c   :  { %v3338_v8 = vpop.f32.mrb[28].mxu0 }
0x301d   :  { %v3339_v11 = vadd.f32 %v6610_v50, %v3338_v8  ;;  %v4857_v38 = vpop.f32.mrb[29].mxu0 }
0x301f   :  { %v3342_v31 = vmax.f32 %v3339_v11, 0.0 }
0x3021   :  { %4867 = vmatmul.mubr.msk.f32.vlgmr.msra.gmra.mrb[32].mxu1 %vm408_vm2, %v3342_v31 }
0x3022   :  { %5202 = vmatpush3.bf16.msra.mxu1 %v6187_v47  ;;  %4892 = vmatprep.mubr.msk.f32.mxu1 %vm5798_vm0, %v5799_v1 }
0x3023   :  { %5203 = vmatprep.subr.bf16.mxu1 %v5797_v0 }
0x3026   :  { %5205 = vmatpush3.bf16.msra.mxu1 %v6190_v49 }
0x3027   :  { %5212 = vmatprep.subr.bf16.mxu1 %v5797_v0 }
0x30f4   :  { %v3412_v15 = vpop.f32.mrb[32].mxu1 }
0x30f5   :  { %v3413_v17 = vadd.f32 %v6620_v32, %v3412_v15  ;;  %v4868_v25 = vpop.f32.mrb[33].mxu1 }
0x30f7   :  { %v3416_v50 = vmax.f32 %v3413_v17, 0.0 }
0x30f9   :  { %v3420_v14 = vsel %vm327_vm1, %v3416_v50, %v3418_v43 }
0x30fa   :  { %4882 = vmatmul.mubr.msk.f32.vlgmr.msra.gmra.mrb[30].mxu0 %vm490_vm3, %v3420_v14 }
0x30fb   :  { %5208 = vmatpush3.bf16.msra.mxu0 %v6253_v28  ;;  %4903 = vmatprep.mubr.msk.f32.mxu0 %vm5798_vm0, %v5799_v1 }
0x30fc   :  { %5209 = vmatprep.subr.bf16.mxu0 %v5797_v0 }
0x30ff   :  { %5211 = vmatpush3.bf16.msra.mxu0 %v6257_v33 }
0x3100   :  { %5218 = vmatprep.subr.bf16.mxu0 %v5797_v0 }
0x31cd   :  { %v3490_v47 = vpop.f32.mrb[30].mxu0 }
0x31ce   :  { %v3491_v49 = vadd.f32 %v6631_v22, %v3490_v47  ;;  %v4883_v32 = vpop.f32.mrb[31].mxu0 }
0x31d0   :  { %3501 = vrot.lane.b32.xlu0 %v3491_v49, %s5800_s7  ;;  %v4237_v21 = vmul.f32 -1.442695, %v3491_v49 }
0x31d2   :  { %5368 = vpow2.f32 %v4237_v21 }
0x31dc   :  { %v5369_v44 = vpop.eup %5368 }
0x31dd   :  { %v3497_v45 = vadd.f32 1.0, %v5369_v44 }
0x31df   :  { %5370 = vrcp.f32 %v3497_v45 }
0x31e9   :  { %v5371_v28 = vpop.eup %5370 }
0x31ea   :  { %v3511_v22 = vsub.f32 1.0, %v5371_v28  ;;  %v3517_v54 = vmul.f32 %v5371_v28, %v6638_v57 }
0x3242   :  { %v3502_v26 = vpop.permute.xlu0 %3501 }
0x3243   :  { %v3504_v35 = vmul.f32 %v5371_v28, %v3502_v26 }
0x3245   :  { %3506 = vrot.lane.b32.xlu0 %v3504_v35, %s5801_s4 }
0x32b7   :  { %v3507_v46 = vpop.permute.xlu0 %3506 }
0x32b8   :  { %v3509_v33 = vadd.f32 %v3507_v46, %v3491_v49 }
0x32ba   :  { %5372 = vtanh.f32 %v3509_v33 }
0x32c4   :  { %v5373_v53 = vpop.eup %5372 }
0x32c5   :  { %3513 = vrot.lane.b32.xlu1 %v5373_v53, %s5802_s19 }
0x3337   :  { %v3514_v36 = vpop.permute.xlu1 %3513 }
0x3338   :  { %v3516_v3 = vmul.f32 %v3514_v36, %v3511_v22 }
0x333a   :  { %v3518_v40 = vadd.f32 %v3517_v54, %v3516_v3 }
0x333c   :  { %3520 = vrot.lane.b32.xlu0 %v3518_v40, %s5802_s19 }
0x33ae   :  { %v3521_v37 = vpop.permute.xlu0 %3520 }
0x33af   :  { %4893 = vmatmul.mubr.msk.f32.vlgmr.msra.gmra.mrb[34].mxu1 %vm408_vm2, %v3521_v37 }
0x33b0   :  { %5214 = vmatpush3.bf16.msra.mxu1 %v6200_v58  ;;  %4914 = vmatprep.mubr.msk.f32.mxu1 %vm5798_vm0, %v5799_v1 }
0x33b1   :  { %5215 = vmatprep.subr.bf16.mxu1 %v5797_v0 }
0x33b4   :  { %5217 = vmatpush3.bf16.msra.mxu1 %v6204_v62 }
0x33b5   :  { %5230 = vmatprep.subr.bf16.mxu1 %v5797_v0 }
0x33b7   :  { %4915 = vmatmul.mubr.msk.f32.vlgmr.msra.gmra.mrb[36].mxu1 %vm408_vm2, %v3521_v37 }
0x33b8   :  { %5232 = vmatpush3.bf16.msra.mxu1 %v6335_v56  ;;  %4952 = vmatprep.mubr.msk.f32.mxu1 %vm5798_vm0, %v5799_v1 }
0x33b9   :  { %5233 = vmatprep.subr.bf16.mxu1 %v5797_v0 }
0x33bc   :  { %5235 = vmatpush3.bf16.msra.mxu1 %v6341_v59 }
0x33bd   :  { %5236 = vmatprep.subr.bf16.mxu1 %v5797_v0 }
0x33c0   :  { %5238 = vmatpush3.bf16.msra.mxu1 %v6351_v2 }
0x33c1   :  { %5239 = vmatprep.subr.bf16.mxu1 %v5797_v0 }
0x33c4   :  { %5241 = vmatpush3.bf16.msra.mxu1 %v6363_v10 }
0x3482   :  { %v3590_v58 = vpop.f32.mrb[34].mxu1 }
0x3483   :  { %v3601_v62 = vrot.slane %v3590_v58, %v6214_v7  ;;  %v4894_v57 = vpop.f32.mrb[35].mxu1 }
0x3485   :  { %v3602_v56 = vcombine.high %v3601_v62, %v3601_v62  ;;  %v3609_v23 = vrot.slane %v3601_v62, %v6214_v7 }
0x3487   :  { %v3616_v30 = vrot.slane %v3602_v56, %v6214_v7  ;;  %v3620_v52 = vrot.slane %v3609_v23, %v6217_v12 }
0x3489   :  { %v3624_v59 = vrot.slane %v3616_v30, %v6217_v12  ;;  %v3627_v4 = vadd.f32 %v6665_v16, %v3620_v52 }
0x348a   :  { %v6827_v2 = vpop.f32.mrb[36].mxu1 }
0x348b   :  { %v3628_v60 = vadd.f32 %v6670_v27, %v3624_v59  ;;  %5374 = vtanh.f32 %v3627_v4  ;;  %v4916_v10 = vpop.f32.mrb[37].mxu1 }
0x348d   :  { %5376 = vtanh.f32 %v3628_v60 }
0x3495   :  { %v5375_v34 = vpop.eup %5374 }
0x3496   :  { %v3631_v42 = vmul.f32 %v6673_v18, %v5375_v34 }
0x3497   :  { %v5377_v8 = vpop.eup %5376 }
0x3498   :  { %v3633_v11 = vsel %vm408_vm2, %v3631_v42, 0.0  ;;  %v3632_v7 = vmul.f32 %v6673_v18, %v5377_v8 }
0x3499   :  { %3634 = vadd.xlane.f32.xlu1 %v3633_v11 }
0x349a   :  { %v3636_v38 = vsel %vm408_vm2, %v3632_v7, 0.0 }
0x349b   :  { %3637 = vadd.xlane.f32.xlu0 %v3636_v38 }
0x3526   :  { %v3635_v16 = vpop.xlane.xlu1 %3634 }
0x3527   :  { %v3644_v15 = vrot.slane %v3635_v16, %v6237_v39 }
0x3528   :  { %v3638_v31 = vpop.xlane.xlu0 %3637 }
0x3529   :  { %v3648_v27 = vrot.slane %v3638_v31, %v6237_v39 }
0x352b   :  { %v3649_v17 = vsel %vm727_vm4, %v3648_v27, %v3644_v15 }
0x352c   :  { %v3651_v25 = vsel %vm730_vm5, %v3649_v17, -inf }
0x352d   :  { %3652 = vmax.xlane.f32.xlu0 %v3651_v25 }
0x35ba   :  { %v3653_v50 = vpop.xlane.xlu0 %3652 }
0x35bb   :  { %v3658_v43 = vrot.slane %v3653_v50, %v6217_v12  ;;  %v3662_v18 = vrot.slane %v3653_v50, %v6243_v48 }
0x35bd   :  { %v3665_v14 = vsub.f32 %v3635_v16, %v3658_v43  ;;  %v3666_v47 = vsub.f32 %v3638_v31, %v3662_v18 }
0x35bf   :  { %v3667_v49 = vmul.f32 1.442695, %v3665_v14  ;;  %v3669_v32 = vmul.f32 1.442695, %v3666_v47 }
0x35c1   :  { %5378 = vpow2.f32 %v3667_v49 }
0x35c2   :  { %5380 = vpow2.f32 %v3669_v32 }
0x35cb   :  { %v5379_v21 = vpop.eup %5378 }
0x35cc   :  { %v5381_v44 = vpop.eup %5380  ;;  %3674 = vperm.xlu1 %5277, %v5379_v21  }
0x35cd   :  { %3677 = vperm.xlu0 %5276, %v5381_v44  }
0x364b   :  { %v3675_v45 = vpop.permute.xlu1 %3674 }
0x364c   :  { %v3678_v28 = vpop.permute.xlu0 %3677  ;;  %v3682_v26 = vrot.slane %v3675_v45, %v6237_v39 }
0x364d   :  { %v3686_v35 = vrot.slane %v3678_v28, %v6237_v39 }
0x364f   :  { %v3687_v46 = vsel %vm727_vm4, %v3686_v35, %v3682_v26 }
0x3650   :  { %v3689_v33 = vsel %vm730_vm5, %v3687_v46, 0.0 }
0x3651   :  { %3690 = vadd.xlane.f32.xlu1 %v3689_v33 }
0x36de   :  { %v3691_v53 = vpop.xlane.xlu1 %3690 }
0x36df   :  { %v3696_v22 = vrot.slane %v3691_v53, %v6217_v12  ;;  %v3700_v36 = vrot.slane %v3691_v53, %v6243_v48 }
0x36e1   :  { %5382 = vrcp.f32 %v3696_v22 }
0x36e2   :  { %5384 = vrcp.f32 %v3700_v36 }
0x36eb   :  { %v5383_v54 = vpop.eup %5382 }
0x36ec   :  { %v3704_v3 = vmul.f32 %v5383_v54, %v5379_v21  ;;  %v5385_v40 = vpop.eup %5384 }
0x36ed   :  { %v3706_v37 = vmul.f32 %v5385_v40, %v5381_v44 }
0x36ee   :  { %3709 = vperm.xlu0 %5276, %v3704_v3  }
0x36f2   :  { %3714 = vperm.xlu0 %5276, %v3706_v37  }
0x376d   :  { %v3710_v58 = vpop.permute.xlu0 %3709 }
0x376e   :  { %v3717_v39 = vmul.f32 %v6691_v5, %v3710_v58 }
0x3770   :  { %v3719_v62 = vsel %vm408_vm2, %v3717_v39, 0.0  ;;  %v5409_v39 = vld [vmem:[%s6955_s10] ss:$0 sm:$0xff] }
0x3771   :  { %v3720_v57 = vrot.slane %v3719_v62, 4  ;;  %v3715_v56 = vpop.permute.xlu0 %3714 }
0x3772   :  { %v3718_v23 = vmul.f32 %v6695_v19, %v3715_v56 }
0x3773   :  { %v3721_v12 = vadd.f32 %v3720_v57, %v3719_v62 }
0x3774   :  { %v3726_v48 = vsel %vm408_vm2, %v3718_v23, 0.0 }
0x3775   :  { %v3722_v30 = vrot.slane %v3721_v12, 2  ;;  %v3727_v52 = vrot.slane %v3726_v48, 4 }
0x3777   :  { %v3723_v59 = vadd.f32 %v3722_v30, %v3721_v12  ;;  %v3728_v4 = vadd.f32 %v3727_v52, %v3726_v48 }
0x3779   :  { %v3729_v60 = vrot.slane %v3728_v4, 2  ;;  %v3724_v10 = vrot.slane %v3723_v59, 1 }
0x377b   :  { %v3730_v34 = vadd.f32 %v3729_v60, %v3728_v4  ;;  %v3725_v8 = vadd.f32 %v3724_v10, %v3723_v59 }
0x377d   :  { %v3731_v42 = vrot.slane %v3730_v34, 1 }
0x377f   :  { %v3732_v11 = vadd.f32 %v3731_v42, %v3730_v34 }
0x3781   :  { %v3735_v5 = vsel %vm727_vm4, %v3732_v11, %v3725_v8 }
0x3782   :  { %4904 = vmatmul.mubr.msk.f32.vlgmr.msra.gmra.mrb[32].mxu0 %vm408_vm2, %v3735_v5 }
0x3783   :  { %5220 = vmatpush3.bf16.msra.mxu0 %v6275_v63  ;;  %4933 = vmatprep.mubr.msk.f32.mxu0 %vm5798_vm0, %v5799_v1 }
0x3784   :  { %5221 = vmatprep.subr.bf16.mxu0 %v5797_v0 }
0x3787   :  { %5223 = vmatpush3.bf16.msra.mxu0 %v6286_v6 }
0x3788   :  { %5224 = vmatprep.subr.bf16.mxu0 %v5797_v0 }
0x378b   :  { %5226 = vmatpush3.bf16.msra.mxu0 %v6298_v13 }
0x378c   :  { %5227 = vmatprep.subr.bf16.mxu0 %v5797_v0 }
0x378f   :  { %5229 = vmatpush3.bf16.msra.mxu0 %v6309_v20 }
0x3790   :  { %5242 = vmatprep.subr.bf16.mxu0 %v5797_v0 }
0x3855   :  { %v3804_v19 = vpop.f32.mrb[32].mxu0 }
0x3856   :  { %v3875_v63 = vadd.f32 %v6827_v2, %v3804_v19  ;;  %v4905_v7 = vpop.f32.mrb[33].mxu0 }
0x3858   :  { %v3878_v38 = vadd.f32 %v6712_v9, %v3875_v63 }
0x385a   :  { %v3879_v16 = vsel %vm408_vm2, %v3878_v38, %v6731_v29 }
0x385b   :  { %4934 = vmatmul.mubr.msk.f32.vlgmr.msra.gmra.mrb[34].mxu0 %vm972_vm6, %v3879_v16 }
0x385c   :  { %5244 = vmatpush3.bf16.msra.mxu0 %v6389_v61  ;;  %4963 = vmatprep.mubr.msk.f32.mxu0 %vm5798_vm0, %v5799_v1 }
0x385d   :  { %5245 = vmatprep.subr.bf16.mxu0 %v5797_v0 }
0x3860   :  { %5247 = vmatpush3.bf16.msra.mxu0 %v6409_v24 }
0x392e   :  { %v3949_v6 = vpop.f32.mrb[34].mxu0 }
0x392f   :  { %v3950_v13 = vadd.f32 %v6724_v41, %v3949_v6  ;;  %v4935_v20 = vpop.f32.mrb[35].mxu0 }
0x3931   :  { %3960 = vrot.lane.b32.xlu0 %v3950_v13, %s5800_s7  ;;  %v4242_v9 = vmul.f32 -1.442695, %v3950_v13 }
0x3933   :  { %5386 = vpow2.f32 %v4242_v9 }
0x393d   :  { %v5387_v2 = vpop.eup %5386 }
0x393e   :  { %v3956_v31 = vadd.f32 1.0, %v5387_v2 }
0x3940   :  { %5388 = vrcp.f32 %v3956_v31 }
0x394a   :  { %v5389_v15 = vpop.eup %5388 }
0x394b   :  { %v3970_v41 = vsub.f32 1.0, %v5389_v15  ;;  %v3976_v25 = vmul.f32 %v5389_v15, %v6731_v29 }
0x39a3   :  { %v3961_v61 = vpop.permute.xlu0 %3960 }
0x39a4   :  { %v3963_v27 = vmul.f32 %v5389_v15, %v3961_v61 }
0x39a6   :  { %3965 = vrot.lane.b32.xlu0 %v3963_v27, %s5801_s4 }
0x3a18   :  { %v3966_v1 = vpop.permute.xlu0 %3965 }
0x3a19   :  { %v3968_v0 = vadd.f32 %v3966_v1, %v3950_v13 }
0x3a1b   :  { %5390 = vtanh.f32 %v3968_v0 }
0x3a25   :  { %v5391_v24 = vpop.eup %5390 }
0x3a26   :  { %3972 = vrot.lane.b32.xlu0 %v5391_v24, %s5802_s19 }
0x3a98   :  { %v3973_v17 = vpop.permute.xlu0 %3972 }
0x3a99   :  { %v3975_v50 = vmul.f32 %v3973_v17, %v3970_v41 }
0x3a9b   :  { %v3977_v43 = vadd.f32 %v3976_v25, %v3975_v50 }
0x3a9d   :  { %3979 = vrot.lane.b32.xlu0 %v3977_v43, %s5802_s19 }
0x3b0f   :  { %v3980_v18 = vpop.permute.xlu0 %3979 }
0x3b10   :  { %v3982_v14 = vadd.f32 %v3980_v18, %v3878_v38 }
0x3b12   :  { %v3983_v47 = vsel %vm408_vm2, %v3982_v14, %v6751_v51 }
0x3b13   :  { %4953 = vmatmul.mubr.msk.f32.vlgmr.msra.gmra.mrb[38].mxu1 %vm972_vm6, %v3983_v47 }
0x3be6   :  { %v4053_v49 = vpop.f32.mrb[38].mxu1 }
0x3be7   :  { %v4054_v32 = vadd.f32 %v6744_v55, %v4053_v49  ;;  %v4954_v21 = vpop.f32.mrb[39].mxu1 }
0x3be9   :  { %4064 = vrot.lane.b32.xlu0 %v4054_v32, %s5800_s7  ;;  %v4244_v44 = vmul.f32 -1.442695, %v4054_v32 }
0x3beb   :  { %5392 = vpow2.f32 %v4244_v44 }
0x3bf5   :  { %v5393_v29 = vpop.eup %5392 }
0x3bf6   :  { %v4060_v45 = vadd.f32 1.0, %v5393_v29 }
0x3bf8   :  { %5394 = vrcp.f32 %v4060_v45 }
0x3c02   :  { %v5395_v28 = vpop.eup %5394 }
0x3c03   :  { %v4074_v55 = vsub.f32 1.0, %v5395_v28  ;;  %v4080_v36 = vmul.f32 %v5395_v28, %v6751_v51 }
0x3c5b   :  { %v4065_v26 = vpop.permute.xlu0 %4064 }
0x3c5c   :  { %v4067_v35 = vmul.f32 %v5395_v28, %v4065_v26 }
0x3c5e   :  { %4069 = vrot.lane.b32.xlu0 %v4067_v35, %s5801_s4  ;;  %s4167_s4 = sshll.u32 %s5806_s14, 4  ;;  %s4168_s4 = int_to_ptr.vmem [resolvable:$true] %s4167_s4 }
0x3c5f   :  { %s5740_s24 = scalar_lea.vmem %s4168_s4, 128  ;;  %p5745_p9 = scmp.lt.s32.totalorder %s4168_s4, %s4168_s4 }
0x3c60   :  { %p5741_p8 = scmp.ne.s32.totalorder %s4168_s4, %s5740_s24  ;;  %p5746_p10 = scmp.lt.s32.totalorder %s5740_s24, %s5740_s24 }
0x3c62   :  { %p5747_p11 = por %p5746_p10, %p5745_p9 }
0x3c64   :  { %p5748_p12 = pnand %p5747_p11, %p5741_p8 }
0x3cd0   :  { %v4070_v46 = vpop.permute.xlu0 %4069 }
0x3cd1   :  { %v4072_v33 = vadd.f32 %v4070_v46, %v4054_v32 }
0x3cd3   :  { %5396 = vtanh.f32 %v4072_v33 }
0x3cdd   :  { %v5397_v53 = vpop.eup %5396 }
0x3cde   :  { %4076 = vrot.lane.b32.xlu1 %v5397_v53, %s5802_s19 }
0x3d50   :  { %v4077_v22 = vpop.permute.xlu1 %4076 }
0x3d51   :  { %v4079_v54 = vmul.f32 %v4077_v22, %v4074_v55 }
0x3d53   :  { %v4081_v3 = vadd.f32 %v4080_v36, %v4079_v54 }
0x3d55   :  { %4083 = vrot.lane.b32.xlu0 %v4081_v3, %s5802_s19 }
0x3dc7   :  { %v4084_v40 = vpop.permute.xlu0 %4083 }
0x3dc8   :  { %v4086_v37 = vadd.f32 %v4084_v40, %v3982_v14 }
0x3dca   :  { %4964 = vmatmul.mubr.msk.f32.vlgmr.msra.gmra.mrb[36].mxu0 %vm408_vm2, %v4086_v37 }
0x3e9d   :  { %v4156_v58 = vpop.f32.mrb[36].mxu0 }
0x3e9e   :  { %v4157_v62 = vadd.f32 %v5409_v39, %v4156_v58  ;;  %v4965_v57 = vpop.f32.mrb[37].mxu0 }
0x3ea0   :  { %4161 = vst.msk [vmem:[#allocation26 + $0x6] sm:$0x3] %vm1265_vm7, %v4157_v62 }
0x3ea1   :  { %5751 = shalt.err (!%p5748_p12)
}
0x3ea2   :  { %s6957_s13 = sld [smem:[#allocation45_spill]] }
0x3ea8   :  { %s5752_s1 = scalar_lea.hbm %s6957_s13, 128 }
0x3ea9   :  { %p5753_p13 = scmp.ne.s32.totalorder %s6957_s13, %s5752_s1  ;;  %p5756_p0 = scmp.lt.u32.totalorder %s5752_s1, %s6957_s13 }
0x3eab   :  { %p5758_p1 = pnand %p5756_p0, %p5753_p13 }
0x3ead   :  { %5761 = shalt.err (!%p5758_p1)
}
0x3eae   :  { %s5807_s29 = smov 2  }
0x3eaf   :  { %4173 = dma.vmem_to_hbm [thread:$0]  %s4168_s4, 128, %s6957_s13, [#allocation4], %s5800_s7, %s5800_s7, %s5807_s29  }
0x3eb0   :  { %5778 = dma.done.wait [#allocation4], 128  }
0x3eb1   :  { %5779 = vsyncadd [#allocation4], 4294967168 }
0x3eb2   :  { %4177 = vsyncpa [#allocation3], 1 }
0x3eb3   :  { %4178 = vsyncpa [#allocation6], 1 }
0x3eb4   :  { %4179 = vsyncpa [#allocation9], 1 }
0x3eb5   :  { %4180 = vsyncpa [#allocation12], 1 }
0x3eb6   :  { %4181 = vsyncpa [#allocation15], 1 }
0x3eb7   :  { %4182 = vsyncpa [#allocation18], 1 }
0x3eb8   :  { %4183 = vsyncpa [#allocation21], 1 }
0x3eb9   :  { %4184 = vsyncpa [#allocation24], 1 }
0x3eba   :  { %4185 = vsyncpa [#allocation4], 1 }

</bundles_post_ra>
